<compile_context>
chip_gen: v5e
topology: v5e:2x2
jax: 0.10.0
libtpu: 0.0.40
codegen_flags: <defaults>
</compile_context>

<pallas_src>
import functools
import math

import numpy as np

import jax
import jax.numpy as jnp
from jax.experimental import pallas as pl
from jax.experimental.pallas import tpu as pltpu

_BN_EPS = 1e-5
_HIGHEST = jax.lax.Precision.HIGHEST


def _ceil_to(x, m):
    return ((x + m - 1) // m) * m


# ----------------------------------------------------------------------------
# Fused Pallas kernel: all Res2net blocks, fully VMEM-resident.
# ----------------------------------------------------------------------------
def _first_resnet_kernel(x_ref, mask_ref, w1_ref, b1_ref, wc_ref, bc_ref,
                         w3_ref, b3_ref, o_ref, taps_ref, cat_ref, *,
                         blocks, nums, scale, wp, img_w):
    f32 = jnp.float32
    hwp = x_ref.shape[1]                      # lanes (k images * padded HW)
    use_bf16 = (w1_ref.dtype == jnp.bfloat16)

    def mm(w, rhs):
        # Performance mode: single bf16 MXU pass (weights pre-cast, RHS cast
        # at the dot so activations stay f32 on the VPU — v5e has no bf16 VALU).
        if use_bf16:
            return jnp.dot(w, rhs.astype(jnp.bfloat16),
                           preferred_element_type=f32)
        # Accuracy mode (f32 weights): reference-level precision.
        return jnp.dot(w, rhs, preferred_element_type=f32, precision=_HIGHEST)

    x = x_ref[...]                            # (Cp, hwp) f32

    # NOTE: static unroll is fine for small `blocks`; for large `blocks` move
    # this to a grid axis / fori_loop (see header comment).
    for blk in range(blocks):
        residual = x

        # conv1 (1x1) + BN + ReLU; output rows are group-padded (scale groups
        # of wp rows, valid channels in the first `width` rows of each group).
        out1 = jnp.maximum(mm(w1_ref[blk, :, :], x) + b1_ref[blk, :, :], 0.0)

        sp = None
        for i in range(nums):
            grp = out1[i * wp:(i + 1) * wp, :]
            sp = grp if i == 0 else sp + grp

            # 3x3 conv (pad=1) as one GEMM: write 9 shifted copies of sp into
            # a persistent VMEM scratch (K = 9*wp rows), masking each tap with
            # the pre-broadcast mask slice (a plain load, no broadcast op).
            for kh in range(3):
                for kw in range(3):
                    t = kh * 3 + kw
                    off = (kh - 1) * img_w + (kw - 1)
                    if off == 0:
                        shifted = sp
                    else:
                        # shifted[:, p] = sp[:, (p + off) mod hwp]
                        shifted = pltpu.roll(sp, shift=(-off) % hwp, axis=1)
                    taps_ref[t * wp:(t + 1) * wp, :] = (
                        shifted * mask_ref[t * wp:(t + 1) * wp, :])

            sp = jnp.maximum(
                mm(wc_ref[blk, i, :, :], taps_ref[...]) + bc_ref[blk, i, :, :],
                0.0)
            cat_ref[i * wp:(i + 1) * wp, :] = sp

        if scale != 1:
            cat_ref[nums * wp:(nums + 1) * wp, :] = \
                out1[nums * wp:(nums + 1) * wp, :]

        # conv3 (1x1) + BN, residual add, ReLU.
        out3 = mm(w3_ref[blk, :, :], cat_ref[...]) + b3_ref[blk, :, :]
        x = jnp.maximum(out3 + residual, 0.0)

    o_ref[...] = x


# ----------------------------------------------------------------------------
# Forward wrapper: boundary layout plumbing + single pallas_call.
# ----------------------------------------------------------------------------
def first_resnet_forward(x_nchw, packed, *, images_per_step=1):
    B, C, H, W = x_nchw.shape
    w1, b1, wc, bc, w3, b3 = (packed[k] for k in
                              ("w1", "b1", "wc", "bc", "w3", "b3"))
    blocks, Sp, Cp = w1.shape
    _, nums, Wp, _ = wc.shape
    scale = Sp // Wp
    HW = H * W
    HWp = _ceil_to(HW, 128)

    # Image fusion: k images per grid step (wider lane blocks for v5e/v6e;
    # keep k=1 so the grid stays 2-way parallel for v7x's two TensorCores).
    k = max(1, int(images_per_step))
    Bp = _ceil_to(B, k)
    lanes = k * HWp

    # NCHW -> (C_pad, Bp * HW_pad): channels in sublanes, spatial in lanes.
    xc = jnp.transpose(x_nchw, (1, 0, 2, 3)).reshape(C, B, HW)
    xc = jnp.pad(xc, ((0, Cp - C), (0, Bp - B), (0, HWp - HW)))
    xc = xc.reshape(Cp, Bp * HWp)

    # Compile-time constant pre-broadcast 3x3 tap-validity mask of shape
    # (9*Wp, lanes): row block t holds tap t's validity, tiled per fused image.
    # It zeroes cross-image / wrap-around reads of pltpu.roll and the spatially
    # padded columns, so no in-kernel broadcast is ever needed.
    pos = np.arange(HWp)
    row, col = pos // W, pos % W
    base = []
    for kh in range(3):
        for kw in range(3):
            valid = ((row + kh - 1 >= 0) & (row + kh - 1 < H)
                     & (col + kw - 1 >= 0) & (col + kw - 1 < W) & (pos < HW))
            base.append(valid)
    base = np.stack(base).astype(np.float32)          # (9, HWp)
    fullmask = np.repeat(base, Wp, axis=0)            # (9*Wp, HWp)
    fullmask = np.tile(fullmask, (1, k))              # (9*Wp, lanes)
    fullmask = jnp.asarray(fullmask)

    kernel = functools.partial(_first_resnet_kernel, blocks=blocks, nums=nums,
                               scale=scale, wp=Wp, img_w=W)

    def bcast_spec(arr):
        n = arr.ndim
        return pl.BlockSpec(arr.shape, lambda b, _n=n: (0,) * _n)

    # Advisory cost hint so XLA overlaps the boundary transpose/pad with us.
    flops = int(2 * B * HW * blocks * (Sp * Cp + nums * Wp * 9 * Wp + Cp * Sp))
    weight_bytes = int(sum(int(np.prod(a.shape)) * a.dtype.itemsize
                           for a in (w1, b1, wc, bc, w3, b3)))
    bytes_accessed = int(2 * Cp * Bp * HWp * 4 + weight_bytes
                         + int(np.prod(fullmask.shape)) * 4)

    out = pl.pallas_call(
        kernel,
        grid=(Bp // k,),
        in_specs=[
            pl.BlockSpec((Cp, lanes), lambda b: (0, b)),   # activations
            bcast_spec(fullmask),
            bcast_spec(w1), bcast_spec(b1),
            bcast_spec(wc), bcast_spec(bc),
            bcast_spec(w3), bcast_spec(b3),
        ],
        out_specs=pl.BlockSpec((Cp, lanes), lambda b: (0, b)),
        out_shape=jax.ShapeDtypeStruct((Cp, Bp * HWp), jnp.float32),
        scratch_shapes=[
            pltpu.VMEM((9 * Wp, lanes), jnp.float32),      # stacked 3x3 taps
            pltpu.VMEM((Sp, lanes), jnp.float32),          # conv3 input (cat)
        ],
        compiler_params=pltpu.CompilerParams(
            dimension_semantics=("parallel",)),
        cost_estimate=pl.CostEstimate(flops=flops, transcendentals=0,
                                      bytes_accessed=bytes_accessed),
    )(xc, fullmask, w1, b1, wc, bc, w3, b3)

    y = out.reshape(Cp, Bp, HWp)[:C, :B, :HW].reshape(C, B, H, W)
    return jnp.transpose(y, (1, 0, 2, 3))


# ----------------------------------------------------------------------------
# One-time parameter folding / packing (hoisted out of the forward path).
# ----------------------------------------------------------------------------
def _fold_bn(bn):
    g, b, m, v = (np.asarray(t, np.float32) for t in bn)
    s = g / np.sqrt(v + _BN_EPS)
    return s, b - m * s


def pack_params(params, weights_dtype=jnp.bfloat16):
    """Fold BN, transpose, pad channel groups; weights cast to `weights_dtype`
    (bf16 default = single MXU pass, half the weight VMEM/DMA). Biases stay f32."""
    width, scale = params["width"], params["scale"]
    block_list = params["blocks"]
    blocks = len(block_list)
    nums = 1 if scale == 1 else scale - 1
    C = int(block_list[0]["conv3_w"].shape[0])
    Wp = _ceil_to(width, 8)
    Sp = scale * Wp
    Cp = _ceil_to(C, 8)

    W1 = np.zeros((blocks, Sp, Cp), np.float32)
    B1 = np.zeros((blocks, Sp, 1), np.float32)
    WC = np.zeros((blocks, nums, Wp, 9 * Wp), np.float32)
    BC = np.zeros((blocks, nums, Wp, 1), np.float32)
    W3 = np.zeros((blocks, Cp, Sp), np.float32)
    B3 = np.zeros((blocks, Cp, 1), np.float32)

    for bi, blk in enumerate(block_list):
        s1, t1 = _fold_bn(blk["bn1"])
        w1 = np.asarray(blk["conv1_w"], np.float32)[:, :, 0, 0] * s1[:, None]
        for g in range(scale):
            W1[bi, g * Wp:g * Wp + width, :C] = w1[g * width:(g + 1) * width]
            B1[bi, g * Wp:g * Wp + width, 0] = t1[g * width:(g + 1) * width]

        for i in range(nums):
            si, ti = _fold_bn(blk["bns"][i])
            wci = np.asarray(blk["convs_w"][i], np.float32) * si[:, None, None, None]
            for kh in range(3):
                for kw in range(3):
                    t = kh * 3 + kw
                    WC[bi, i, :width, t * Wp:t * Wp + width] = wci[:, :, kh, kw]
            BC[bi, i, :width, 0] = ti

        s3, t3 = _fold_bn(blk["bn3"])
        w3 = np.asarray(blk["conv3_w"], np.float32)[:, :, 0, 0] * s3[:, None]
        for g in range(scale):
            W3[bi, :C, g * Wp:g * Wp + width] = w3[:, g * width:(g + 1) * width]
        B3[bi, :C, 0] = t3

    return {
        "w1": jnp.asarray(W1, weights_dtype), "b1": jnp.asarray(B1),
        "wc": jnp.asarray(WC, weights_dtype), "bc": jnp.asarray(BC),
        "w3": jnp.asarray(W3, weights_dtype), "b3": jnp.asarray(B3),
    }


# ----------------------------------------------------------------------------
# Deterministic raw parameters (PyTorch layouts) + plain-JAX reference.
# ----------------------------------------------------------------------------
def init_params(key, out_channels, baseWidth, init_feature, scale, blocks):
    # First_resnet builds Res2net_backbone_f(out_channels -> out_channels);
    # its own `in_channels` argument is unused by the module.
    width = int(math.floor(out_channels * (baseWidth / init_feature)))
    nums = 1 if scale == 1 else scale - 1
    keys = iter(jax.random.split(key, 256))

    def w_init(shape, fan_in):
        return jax.random.normal(next(keys), shape, jnp.float32) / np.sqrt(fan_in)

    def bn_init(c):
        g = 1.0 + 0.1 * jax.random.normal(next(keys), (c,), jnp.float32)
        b = 0.1 * jax.random.normal(next(keys), (c,), jnp.float32)
        return (g, b, jnp.zeros((c,), jnp.float32), jnp.ones((c,), jnp.float32))

    C = out_channels
    block_list = []
    for _ in range(blocks):
        block_list.append({
            "conv1_w": w_init((width * scale, C, 1, 1), C),
            "bn1": bn_init(width * scale),
            "convs_w": [w_init((width, width, 3, 3), width * 9)
                        for _ in range(nums)],
            "bns": [bn_init(width) for _ in range(nums)],
            "conv3_w": w_init((C, width * scale, 1, 1), width * scale),
            "bn3": bn_init(C),
        })
    return {"width": width, "scale": scale, "blocks": block_list}


def _bn_eval_ref(x, bn):
    g, b, m, v = bn
    s = g / jnp.sqrt(v + _BN_EPS)
    return x * s[None, :, None, None] + (b - m * s)[None, :, None, None]


def _conv_ref(x, w, padding=0):
    return jax.lax.conv_general_dilated(
        x, w, window_strides=(1, 1), padding=[(padding, padding)] * 2,
        dimension_numbers=("NCHW", "OIHW", "NCHW"), precision=_HIGHEST)


def _res2net_block_ref(x, blk, width, scale):
    residual = x
    out = jax.nn.relu(_bn_eval_ref(_conv_ref(x, blk["conv1_w"]), blk["bn1"]))
    spx = [out[:, i * width:(i + 1) * width] for i in range(scale)]
    nums = 1 if scale == 1 else scale - 1
    cat = None
    sp = None
    for i in range(nums):
        sp = spx[i] if i == 0 else sp + spx[i]
        sp = jax.nn.relu(_bn_eval_ref(_conv_ref(sp, blk["convs_w"][i], padding=1),
                                      blk["bns"][i]))
        cat = sp if i == 0 else jnp.concatenate([cat, sp], axis=1)
    if scale != 1:
        cat = jnp.concatenate([cat, spx[nums]], axis=1)
    out = _bn_eval_ref(_conv_ref(cat, blk["conv3_w"]), blk["bn3"])
    return jax.nn.relu(out + residual)


def first_resnet_ref(x, params):
    for blk in params["blocks"]:
        x = _res2net_block_ref(x, blk, params["width"], params["scale"])
    return x


# ----------------------------------------------------------------------------
if __name__ == "__main__":
    # First_resnet(in_channels=16, out_channels=16, baseWidth=4, init_feature=8,
    #              scale=4, blocks=2)  =>  width = 8, nums = 3.
    # Forward input has out_channels channels (the blocks map C -> C).
    B, C, H, W = 2, 16, 16, 16
    baseWidth, init_feature, scale, blocks = 4, 8, 4, 2

    key = jax.random.PRNGKey(0)
    kp, kx = jax.random.split(key)
    params = init_params(kp, C, baseWidth, init_feature, scale, blocks)
    x = jax.random.normal(kx, (B, C, H, W), jnp.float32)

    # Plain-JAX (XLA conv, HIGHEST) reference of the module.
    y_ref = first_resnet_ref(x, params)

    # 1) Accuracy mode (f32 weights, HIGHEST matmuls): structural correctness.
    packed_f32 = pack_params(params, weights_dtype=jnp.float32)
    y_f32 = jax.jit(first_resnet_forward)(x, packed_f32)
    jax.block_until_ready(y_f32)
    assert y_f32.shape == (B, C, H, W)
    assert bool(jnp.all(jnp.isfinite(y_f32)))
    err_f32 = float(jnp.max(jnp.abs(y_f32 - y_ref)))
    assert err_f32 < 3e-2, f"f32 path max abs err {err_f32}"

    # 2) Performance mode (default): bf16 weights, single-pass MXU matmuls.
    packed_bf16 = pack_params(params)
    y_bf16 = jax.jit(first_resnet_forward)(x, packed_bf16)
    jax.block_until_ready(y_bf16)
    assert bool(jnp.all(jnp.isfinite(y_bf16)))
    err_bf16 = float(jnp.max(jnp.abs(y_bf16 - y_ref)))
    assert err_bf16 < 1.5e-1, f"bf16 path max abs err {err_bf16}"

    # 3) Image-fusion path (v5e/v6e: wider lane blocks, fewer grid steps).
    fwd_fused = jax.jit(functools.partial(first_resnet_forward,
                                          images_per_step=2))
    y_fused = fwd_fused(x, packed_f32)
    jax.block_until_ready(y_fused)
    err_fused = float(jnp.max(jnp.abs(y_fused - y_ref)))
    assert err_fused < 3e-2, f"fused path max abs err {err_fused}"

    print("KERNEL_OK")
</pallas_src>

<mosaic_0001>
module attributes {stable_mosaic.version = 11 : i64} {
  func.func @_first_resnet_kernel(%arg0: i32, %arg1: memref<16x256xf32, #tpu.memory_space<vmem>>, %arg2: memref<72x256xf32, #tpu.memory_space<vmem>>, %arg3: memref<2x32x16xf32, #tpu.memory_space<vmem>>, %arg4: memref<2x32x1xf32, #tpu.memory_space<vmem>>, %arg5: memref<2x3x8x72xf32, #tpu.memory_space<vmem>>, %arg6: memref<2x3x8x1xf32, #tpu.memory_space<vmem>>, %arg7: memref<2x16x32xf32, #tpu.memory_space<vmem>>, %arg8: memref<2x16x1xf32, #tpu.memory_space<vmem>>, %arg9: memref<16x256xf32, #tpu.memory_space<vmem>>, %arg10: memref<72x256xf32, #tpu.memory_space<vmem>>, %arg11: memref<32x256xf32, #tpu.memory_space<vmem>>) attributes {dimension_semantics = [#tpu.dimension_semantics<parallel>], iteration_bounds = array<i64: 2>, scalar_prefetch = 0 : i64, scratch_operands = 2 : i64, tpu.core_type = #tpu.core_type<tc>, window_params = [{transform_indices = @transform_0, window_bounds = array<i64: 16, 256>}, {pipeline_mode = #tpu.pipeline_mode<synchronous>, transform_indices = @transform_1, window_bounds = array<i64: 72, 256>}, {pipeline_mode = #tpu.pipeline_mode<synchronous>, transform_indices = @transform_2, window_bounds = array<i64: 2, 32, 16>}, {pipeline_mode = #tpu.pipeline_mode<synchronous>, transform_indices = @transform_3, window_bounds = array<i64: 2, 32, 1>}, {pipeline_mode = #tpu.pipeline_mode<synchronous>, transform_indices = @transform_4, window_bounds = array<i64: 2, 3, 8, 72>}, {pipeline_mode = #tpu.pipeline_mode<synchronous>, transform_indices = @transform_5, window_bounds = array<i64: 2, 3, 8, 1>}, {pipeline_mode = #tpu.pipeline_mode<synchronous>, transform_indices = @transform_6, window_bounds = array<i64: 2, 16, 32>}, {pipeline_mode = #tpu.pipeline_mode<synchronous>, transform_indices = @transform_7, window_bounds = array<i64: 2, 16, 1>}, {transform_indices = @transform_8, window_bounds = array<i64: 16, 256>}]} {
    %c0 = arith.constant 0 : index
    %c0_0 = arith.constant 0 : index
    %0 = vector.load %arg1[%c0, %c0_0] : memref<16x256xf32, #tpu.memory_space<vmem>>, vector<16x256xf32>
    %c0_1 = arith.constant 0 : index
    %c0_2 = arith.constant 0 : index
    %c0_3 = arith.constant 0 : index
    %1 = vector.load %arg3[%c0_1, %c0_2, %c0_3] : memref<2x32x16xf32, #tpu.memory_space<vmem>>, vector<1x32x16xf32>
    %2 = vector.shape_cast %1 : vector<1x32x16xf32> to vector<32x16xf32>
    %cst = arith.constant dense<0.000000e+00> : vector<32x256xf32>
    %3 = tpu.matmul %2, %0, %cst {dimension_numbers = #tpu.dot_dimension_numbers<[1], [0], [0], [1], [0, 0, 1, 1], [], []>, precision = #tpu.contract_precision<fp32>} : vector<32x16xf32>, vector<16x256xf32>, vector<32x256xf32> -> vector<32x256xf32>
    %c0_4 = arith.constant 0 : index
    %c0_5 = arith.constant 0 : index
    %c0_6 = arith.constant 0 : index
    %4 = vector.load %arg4[%c0_4, %c0_5, %c0_6] : memref<2x32x1xf32, #tpu.memory_space<vmem>>, vector<1x32x1xf32>
    %5 = vector.shape_cast %4 : vector<1x32x1xf32> to vector<32x1xf32>
    %6 = vector.broadcast %5 : vector<32x1xf32> to vector<32x256xf32>
    %7 = arith.addf %3, %6 : vector<32x256xf32>
    %cst_7 = arith.constant 0.000000e+00 : f32
    %8 = vector.broadcast %cst_7 : f32 to vector<32x256xf32>
    %9 = arith.maximumf %7, %8 : vector<32x256xf32>
    %10 = vector.extract_strided_slice %9 {offsets = [0, 0], sizes = [8, 256], strides = [1, 1]} : vector<32x256xf32> to vector<8x256xf32>
    %c17_i32 = arith.constant 17 : i32
    %11 = tpu.dynamic_rotate %10 by %c17_i32 dim 1 : vector<8x256xf32>, i32 -> vector<8x256xf32>
    %c0_8 = arith.constant 0 : index
    %c0_9 = arith.constant 0 : index
    %12 = vector.load %arg2[%c0_8, %c0_9] : memref<72x256xf32, #tpu.memory_space<vmem>>, vector<8x256xf32>
    %13 = arith.mulf %11, %12 : vector<8x256xf32>
    %c0_10 = arith.constant 0 : index
    %c0_11 = arith.constant 0 : index
    %14 = vector.load %arg10[%c0_10, %c0_11] : memref<72x256xf32, #tpu.memory_space<vmem>>, vector<8x256xf32>
    tpu.vector_store %arg10[%c0_10, %c0_11], %13 {strides = array<i32>} : memref<72x256xf32, #tpu.memory_space<vmem>>, vector<8x256xf32>,
    %c16_i32 = arith.constant 16 : i32
    %15 = tpu.dynamic_rotate %10 by %c16_i32 dim 1 : vector<8x256xf32>, i32 -> vector<8x256xf32>
    %c8 = arith.constant 8 : index
    %c0_12 = arith.constant 0 : index
    %16 = vector.load %arg2[%c8, %c0_12] : memref<72x256xf32, #tpu.memory_space<vmem>>, vector<8x256xf32>
    %17 = arith.mulf %15, %16 : vector<8x256xf32>
    %c8_13 = arith.constant 8 : index
    %c0_14 = arith.constant 0 : index
    %18 = vector.load %arg10[%c8_13, %c0_14] : memref<72x256xf32, #tpu.memory_space<vmem>>, vector<8x256xf32>
    tpu.vector_store %arg10[%c8_13, %c0_14], %17 {strides = array<i32>} : memref<72x256xf32, #tpu.memory_space<vmem>>, vector<8x256xf32>,
    %c15_i32 = arith.constant 15 : i32
    %19 = tpu.dynamic_rotate %10 by %c15_i32 dim 1 : vector<8x256xf32>, i32 -> vector<8x256xf32>
    %c16 = arith.constant 16 : index
    %c0_15 = arith.constant 0 : index
    %20 = vector.load %arg2[%c16, %c0_15] : memref<72x256xf32, #tpu.memory_space<vmem>>, vector<8x256xf32>
    %21 = arith.mulf %19, %20 : vector<8x256xf32>
    %c16_16 = arith.constant 16 : index
    %c0_17 = arith.constant 0 : index
    %22 = vector.load %arg10[%c16_16, %c0_17] : memref<72x256xf32, #tpu.memory_space<vmem>>, vector<8x256xf32>
    tpu.vector_store %arg10[%c16_16, %c0_17], %21 {strides = array<i32>} : memref<72x256xf32, #tpu.memory_space<vmem>>, vector<8x256xf32>,
    %c1_i32 = arith.constant 1 : i32
    %23 = tpu.dynamic_rotate %10 by %c1_i32 dim 1 : vector<8x256xf32>, i32 -> vector<8x256xf32>
    %c24 = arith.constant 24 : index
    %c0_18 = arith.constant 0 : index
    %24 = vector.load %arg2[%c24, %c0_18] : memref<72x256xf32, #tpu.memory_space<vmem>>, vector<8x256xf32>
    %25 = arith.mulf %23, %24 : vector<8x256xf32>
    %c24_19 = arith.constant 24 : index
    %c0_20 = arith.constant 0 : index
    %26 = vector.load %arg10[%c24_19, %c0_20] : memref<72x256xf32, #tpu.memory_space<vmem>>, vector<8x256xf32>
    tpu.vector_store %arg10[%c24_19, %c0_20], %25 {strides = array<i32>} : memref<72x256xf32, #tpu.memory_space<vmem>>, vector<8x256xf32>,
    %c32 = arith.constant 32 : index
    %c0_21 = arith.constant 0 : index
    %27 = vector.load %arg2[%c32, %c0_21] : memref<72x256xf32, #tpu.memory_space<vmem>>, vector<8x256xf32>
    %28 = arith.mulf %10, %27 : vector<8x256xf32>
    %c32_22 = arith.constant 32 : index
    %c0_23 = arith.constant 0 : index
    %29 = vector.load %arg10[%c32_22, %c0_23] : memref<72x256xf32, #tpu.memory_space<vmem>>, vector<8x256xf32>
    tpu.vector_store %arg10[%c32_22, %c0_23], %28 {strides = array<i32>} : memref<72x256xf32, #tpu.memory_space<vmem>>, vector<8x256xf32>,
    %c255_i32 = arith.constant 255 : i32
    %30 = tpu.dynamic_rotate %10 by %c255_i32 dim 1 : vector<8x256xf32>, i32 -> vector<8x256xf32>
    %c40 = arith.constant 40 : index
    %c0_24 = arith.constant 0 : index
    %31 = vector.load %arg2[%c40, %c0_24] : memref<72x256xf32, #tpu.memory_space<vmem>>, vector<8x256xf32>
    %32 = arith.mulf %30, %31 : vector<8x256xf32>
    %c40_25 = arith.constant 40 : index
    %c0_26 = arith.constant 0 : index
    %33 = vector.load %arg10[%c40_25, %c0_26] : memref<72x256xf32, #tpu.memory_space<vmem>>, vector<8x256xf32>
    tpu.vector_store %arg10[%c40_25, %c0_26], %32 {strides = array<i32>} : memref<72x256xf32, #tpu.memory_space<vmem>>, vector<8x256xf32>,
    %c241_i32 = arith.constant 241 : i32
    %34 = tpu.dynamic_rotate %10 by %c241_i32 dim 1 : vector<8x256xf32>, i32 -> vector<8x256xf32>
    %c48 = arith.constant 48 : index
    %c0_27 = arith.constant 0 : index
    %35 = vector.load %arg2[%c48, %c0_27] : memref<72x256xf32, #tpu.memory_space<vmem>>, vector<8x256xf32>
    %36 = arith.mulf %34, %35 : vector<8x256xf32>
    %c48_28 = arith.constant 48 : index
    %c0_29 = arith.constant 0 : index
    %37 = vector.load %arg10[%c48_28, %c0_29] : memref<72x256xf32, #tpu.memory_space<vmem>>, vector<8x256xf32>
    tpu.vector_store %arg10[%c48_28, %c0_29], %36 {strides = array<i32>} : memref<72x256xf32, #tpu.memory_space<vmem>>, vector<8x256xf32>,
    %c240_i32 = arith.constant 240 : i32
    %38 = tpu.dynamic_rotate %10 by %c240_i32 dim 1 : vector<8x256xf32>, i32 -> vector<8x256xf32>
    %c56 = arith.constant 56 : index
    %c0_30 = arith.constant 0 : index
    %39 = vector.load %arg2[%c56, %c0_30] : memref<72x256xf32, #tpu.memory_space<vmem>>, vector<8x256xf32>
    %40 = arith.mulf %38, %39 : vector<8x256xf32>
    %c56_31 = arith.constant 56 : index
    %c0_32 = arith.constant 0 : index
    %41 = vector.load %arg10[%c56_31, %c0_32] : memref<72x256xf32, #tpu.memory_space<vmem>>, vector<8x256xf32>
    tpu.vector_store %arg10[%c56_31, %c0_32], %40 {strides = array<i32>} : memref<72x256xf32, #tpu.memory_space<vmem>>, vector<8x256xf32>,
    %c239_i32 = arith.constant 239 : i32
    %42 = tpu.dynamic_rotate %10 by %c239_i32 dim 1 : vector<8x256xf32>, i32 -> vector<8x256xf32>
    %c64 = arith.constant 64 : index
    %c0_33 = arith.constant 0 : index
    %43 = vector.load %arg2[%c64, %c0_33] : memref<72x256xf32, #tpu.memory_space<vmem>>, vector<8x256xf32>
    %44 = arith.mulf %42, %43 : vector<8x256xf32>
    %c64_34 = arith.constant 64 : index
    %c0_35 = arith.constant 0 : index
    %45 = vector.load %arg10[%c64_34, %c0_35] : memref<72x256xf32, #tpu.memory_space<vmem>>, vector<8x256xf32>
    tpu.vector_store %arg10[%c64_34, %c0_35], %44 {strides = array<i32>} : memref<72x256xf32, #tpu.memory_space<vmem>>, vector<8x256xf32>,
    %c0_36 = arith.constant 0 : index
    %c0_37 = arith.constant 0 : index
    %c0_38 = arith.constant 0 : index
    %c0_39 = arith.constant 0 : index
    %46 = vector.load %arg5[%c0_36, %c0_37, %c0_38, %c0_39] : memref<2x3x8x72xf32, #tpu.memory_space<vmem>>, vector<1x1x8x72xf32>
    %47 = vector.shape_cast %46 : vector<1x1x8x72xf32> to vector<8x72xf32>
    %c0_40 = arith.constant 0 : index
    %c0_41 = arith.constant 0 : index
    %48 = vector.load %arg10[%c0_40, %c0_41] : memref<72x256xf32, #tpu.memory_space<vmem>>, vector<72x256xf32>
    %cst_42 = arith.constant dense<0.000000e+00> : vector<8x256xf32>
    %49 = tpu.matmul %47, %48, %cst_42 {dimension_numbers = #tpu.dot_dimension_numbers<[1], [0], [0], [1], [0, 0, 1, 1], [], []>, precision = #tpu.contract_precision<fp32>} : vector<8x72xf32>, vector<72x256xf32>, vector<8x256xf32> -> vector<8x256xf32>
    %c0_43 = arith.constant 0 : index
    %c0_44 = arith.constant 0 : index
    %c0_45 = arith.constant 0 : index
    %c0_46 = arith.constant 0 : index
    %50 = vector.load %arg6[%c0_43, %c0_44, %c0_45, %c0_46] : memref<2x3x8x1xf32, #tpu.memory_space<vmem>>, vector<1x1x8x1xf32>
    %51 = vector.shape_cast %50 : vector<1x1x8x1xf32> to vector<8x1xf32>
    %52 = vector.broadcast %51 : vector<8x1xf32> to vector<8x256xf32>
    %53 = arith.addf %49, %52 : vector<8x256xf32>
    %cst_47 = arith.constant 0.000000e+00 : f32
    %54 = vector.broadcast %cst_47 : f32 to vector<8x256xf32>
    %55 = arith.maximumf %53, %54 : vector<8x256xf32>
    %c0_48 = arith.constant 0 : index
    %c0_49 = arith.constant 0 : index
    %56 = vector.load %arg11[%c0_48, %c0_49] : memref<32x256xf32, #tpu.memory_space<vmem>>, vector<8x256xf32>
    tpu.vector_store %arg11[%c0_48, %c0_49], %55 {strides = array<i32>} : memref<32x256xf32, #tpu.memory_space<vmem>>, vector<8x256xf32>,
    %57 = vector.extract_strided_slice %9 {offsets = [8, 0], sizes = [8, 256], strides = [1, 1]} : vector<32x256xf32> to vector<8x256xf32>
    %58 = arith.addf %55, %57 : vector<8x256xf32>
    %c17_i32_50 = arith.constant 17 : i32
    %59 = tpu.dynamic_rotate %58 by %c17_i32_50 dim 1 : vector<8x256xf32>, i32 -> vector<8x256xf32>
    %c0_51 = arith.constant 0 : index
    %c0_52 = arith.constant 0 : index
    %60 = vector.load %arg2[%c0_51, %c0_52] : memref<72x256xf32, #tpu.memory_space<vmem>>, vector<8x256xf32>
    %61 = arith.mulf %59, %60 : vector<8x256xf32>
    %c0_53 = arith.constant 0 : index
    %c0_54 = arith.constant 0 : index
    %62 = vector.load %arg10[%c0_53, %c0_54] : memref<72x256xf32, #tpu.memory_space<vmem>>, vector<8x256xf32>
    tpu.vector_store %arg10[%c0_53, %c0_54], %61 {strides = array<i32>} : memref<72x256xf32, #tpu.memory_space<vmem>>, vector<8x256xf32>,
    %c16_i32_55 = arith.constant 16 : i32
    %63 = tpu.dynamic_rotate %58 by %c16_i32_55 dim 1 : vector<8x256xf32>, i32 -> vector<8x256xf32>
    %c8_56 = arith.constant 8 : index
    %c0_57 = arith.constant 0 : index
    %64 = vector.load %arg2[%c8_56, %c0_57] : memref<72x256xf32, #tpu.memory_space<vmem>>, vector<8x256xf32>
    %65 = arith.mulf %63, %64 : vector<8x256xf32>
    %c8_58 = arith.constant 8 : index
    %c0_59 = arith.constant 0 : index
    %66 = vector.load %arg10[%c8_58, %c0_59] : memref<72x256xf32, #tpu.memory_space<vmem>>, vector<8x256xf32>
    tpu.vector_store %arg10[%c8_58, %c0_59], %65 {strides = array<i32>} : memref<72x256xf32, #tpu.memory_space<vmem>>, vector<8x256xf32>,
    %c15_i32_60 = arith.constant 15 : i32
    %67 = tpu.dynamic_rotate %58 by %c15_i32_60 dim 1 : vector<8x256xf32>, i32 -> vector<8x256xf32>
    %c16_61 = arith.constant 16 : index
    %c0_62 = arith.constant 0 : index
    %68 = vector.load %arg2[%c16_61, %c0_62] : memref<72x256xf32, #tpu.memory_space<vmem>>, vector<8x256xf32>
    %69 = arith.mulf %67, %68 : vector<8x256xf32>
    %c16_63 = arith.constant 16 : index
    %c0_64 = arith.constant 0 : index
    %70 = vector.load %arg10[%c16_63, %c0_64] : memref<72x256xf32, #tpu.memory_space<vmem>>, vector<8x256xf32>
    tpu.vector_store %arg10[%c16_63, %c0_64], %69 {strides = array<i32>} : memref<72x256xf32, #tpu.memory_space<vmem>>, vector<8x256xf32>,
    %c1_i32_65 = arith.constant 1 : i32
    %71 = tpu.dynamic_rotate %58 by %c1_i32_65 dim 1 : vector<8x256xf32>, i32 -> vector<8x256xf32>
    %c24_66 = arith.constant 24 : index
    %c0_67 = arith.constant 0 : index
    %72 = vector.load %arg2[%c24_66, %c0_67] : memref<72x256xf32, #tpu.memory_space<vmem>>, vector<8x256xf32>
    %73 = arith.mulf %71, %72 : vector<8x256xf32>
    %c24_68 = arith.constant 24 : index
    %c0_69 = arith.constant 0 : index
    %74 = vector.load %arg10[%c24_68, %c0_69] : memref<72x256xf32, #tpu.memory_space<vmem>>, vector<8x256xf32>
    tpu.vector_store %arg10[%c24_68, %c0_69], %73 {strides = array<i32>} : memref<72x256xf32, #tpu.memory_space<vmem>>, vector<8x256xf32>,
    %c32_70 = arith.constant 32 : index
    %c0_71 = arith.constant 0 : index
    %75 = vector.load %arg2[%c32_70, %c0_71] : memref<72x256xf32, #tpu.memory_space<vmem>>, vector<8x256xf32>
    %76 = arith.mulf %58, %75 : vector<8x256xf32>
    %c32_72 = arith.constant 32 : index
    %c0_73 = arith.constant 0 : index
    %77 = vector.load %arg10[%c32_72, %c0_73] : memref<72x256xf32, #tpu.memory_space<vmem>>, vector<8x256xf32>
    tpu.vector_store %arg10[%c32_72, %c0_73], %76 {strides = array<i32>} : memref<72x256xf32, #tpu.memory_space<vmem>>, vector<8x256xf32>,
    %c255_i32_74 = arith.constant 255 : i32
    %78 = tpu.dynamic_rotate %58 by %c255_i32_74 dim 1 : vector<8x256xf32>, i32 -> vector<8x256xf32>
    %c40_75 = arith.constant 40 : index
    %c0_76 = arith.constant 0 : index
    %79 = vector.load %arg2[%c40_75, %c0_76] : memref<72x256xf32, #tpu.memory_space<vmem>>, vector<8x256xf32>
    %80 = arith.mulf %78, %79 : vector<8x256xf32>
    %c40_77 = arith.constant 40 : index
    %c0_78 = arith.constant 0 : index
    %81 = vector.load %arg10[%c40_77, %c0_78] : memref<72x256xf32, #tpu.memory_space<vmem>>, vector<8x256xf32>
    tpu.vector_store %arg10[%c40_77, %c0_78], %80 {strides = array<i32>} : memref<72x256xf32, #tpu.memory_space<vmem>>, vector<8x256xf32>,
    %c241_i32_79 = arith.constant 241 : i32
    %82 = tpu.dynamic_rotate %58 by %c241_i32_79 dim 1 : vector<8x256xf32>, i32 -> vector<8x256xf32>
    %c48_80 = arith.constant 48 : index
    %c0_81 = arith.constant 0 : index
    %83 = vector.load %arg2[%c48_80, %c0_81] : memref<72x256xf32, #tpu.memory_space<vmem>>, vector<8x256xf32>
    %84 = arith.mulf %82, %83 : vector<8x256xf32>
    %c48_82 = arith.constant 48 : index
    %c0_83 = arith.constant 0 : index
    %85 = vector.load %arg10[%c48_82, %c0_83] : memref<72x256xf32, #tpu.memory_space<vmem>>, vector<8x256xf32>
    tpu.vector_store %arg10[%c48_82, %c0_83], %84 {strides = array<i32>} : memref<72x256xf32, #tpu.memory_space<vmem>>, vector<8x256xf32>,
    %c240_i32_84 = arith.constant 240 : i32
    %86 = tpu.dynamic_rotate %58 by %c240_i32_84 dim 1 : vector<8x256xf32>, i32 -> vector<8x256xf32>
    %c56_85 = arith.constant 56 : index
    %c0_86 = arith.constant 0 : index
    %87 = vector.load %arg2[%c56_85, %c0_86] : memref<72x256xf32, #tpu.memory_space<vmem>>, vector<8x256xf32>
    %88 = arith.mulf %86, %87 : vector<8x256xf32>
    %c56_87 = arith.constant 56 : index
    %c0_88 = arith.constant 0 : index
    %89 = vector.load %arg10[%c56_87, %c0_88] : memref<72x256xf32, #tpu.memory_space<vmem>>, vector<8x256xf32>
    tpu.vector_store %arg10[%c56_87, %c0_88], %88 {strides = array<i32>} : memref<72x256xf32, #tpu.memory_space<vmem>>, vector<8x256xf32>,
    %c239_i32_89 = arith.constant 239 : i32
    %90 = tpu.dynamic_rotate %58 by %c239_i32_89 dim 1 : vector<8x256xf32>, i32 -> vector<8x256xf32>
    %c64_90 = arith.constant 64 : index
    %c0_91 = arith.constant 0 : index
    %91 = vector.load %arg2[%c64_90, %c0_91] : memref<72x256xf32, #tpu.memory_space<vmem>>, vector<8x256xf32>
    %92 = arith.mulf %90, %91 : vector<8x256xf32>
    %c64_92 = arith.constant 64 : index
    %c0_93 = arith.constant 0 : index
    %93 = vector.load %arg10[%c64_92, %c0_93] : memref<72x256xf32, #tpu.memory_space<vmem>>, vector<8x256xf32>
    tpu.vector_store %arg10[%c64_92, %c0_93], %92 {strides = array<i32>} : memref<72x256xf32, #tpu.memory_space<vmem>>, vector<8x256xf32>,
    %c0_94 = arith.constant 0 : index
    %c1 = arith.constant 1 : index
    %c0_95 = arith.constant 0 : index
    %c0_96 = arith.constant 0 : index
    %94 = vector.load %arg5[%c0_94, %c1, %c0_95, %c0_96] : memref<2x3x8x72xf32, #tpu.memory_space<vmem>>, vector<1x1x8x72xf32>
    %95 = vector.shape_cast %94 : vector<1x1x8x72xf32> to vector<8x72xf32>
    %c0_97 = arith.constant 0 : index
    %c0_98 = arith.constant 0 : index
    %96 = vector.load %arg10[%c0_97, %c0_98] : memref<72x256xf32, #tpu.memory_space<vmem>>, vector<72x256xf32>
    %cst_99 = arith.constant dense<0.000000e+00> : vector<8x256xf32>
    %97 = tpu.matmul %95, %96, %cst_99 {dimension_numbers = #tpu.dot_dimension_numbers<[1], [0], [0], [1], [0, 0, 1, 1], [], []>, precision = #tpu.contract_precision<fp32>} : vector<8x72xf32>, vector<72x256xf32>, vector<8x256xf32> -> vector<8x256xf32>
    %c0_100 = arith.constant 0 : index
    %c1_101 = arith.constant 1 : index
    %c0_102 = arith.constant 0 : index
    %c0_103 = arith.constant 0 : index
    %98 = vector.load %arg6[%c0_100, %c1_101, %c0_102, %c0_103] : memref<2x3x8x1xf32, #tpu.memory_space<vmem>>, vector<1x1x8x1xf32>
    %99 = vector.shape_cast %98 : vector<1x1x8x1xf32> to vector<8x1xf32>
    %100 = vector.broadcast %99 : vector<8x1xf32> to vector<8x256xf32>
    %101 = arith.addf %97, %100 : vector<8x256xf32>
    %cst_104 = arith.constant 0.000000e+00 : f32
    %102 = vector.broadcast %cst_104 : f32 to vector<8x256xf32>
    %103 = arith.maximumf %101, %102 : vector<8x256xf32>
    %c8_105 = arith.constant 8 : index
    %c0_106 = arith.constant 0 : index
    %104 = vector.load %arg11[%c8_105, %c0_106] : memref<32x256xf32, #tpu.memory_space<vmem>>, vector<8x256xf32>
    tpu.vector_store %arg11[%c8_105, %c0_106], %103 {strides = array<i32>} : memref<32x256xf32, #tpu.memory_space<vmem>>, vector<8x256xf32>,
    %105 = vector.extract_strided_slice %9 {offsets = [16, 0], sizes = [8, 256], strides = [1, 1]} : vector<32x256xf32> to vector<8x256xf32>
    %106 = arith.addf %103, %105 : vector<8x256xf32>
    %c17_i32_107 = arith.constant 17 : i32
    %107 = tpu.dynamic_rotate %106 by %c17_i32_107 dim 1 : vector<8x256xf32>, i32 -> vector<8x256xf32>
    %c0_108 = arith.constant 0 : index
    %c0_109 = arith.constant 0 : index
    %108 = vector.load %arg2[%c0_108, %c0_109] : memref<72x256xf32, #tpu.memory_space<vmem>>, vector<8x256xf32>
    %109 = arith.mulf %107, %108 : vector<8x256xf32>
    %c0_110 = arith.constant 0 : index
    %c0_111 = arith.constant 0 : index
    %110 = vector.load %arg10[%c0_110, %c0_111] : memref<72x256xf32, #tpu.memory_space<vmem>>, vector<8x256xf32>
    tpu.vector_store %arg10[%c0_110, %c0_111], %109 {strides = array<i32>} : memref<72x256xf32, #tpu.memory_space<vmem>>, vector<8x256xf32>,
    %c16_i32_112 = arith.constant 16 : i32
    %111 = tpu.dynamic_rotate %106 by %c16_i32_112 dim 1 : vector<8x256xf32>, i32 -> vector<8x256xf32>
    %c8_113 = arith.constant 8 : index
    %c0_114 = arith.constant 0 : index
    %112 = vector.load %arg2[%c8_113, %c0_114] : memref<72x256xf32, #tpu.memory_space<vmem>>, vector<8x256xf32>
    %113 = arith.mulf %111, %112 : vector<8x256xf32>
    %c8_115 = arith.constant 8 : index
    %c0_116 = arith.constant 0 : index
    %114 = vector.load %arg10[%c8_115, %c0_116] : memref<72x256xf32, #tpu.memory_space<vmem>>, vector<8x256xf32>
    tpu.vector_store %arg10[%c8_115, %c0_116], %113 {strides = array<i32>} : memref<72x256xf32, #tpu.memory_space<vmem>>, vector<8x256xf32>,
    %c15_i32_117 = arith.constant 15 : i32
    %115 = tpu.dynamic_rotate %106 by %c15_i32_117 dim 1 : vector<8x256xf32>, i32 -> vector<8x256xf32>
    %c16_118 = arith.constant 16 : index
    %c0_119 = arith.constant 0 : index
    %116 = vector.load %arg2[%c16_118, %c0_119] : memref<72x256xf32, #tpu.memory_space<vmem>>, vector<8x256xf32>
    %117 = arith.mulf %115, %116 : vector<8x256xf32>
    %c16_120 = arith.constant 16 : index
    %c0_121 = arith.constant 0 : index
    %118 = vector.load %arg10[%c16_120, %c0_121] : memref<72x256xf32, #tpu.memory_space<vmem>>, vector<8x256xf32>
    tpu.vector_store %arg10[%c16_120, %c0_121], %117 {strides = array<i32>} : memref<72x256xf32, #tpu.memory_space<vmem>>, vector<8x256xf32>,
    %c1_i32_122 = arith.constant 1 : i32
    %119 = tpu.dynamic_rotate %106 by %c1_i32_122 dim 1 : vector<8x256xf32>, i32 -> vector<8x256xf32>
    %c24_123 = arith.constant 24 : index
    %c0_124 = arith.constant 0 : index
    %120 = vector.load %arg2[%c24_123, %c0_124] : memref<72x256xf32, #tpu.memory_space<vmem>>, vector<8x256xf32>
    %121 = arith.mulf %119, %120 : vector<8x256xf32>
    %c24_125 = arith.constant 24 : index
    %c0_126 = arith.constant 0 : index
    %122 = vector.load %arg10[%c24_125, %c0_126] : memref<72x256xf32, #tpu.memory_space<vmem>>, vector<8x256xf32>
    tpu.vector_store %arg10[%c24_125, %c0_126], %121 {strides = array<i32>} : memref<72x256xf32, #tpu.memory_space<vmem>>, vector<8x256xf32>,
    %c32_127 = arith.constant 32 : index
    %c0_128 = arith.constant 0 : index
    %123 = vector.load %arg2[%c32_127, %c0_128] : memref<72x256xf32, #tpu.memory_space<vmem>>, vector<8x256xf32>
    %124 = arith.mulf %106, %123 : vector<8x256xf32>
    %c32_129 = arith.constant 32 : index
    %c0_130 = arith.constant 0 : index
    %125 = vector.load %arg10[%c32_129, %c0_130] : memref<72x256xf32, #tpu.memory_space<vmem>>, vector<8x256xf32>
    tpu.vector_store %arg10[%c32_129, %c0_130], %124 {strides = array<i32>} : memref<72x256xf32, #tpu.memory_space<vmem>>, vector<8x256xf32>,
    %c255_i32_131 = arith.constant 255 : i32
    %126 = tpu.dynamic_rotate %106 by %c255_i32_131 dim 1 : vector<8x256xf32>, i32 -> vector<8x256xf32>
    %c40_132 = arith.constant 40 : index
    %c0_133 = arith.constant 0 : index
    %127 = vector.load %arg2[%c40_132, %c0_133] : memref<72x256xf32, #tpu.memory_space<vmem>>, vector<8x256xf32>
    %128 = arith.mulf %126, %127 : vector<8x256xf32>
    %c40_134 = arith.constant 40 : index
    %c0_135 = arith.constant 0 : index
    %129 = vector.load %arg10[%c40_134, %c0_135] : memref<72x256xf32, #tpu.memory_space<vmem>>, vector<8x256xf32>
    tpu.vector_store %arg10[%c40_134, %c0_135], %128 {strides = array<i32>} : memref<72x256xf32, #tpu.memory_space<vmem>>, vector<8x256xf32>,
    %c241_i32_136 = arith.constant 241 : i32
    %130 = tpu.dynamic_rotate %106 by %c241_i32_136 dim 1 : vector<8x256xf32>, i32 -> vector<8x256xf32>
    %c48_137 = arith.constant 48 : index
    %c0_138 = arith.constant 0 : index
    %131 = vector.load %arg2[%c48_137, %c0_138] : memref<72x256xf32, #tpu.memory_space<vmem>>, vector<8x256xf32>
    %132 = arith.mulf %130, %131 : vector<8x256xf32>
    %c48_139 = arith.constant 48 : index
    %c0_140 = arith.constant 0 : index
    %133 = vector.load %arg10[%c48_139, %c0_140] : memref<72x256xf32, #tpu.memory_space<vmem>>, vector<8x256xf32>
    tpu.vector_store %arg10[%c48_139, %c0_140], %132 {strides = array<i32>} : memref<72x256xf32, #tpu.memory_space<vmem>>, vector<8x256xf32>,
    %c240_i32_141 = arith.constant 240 : i32
    %134 = tpu.dynamic_rotate %106 by %c240_i32_141 dim 1 : vector<8x256xf32>, i32 -> vector<8x256xf32>
    %c56_142 = arith.constant 56 : index
    %c0_143 = arith.constant 0 : index
    %135 = vector.load %arg2[%c56_142, %c0_143] : memref<72x256xf32, #tpu.memory_space<vmem>>, vector<8x256xf32>
    %136 = arith.mulf %134, %135 : vector<8x256xf32>
    %c56_144 = arith.constant 56 : index
    %c0_145 = arith.constant 0 : index
    %137 = vector.load %arg10[%c56_144, %c0_145] : memref<72x256xf32, #tpu.memory_space<vmem>>, vector<8x256xf32>
    tpu.vector_store %arg10[%c56_144, %c0_145], %136 {strides = array<i32>} : memref<72x256xf32, #tpu.memory_space<vmem>>, vector<8x256xf32>,
    %c239_i32_146 = arith.constant 239 : i32
    %138 = tpu.dynamic_rotate %106 by %c239_i32_146 dim 1 : vector<8x256xf32>, i32 -> vector<8x256xf32>
    %c64_147 = arith.constant 64 : index
    %c0_148 = arith.constant 0 : index
    %139 = vector.load %arg2[%c64_147, %c0_148] : memref<72x256xf32, #tpu.memory_space<vmem>>, vector<8x256xf32>
    %140 = arith.mulf %138, %139 : vector<8x256xf32>
    %c64_149 = arith.constant 64 : index
    %c0_150 = arith.constant 0 : index
    %141 = vector.load %arg10[%c64_149, %c0_150] : memref<72x256xf32, #tpu.memory_space<vmem>>, vector<8x256xf32>
    tpu.vector_store %arg10[%c64_149, %c0_150], %140 {strides = array<i32>} : memref<72x256xf32, #tpu.memory_space<vmem>>, vector<8x256xf32>,
    %c0_151 = arith.constant 0 : index
    %c2 = arith.constant 2 : index
    %c0_152 = arith.constant 0 : index
    %c0_153 = arith.constant 0 : index
    %142 = vector.load %arg5[%c0_151, %c2, %c0_152, %c0_153] : memref<2x3x8x72xf32, #tpu.memory_space<vmem>>, vector<1x1x8x72xf32>
    %143 = vector.shape_cast %142 : vector<1x1x8x72xf32> to vector<8x72xf32>
    %c0_154 = arith.constant 0 : index
    %c0_155 = arith.constant 0 : index
    %144 = vector.load %arg10[%c0_154, %c0_155] : memref<72x256xf32, #tpu.memory_space<vmem>>, vector<72x256xf32>
    %cst_156 = arith.constant dense<0.000000e+00> : vector<8x256xf32>
    %145 = tpu.matmul %143, %144, %cst_156 {dimension_numbers = #tpu.dot_dimension_numbers<[1], [0], [0], [1], [0, 0, 1, 1], [], []>, precision = #tpu.contract_precision<fp32>} : vector<8x72xf32>, vector<72x256xf32>, vector<8x256xf32> -> vector<8x256xf32>
    %c0_157 = arith.constant 0 : index
    %c2_158 = arith.constant 2 : index
    %c0_159 = arith.constant 0 : index
    %c0_160 = arith.constant 0 : index
    %146 = vector.load %arg6[%c0_157, %c2_158, %c0_159, %c0_160] : memref<2x3x8x1xf32, #tpu.memory_space<vmem>>, vector<1x1x8x1xf32>
    %147 = vector.shape_cast %146 : vector<1x1x8x1xf32> to vector<8x1xf32>
    %148 = vector.broadcast %147 : vector<8x1xf32> to vector<8x256xf32>
    %149 = arith.addf %145, %148 : vector<8x256xf32>
    %cst_161 = arith.constant 0.000000e+00 : f32
    %150 = vector.broadcast %cst_161 : f32 to vector<8x256xf32>
    %151 = arith.maximumf %149, %150 : vector<8x256xf32>
    %c16_162 = arith.constant 16 : index
    %c0_163 = arith.constant 0 : index
    %152 = vector.load %arg11[%c16_162, %c0_163] : memref<32x256xf32, #tpu.memory_space<vmem>>, vector<8x256xf32>
    tpu.vector_store %arg11[%c16_162, %c0_163], %151 {strides = array<i32>} : memref<32x256xf32, #tpu.memory_space<vmem>>, vector<8x256xf32>,
    %153 = vector.extract_strided_slice %9 {offsets = [24, 0], sizes = [8, 256], strides = [1, 1]} : vector<32x256xf32> to vector<8x256xf32>
    %c24_164 = arith.constant 24 : index
    %c0_165 = arith.constant 0 : index
    %154 = vector.load %arg11[%c24_164, %c0_165] : memref<32x256xf32, #tpu.memory_space<vmem>>, vector<8x256xf32>
    tpu.vector_store %arg11[%c24_164, %c0_165], %153 {strides = array<i32>} : memref<32x256xf32, #tpu.memory_space<vmem>>, vector<8x256xf32>,
    %c0_166 = arith.constant 0 : index
    %c0_167 = arith.constant 0 : index
    %c0_168 = arith.constant 0 : index
    %155 = vector.load %arg7[%c0_166, %c0_167, %c0_168] : memref<2x16x32xf32, #tpu.memory_space<vmem>>, vector<1x16x32xf32>
    %156 = vector.shape_cast %155 : vector<1x16x32xf32> to vector<16x32xf32>
    %c0_169 = arith.constant 0 : index
    %c0_170 = arith.constant 0 : index
    %157 = vector.load %arg11[%c0_169, %c0_170] : memref<32x256xf32, #tpu.memory_space<vmem>>, vector<32x256xf32>
    %cst_171 = arith.constant dense<0.000000e+00> : vector<16x256xf32>
    %158 = tpu.matmul %156, %157, %cst_171 {dimension_numbers = #tpu.dot_dimension_numbers<[1], [0], [0], [1], [0, 0, 1, 1], [], []>, precision = #tpu.contract_precision<fp32>} : vector<16x32xf32>, vector<32x256xf32>, vector<16x256xf32> -> vector<16x256xf32>
    %c0_172 = arith.constant 0 : index
    %c0_173 = arith.constant 0 : index
    %c0_174 = arith.constant 0 : index
    %159 = vector.load %arg8[%c0_172, %c0_173, %c0_174] : memref<2x16x1xf32, #tpu.memory_space<vmem>>, vector<1x16x1xf32>
    %160 = vector.shape_cast %159 : vector<1x16x1xf32> to vector<16x1xf32>
    %161 = vector.broadcast %160 : vector<16x1xf32> to vector<16x256xf32>
    %162 = arith.addf %158, %161 : vector<16x256xf32>
    %163 = arith.addf %162, %0 : vector<16x256xf32>
    %cst_175 = arith.constant 0.000000e+00 : f32
    %164 = vector.broadcast %cst_175 : f32 to vector<16x256xf32>
    %165 = arith.maximumf %163, %164 : vector<16x256xf32>
    %c1_176 = arith.constant 1 : index
    %c0_177 = arith.constant 0 : index
    %c0_178 = arith.constant 0 : index
    %166 = vector.load %arg3[%c1_176, %c0_177, %c0_178] : memref<2x32x16xf32, #tpu.memory_space<vmem>>, vector<1x32x16xf32>
    %167 = vector.shape_cast %166 : vector<1x32x16xf32> to vector<32x16xf32>
    %cst_179 = arith.constant dense<0.000000e+00> : vector<32x256xf32>
    %168 = tpu.matmul %167, %165, %cst_179 {dimension_numbers = #tpu.dot_dimension_numbers<[1], [0], [0], [1], [0, 0, 1, 1], [], []>, precision = #tpu.contract_precision<fp32>} : vector<32x16xf32>, vector<16x256xf32>, vector<32x256xf32> -> vector<32x256xf32>
    %c1_180 = arith.constant 1 : index
    %c0_181 = arith.constant 0 : index
    %c0_182 = arith.constant 0 : index
    %169 = vector.load %arg4[%c1_180, %c0_181, %c0_182] : memref<2x32x1xf32, #tpu.memory_space<vmem>>, vector<1x32x1xf32>
    %170 = vector.shape_cast %169 : vector<1x32x1xf32> to vector<32x1xf32>
    %171 = vector.broadcast %170 : vector<32x1xf32> to vector<32x256xf32>
    %172 = arith.addf %168, %171 : vector<32x256xf32>
    %cst_183 = arith.constant 0.000000e+00 : f32
    %173 = vector.broadcast %cst_183 : f32 to vector<32x256xf32>
    %174 = arith.maximumf %172, %173 : vector<32x256xf32>
    %175 = vector.extract_strided_slice %174 {offsets = [0, 0], sizes = [8, 256], strides = [1, 1]} : vector<32x256xf32> to vector<8x256xf32>
    %c17_i32_184 = arith.constant 17 : i32
    %176 = tpu.dynamic_rotate %175 by %c17_i32_184 dim 1 : vector<8x256xf32>, i32 -> vector<8x256xf32>
    %c0_185 = arith.constant 0 : index
    %c0_186 = arith.constant 0 : index
    %177 = vector.load %arg2[%c0_185, %c0_186] : memref<72x256xf32, #tpu.memory_space<vmem>>, vector<8x256xf32>
    %178 = arith.mulf %176, %177 : vector<8x256xf32>
    %c0_187 = arith.constant 0 : index
    %c0_188 = arith.constant 0 : index
    %179 = vector.load %arg10[%c0_187, %c0_188] : memref<72x256xf32, #tpu.memory_space<vmem>>, vector<8x256xf32>
    tpu.vector_store %arg10[%c0_187, %c0_188], %178 {strides = array<i32>} : memref<72x256xf32, #tpu.memory_space<vmem>>, vector<8x256xf32>,
    %c16_i32_189 = arith.constant 16 : i32
    %180 = tpu.dynamic_rotate %175 by %c16_i32_189 dim 1 : vector<8x256xf32>, i32 -> vector<8x256xf32>
    %c8_190 = arith.constant 8 : index
    %c0_191 = arith.constant 0 : index
    %181 = vector.load %arg2[%c8_190, %c0_191] : memref<72x256xf32, #tpu.memory_space<vmem>>, vector<8x256xf32>
    %182 = arith.mulf %180, %181 : vector<8x256xf32>
    %c8_192 = arith.constant 8 : index
    %c0_193 = arith.constant 0 : index
    %183 = vector.load %arg10[%c8_192, %c0_193] : memref<72x256xf32, #tpu.memory_space<vmem>>, vector<8x256xf32>
    tpu.vector_store %arg10[%c8_192, %c0_193], %182 {strides = array<i32>} : memref<72x256xf32, #tpu.memory_space<vmem>>, vector<8x256xf32>,
    %c15_i32_194 = arith.constant 15 : i32
    %184 = tpu.dynamic_rotate %175 by %c15_i32_194 dim 1 : vector<8x256xf32>, i32 -> vector<8x256xf32>
    %c16_195 = arith.constant 16 : index
    %c0_196 = arith.constant 0 : index
    %185 = vector.load %arg2[%c16_195, %c0_196] : memref<72x256xf32, #tpu.memory_space<vmem>>, vector<8x256xf32>
    %186 = arith.mulf %184, %185 : vector<8x256xf32>
    %c16_197 = arith.constant 16 : index
    %c0_198 = arith.constant 0 : index
    %187 = vector.load %arg10[%c16_197, %c0_198] : memref<72x256xf32, #tpu.memory_space<vmem>>, vector<8x256xf32>
    tpu.vector_store %arg10[%c16_197, %c0_198], %186 {strides = array<i32>} : memref<72x256xf32, #tpu.memory_space<vmem>>, vector<8x256xf32>,
    %c1_i32_199 = arith.constant 1 : i32
    %188 = tpu.dynamic_rotate %175 by %c1_i32_199 dim 1 : vector<8x256xf32>, i32 -> vector<8x256xf32>
    %c24_200 = arith.constant 24 : index
    %c0_201 = arith.constant 0 : index
    %189 = vector.load %arg2[%c24_200, %c0_201] : memref<72x256xf32, #tpu.memory_space<vmem>>, vector<8x256xf32>
    %190 = arith.mulf %188, %189 : vector<8x256xf32>
    %c24_202 = arith.constant 24 : index
    %c0_203 = arith.constant 0 : index
    %191 = vector.load %arg10[%c24_202, %c0_203] : memref<72x256xf32, #tpu.memory_space<vmem>>, vector<8x256xf32>
    tpu.vector_store %arg10[%c24_202, %c0_203], %190 {strides = array<i32>} : memref<72x256xf32, #tpu.memory_space<vmem>>, vector<8x256xf32>,
    %c32_204 = arith.constant 32 : index
    %c0_205 = arith.constant 0 : index
    %192 = vector.load %arg2[%c32_204, %c0_205] : memref<72x256xf32, #tpu.memory_space<vmem>>, vector<8x256xf32>
    %193 = arith.mulf %175, %192 : vector<8x256xf32>
    %c32_206 = arith.constant 32 : index
    %c0_207 = arith.constant 0 : index
    %194 = vector.load %arg10[%c32_206, %c0_207] : memref<72x256xf32, #tpu.memory_space<vmem>>, vector<8x256xf32>
    tpu.vector_store %arg10[%c32_206, %c0_207], %193 {strides = array<i32>} : memref<72x256xf32, #tpu.memory_space<vmem>>, vector<8x256xf32>,
    %c255_i32_208 = arith.constant 255 : i32
    %195 = tpu.dynamic_rotate %175 by %c255_i32_208 dim 1 : vector<8x256xf32>, i32 -> vector<8x256xf32>
    %c40_209 = arith.constant 40 : index
    %c0_210 = arith.constant 0 : index
    %196 = vector.load %arg2[%c40_209, %c0_210] : memref<72x256xf32, #tpu.memory_space<vmem>>, vector<8x256xf32>
    %197 = arith.mulf %195, %196 : vector<8x256xf32>
    %c40_211 = arith.constant 40 : index
    %c0_212 = arith.constant 0 : index
    %198 = vector.load %arg10[%c40_211, %c0_212] : memref<72x256xf32, #tpu.memory_space<vmem>>, vector<8x256xf32>
    tpu.vector_store %arg10[%c40_211, %c0_212], %197 {strides = array<i32>} : memref<72x256xf32, #tpu.memory_space<vmem>>, vector<8x256xf32>,
    %c241_i32_213 = arith.constant 241 : i32
    %199 = tpu.dynamic_rotate %175 by %c241_i32_213 dim 1 : vector<8x256xf32>, i32 -> vector<8x256xf32>
    %c48_214 = arith.constant 48 : index
    %c0_215 = arith.constant 0 : index
    %200 = vector.load %arg2[%c48_214, %c0_215] : memref<72x256xf32, #tpu.memory_space<vmem>>, vector<8x256xf32>
    %201 = arith.mulf %199, %200 : vector<8x256xf32>
    %c48_216 = arith.constant 48 : index
    %c0_217 = arith.constant 0 : index
    %202 = vector.load %arg10[%c48_216, %c0_217] : memref<72x256xf32, #tpu.memory_space<vmem>>, vector<8x256xf32>
    tpu.vector_store %arg10[%c48_216, %c0_217], %201 {strides = array<i32>} : memref<72x256xf32, #tpu.memory_space<vmem>>, vector<8x256xf32>,
    %c240_i32_218 = arith.constant 240 : i32
    %203 = tpu.dynamic_rotate %175 by %c240_i32_218 dim 1 : vector<8x256xf32>, i32 -> vector<8x256xf32>
    %c56_219 = arith.constant 56 : index
    %c0_220 = arith.constant 0 : index
    %204 = vector.load %arg2[%c56_219, %c0_220] : memref<72x256xf32, #tpu.memory_space<vmem>>, vector<8x256xf32>
    %205 = arith.mulf %203, %204 : vector<8x256xf32>
    %c56_221 = arith.constant 56 : index
    %c0_222 = arith.constant 0 : index
    %206 = vector.load %arg10[%c56_221, %c0_222] : memref<72x256xf32, #tpu.memory_space<vmem>>, vector<8x256xf32>
    tpu.vector_store %arg10[%c56_221, %c0_222], %205 {strides = array<i32>} : memref<72x256xf32, #tpu.memory_space<vmem>>, vector<8x256xf32>,
    %c239_i32_223 = arith.constant 239 : i32
    %207 = tpu.dynamic_rotate %175 by %c239_i32_223 dim 1 : vector<8x256xf32>, i32 -> vector<8x256xf32>
    %c64_224 = arith.constant 64 : index
    %c0_225 = arith.constant 0 : index
    %208 = vector.load %arg2[%c64_224, %c0_225] : memref<72x256xf32, #tpu.memory_space<vmem>>, vector<8x256xf32>
    %209 = arith.mulf %207, %208 : vector<8x256xf32>
    %c64_226 = arith.constant 64 : index
    %c0_227 = arith.constant 0 : index
    %210 = vector.load %arg10[%c64_226, %c0_227] : memref<72x256xf32, #tpu.memory_space<vmem>>, vector<8x256xf32>
    tpu.vector_store %arg10[%c64_226, %c0_227], %209 {strides = array<i32>} : memref<72x256xf32, #tpu.memory_space<vmem>>, vector<8x256xf32>,
    %c1_228 = arith.constant 1 : index
    %c0_229 = arith.constant 0 : index
    %c0_230 = arith.constant 0 : index
    %c0_231 = arith.constant 0 : index
    %211 = vector.load %arg5[%c1_228, %c0_229, %c0_230, %c0_231] : memref<2x3x8x72xf32, #tpu.memory_space<vmem>>, vector<1x1x8x72xf32>
    %212 = vector.shape_cast %211 : vector<1x1x8x72xf32> to vector<8x72xf32>
    %c0_232 = arith.constant 0 : index
    %c0_233 = arith.constant 0 : index
    %213 = vector.load %arg10[%c0_232, %c0_233] : memref<72x256xf32, #tpu.memory_space<vmem>>, vector<72x256xf32>
    %cst_234 = arith.constant dense<0.000000e+00> : vector<8x256xf32>
    %214 = tpu.matmul %212, %213, %cst_234 {dimension_numbers = #tpu.dot_dimension_numbers<[1], [0], [0], [1], [0, 0, 1, 1], [], []>, precision = #tpu.contract_precision<fp32>} : vector<8x72xf32>, vector<72x256xf32>, vector<8x256xf32> -> vector<8x256xf32>
    %c1_235 = arith.constant 1 : index
    %c0_236 = arith.constant 0 : index
    %c0_237 = arith.constant 0 : index
    %c0_238 = arith.constant 0 : index
    %215 = vector.load %arg6[%c1_235, %c0_236, %c0_237, %c0_238] : memref<2x3x8x1xf32, #tpu.memory_space<vmem>>, vector<1x1x8x1xf32>
    %216 = vector.shape_cast %215 : vector<1x1x8x1xf32> to vector<8x1xf32>
    %217 = vector.broadcast %216 : vector<8x1xf32> to vector<8x256xf32>
    %218 = arith.addf %214, %217 : vector<8x256xf32>
    %cst_239 = arith.constant 0.000000e+00 : f32
    %219 = vector.broadcast %cst_239 : f32 to vector<8x256xf32>
    %220 = arith.maximumf %218, %219 : vector<8x256xf32>
    %c0_240 = arith.constant 0 : index
    %c0_241 = arith.constant 0 : index
    %221 = vector.load %arg11[%c0_240, %c0_241] : memref<32x256xf32, #tpu.memory_space<vmem>>, vector<8x256xf32>
    tpu.vector_store %arg11[%c0_240, %c0_241], %220 {strides = array<i32>} : memref<32x256xf32, #tpu.memory_space<vmem>>, vector<8x256xf32>,
    %222 = vector.extract_strided_slice %174 {offsets = [8, 0], sizes = [8, 256], strides = [1, 1]} : vector<32x256xf32> to vector<8x256xf32>
    %223 = arith.addf %220, %222 : vector<8x256xf32>
    %c17_i32_242 = arith.constant 17 : i32
    %224 = tpu.dynamic_rotate %223 by %c17_i32_242 dim 1 : vector<8x256xf32>, i32 -> vector<8x256xf32>
    %c0_243 = arith.constant 0 : index
    %c0_244 = arith.constant 0 : index
    %225 = vector.load %arg2[%c0_243, %c0_244] : memref<72x256xf32, #tpu.memory_space<vmem>>, vector<8x256xf32>
    %226 = arith.mulf %224, %225 : vector<8x256xf32>
    %c0_245 = arith.constant 0 : index
    %c0_246 = arith.constant 0 : index
    %227 = vector.load %arg10[%c0_245, %c0_246] : memref<72x256xf32, #tpu.memory_space<vmem>>, vector<8x256xf32>
    tpu.vector_store %arg10[%c0_245, %c0_246], %226 {strides = array<i32>} : memref<72x256xf32, #tpu.memory_space<vmem>>, vector<8x256xf32>,
    %c16_i32_247 = arith.constant 16 : i32
    %228 = tpu.dynamic_rotate %223 by %c16_i32_247 dim 1 : vector<8x256xf32>, i32 -> vector<8x256xf32>
    %c8_248 = arith.constant 8 : index
    %c0_249 = arith.constant 0 : index
    %229 = vector.load %arg2[%c8_248, %c0_249] : memref<72x256xf32, #tpu.memory_space<vmem>>, vector<8x256xf32>
    %230 = arith.mulf %228, %229 : vector<8x256xf32>
    %c8_250 = arith.constant 8 : index
    %c0_251 = arith.constant 0 : index
    %231 = vector.load %arg10[%c8_250, %c0_251] : memref<72x256xf32, #tpu.memory_space<vmem>>, vector<8x256xf32>
    tpu.vector_store %arg10[%c8_250, %c0_251], %230 {strides = array<i32>} : memref<72x256xf32, #tpu.memory_space<vmem>>, vector<8x256xf32>,
    %c15_i32_252 = arith.constant 15 : i32
    %232 = tpu.dynamic_rotate %223 by %c15_i32_252 dim 1 : vector<8x256xf32>, i32 -> vector<8x256xf32>
    %c16_253 = arith.constant 16 : index
    %c0_254 = arith.constant 0 : index
    %233 = vector.load %arg2[%c16_253, %c0_254] : memref<72x256xf32, #tpu.memory_space<vmem>>, vector<8x256xf32>
    %234 = arith.mulf %232, %233 : vector<8x256xf32>
    %c16_255 = arith.constant 16 : index
    %c0_256 = arith.constant 0 : index
    %235 = vector.load %arg10[%c16_255, %c0_256] : memref<72x256xf32, #tpu.memory_space<vmem>>, vector<8x256xf32>
    tpu.vector_store %arg10[%c16_255, %c0_256], %234 {strides = array<i32>} : memref<72x256xf32, #tpu.memory_space<vmem>>, vector<8x256xf32>,
    %c1_i32_257 = arith.constant 1 : i32
    %236 = tpu.dynamic_rotate %223 by %c1_i32_257 dim 1 : vector<8x256xf32>, i32 -> vector<8x256xf32>
    %c24_258 = arith.constant 24 : index
    %c0_259 = arith.constant 0 : index
    %237 = vector.load %arg2[%c24_258, %c0_259] : memref<72x256xf32, #tpu.memory_space<vmem>>, vector<8x256xf32>
    %238 = arith.mulf %236, %237 : vector<8x256xf32>
    %c24_260 = arith.constant 24 : index
    %c0_261 = arith.constant 0 : index
    %239 = vector.load %arg10[%c24_260, %c0_261] : memref<72x256xf32, #tpu.memory_space<vmem>>, vector<8x256xf32>
    tpu.vector_store %arg10[%c24_260, %c0_261], %238 {strides = array<i32>} : memref<72x256xf32, #tpu.memory_space<vmem>>, vector<8x256xf32>,
    %c32_262 = arith.constant 32 : index
    %c0_263 = arith.constant 0 : index
    %240 = vector.load %arg2[%c32_262, %c0_263] : memref<72x256xf32, #tpu.memory_space<vmem>>, vector<8x256xf32>
    %241 = arith.mulf %223, %240 : vector<8x256xf32>
    %c32_264 = arith.constant 32 : index
    %c0_265 = arith.constant 0 : index
    %242 = vector.load %arg10[%c32_264, %c0_265] : memref<72x256xf32, #tpu.memory_space<vmem>>, vector<8x256xf32>
    tpu.vector_store %arg10[%c32_264, %c0_265], %241 {strides = array<i32>} : memref<72x256xf32, #tpu.memory_space<vmem>>, vector<8x256xf32>,
    %c255_i32_266 = arith.constant 255 : i32
    %243 = tpu.dynamic_rotate %223 by %c255_i32_266 dim 1 : vector<8x256xf32>, i32 -> vector<8x256xf32>
    %c40_267 = arith.constant 40 : index
    %c0_268 = arith.constant 0 : index
    %244 = vector.load %arg2[%c40_267, %c0_268] : memref<72x256xf32, #tpu.memory_space<vmem>>, vector<8x256xf32>
    %245 = arith.mulf %243, %244 : vector<8x256xf32>
    %c40_269 = arith.constant 40 : index
    %c0_270 = arith.constant 0 : index
    %246 = vector.load %arg10[%c40_269, %c0_270] : memref<72x256xf32, #tpu.memory_space<vmem>>, vector<8x256xf32>
    tpu.vector_store %arg10[%c40_269, %c0_270], %245 {strides = array<i32>} : memref<72x256xf32, #tpu.memory_space<vmem>>, vector<8x256xf32>,
    %c241_i32_271 = arith.constant 241 : i32
    %247 = tpu.dynamic_rotate %223 by %c241_i32_271 dim 1 : vector<8x256xf32>, i32 -> vector<8x256xf32>
    %c48_272 = arith.constant 48 : index
    %c0_273 = arith.constant 0 : index
    %248 = vector.load %arg2[%c48_272, %c0_273] : memref<72x256xf32, #tpu.memory_space<vmem>>, vector<8x256xf32>
    %249 = arith.mulf %247, %248 : vector<8x256xf32>
    %c48_274 = arith.constant 48 : index
    %c0_275 = arith.constant 0 : index
    %250 = vector.load %arg10[%c48_274, %c0_275] : memref<72x256xf32, #tpu.memory_space<vmem>>, vector<8x256xf32>
    tpu.vector_store %arg10[%c48_274, %c0_275], %249 {strides = array<i32>} : memref<72x256xf32, #tpu.memory_space<vmem>>, vector<8x256xf32>,
    %c240_i32_276 = arith.constant 240 : i32
    %251 = tpu.dynamic_rotate %223 by %c240_i32_276 dim 1 : vector<8x256xf32>, i32 -> vector<8x256xf32>
    %c56_277 = arith.constant 56 : index
    %c0_278 = arith.constant 0 : index
    %252 = vector.load %arg2[%c56_277, %c0_278] : memref<72x256xf32, #tpu.memory_space<vmem>>, vector<8x256xf32>
    %253 = arith.mulf %251, %252 : vector<8x256xf32>
    %c56_279 = arith.constant 56 : index
    %c0_280 = arith.constant 0 : index
    %254 = vector.load %arg10[%c56_279, %c0_280] : memref<72x256xf32, #tpu.memory_space<vmem>>, vector<8x256xf32>
    tpu.vector_store %arg10[%c56_279, %c0_280], %253 {strides = array<i32>} : memref<72x256xf32, #tpu.memory_space<vmem>>, vector<8x256xf32>,
    %c239_i32_281 = arith.constant 239 : i32
    %255 = tpu.dynamic_rotate %223 by %c239_i32_281 dim 1 : vector<8x256xf32>, i32 -> vector<8x256xf32>
    %c64_282 = arith.constant 64 : index
    %c0_283 = arith.constant 0 : index
    %256 = vector.load %arg2[%c64_282, %c0_283] : memref<72x256xf32, #tpu.memory_space<vmem>>, vector<8x256xf32>
    %257 = arith.mulf %255, %256 : vector<8x256xf32>
    %c64_284 = arith.constant 64 : index
    %c0_285 = arith.constant 0 : index
    %258 = vector.load %arg10[%c64_284, %c0_285] : memref<72x256xf32, #tpu.memory_space<vmem>>, vector<8x256xf32>
    tpu.vector_store %arg10[%c64_284, %c0_285], %257 {strides = array<i32>} : memref<72x256xf32, #tpu.memory_space<vmem>>, vector<8x256xf32>,
    %c1_286 = arith.constant 1 : index
    %c1_287 = arith.constant 1 : index
    %c0_288 = arith.constant 0 : index
    %c0_289 = arith.constant 0 : index
    %259 = vector.load %arg5[%c1_286, %c1_287, %c0_288, %c0_289] : memref<2x3x8x72xf32, #tpu.memory_space<vmem>>, vector<1x1x8x72xf32>
    %260 = vector.shape_cast %259 : vector<1x1x8x72xf32> to vector<8x72xf32>
    %c0_290 = arith.constant 0 : index
    %c0_291 = arith.constant 0 : index
    %261 = vector.load %arg10[%c0_290, %c0_291] : memref<72x256xf32, #tpu.memory_space<vmem>>, vector<72x256xf32>
    %cst_292 = arith.constant dense<0.000000e+00> : vector<8x256xf32>
    %262 = tpu.matmul %260, %261, %cst_292 {dimension_numbers = #tpu.dot_dimension_numbers<[1], [0], [0], [1], [0, 0, 1, 1], [], []>, precision = #tpu.contract_precision<fp32>} : vector<8x72xf32>, vector<72x256xf32>, vector<8x256xf32> -> vector<8x256xf32>
    %c1_293 = arith.constant 1 : index
    %c1_294 = arith.constant 1 : index
    %c0_295 = arith.constant 0 : index
    %c0_296 = arith.constant 0 : index
    %263 = vector.load %arg6[%c1_293, %c1_294, %c0_295, %c0_296] : memref<2x3x8x1xf32, #tpu.memory_space<vmem>>, vector<1x1x8x1xf32>
    %264 = vector.shape_cast %263 : vector<1x1x8x1xf32> to vector<8x1xf32>
    %265 = vector.broadcast %264 : vector<8x1xf32> to vector<8x256xf32>
    %266 = arith.addf %262, %265 : vector<8x256xf32>
    %cst_297 = arith.constant 0.000000e+00 : f32
    %267 = vector.broadcast %cst_297 : f32 to vector<8x256xf32>
    %268 = arith.maximumf %266, %267 : vector<8x256xf32>
    %c8_298 = arith.constant 8 : index
    %c0_299 = arith.constant 0 : index
    %269 = vector.load %arg11[%c8_298, %c0_299] : memref<32x256xf32, #tpu.memory_space<vmem>>, vector<8x256xf32>
    tpu.vector_store %arg11[%c8_298, %c0_299], %268 {strides = array<i32>} : memref<32x256xf32, #tpu.memory_space<vmem>>, vector<8x256xf32>,
    %270 = vector.extract_strided_slice %174 {offsets = [16, 0], sizes = [8, 256], strides = [1, 1]} : vector<32x256xf32> to vector<8x256xf32>
    %271 = arith.addf %268, %270 : vector<8x256xf32>
    %c17_i32_300 = arith.constant 17 : i32
    %272 = tpu.dynamic_rotate %271 by %c17_i32_300 dim 1 : vector<8x256xf32>, i32 -> vector<8x256xf32>
    %c0_301 = arith.constant 0 : index
    %c0_302 = arith.constant 0 : index
    %273 = vector.load %arg2[%c0_301, %c0_302] : memref<72x256xf32, #tpu.memory_space<vmem>>, vector<8x256xf32>
    %274 = arith.mulf %272, %273 : vector<8x256xf32>
    %c0_303 = arith.constant 0 : index
    %c0_304 = arith.constant 0 : index
    %275 = vector.load %arg10[%c0_303, %c0_304] : memref<72x256xf32, #tpu.memory_space<vmem>>, vector<8x256xf32>
    tpu.vector_store %arg10[%c0_303, %c0_304], %274 {strides = array<i32>} : memref<72x256xf32, #tpu.memory_space<vmem>>, vector<8x256xf32>,
    %c16_i32_305 = arith.constant 16 : i32
    %276 = tpu.dynamic_rotate %271 by %c16_i32_305 dim 1 : vector<8x256xf32>, i32 -> vector<8x256xf32>
    %c8_306 = arith.constant 8 : index
    %c0_307 = arith.constant 0 : index
    %277 = vector.load %arg2[%c8_306, %c0_307] : memref<72x256xf32, #tpu.memory_space<vmem>>, vector<8x256xf32>
    %278 = arith.mulf %276, %277 : vector<8x256xf32>
    %c8_308 = arith.constant 8 : index
    %c0_309 = arith.constant 0 : index
    %279 = vector.load %arg10[%c8_308, %c0_309] : memref<72x256xf32, #tpu.memory_space<vmem>>, vector<8x256xf32>
    tpu.vector_store %arg10[%c8_308, %c0_309], %278 {strides = array<i32>} : memref<72x256xf32, #tpu.memory_space<vmem>>, vector<8x256xf32>,
    %c15_i32_310 = arith.constant 15 : i32
    %280 = tpu.dynamic_rotate %271 by %c15_i32_310 dim 1 : vector<8x256xf32>, i32 -> vector<8x256xf32>
    %c16_311 = arith.constant 16 : index
    %c0_312 = arith.constant 0 : index
    %281 = vector.load %arg2[%c16_311, %c0_312] : memref<72x256xf32, #tpu.memory_space<vmem>>, vector<8x256xf32>
    %282 = arith.mulf %280, %281 : vector<8x256xf32>
    %c16_313 = arith.constant 16 : index
    %c0_314 = arith.constant 0 : index
    %283 = vector.load %arg10[%c16_313, %c0_314] : memref<72x256xf32, #tpu.memory_space<vmem>>, vector<8x256xf32>
    tpu.vector_store %arg10[%c16_313, %c0_314], %282 {strides = array<i32>} : memref<72x256xf32, #tpu.memory_space<vmem>>, vector<8x256xf32>,
    %c1_i32_315 = arith.constant 1 : i32
    %284 = tpu.dynamic_rotate %271 by %c1_i32_315 dim 1 : vector<8x256xf32>, i32 -> vector<8x256xf32>
    %c24_316 = arith.constant 24 : index
    %c0_317 = arith.constant 0 : index
    %285 = vector.load %arg2[%c24_316, %c0_317] : memref<72x256xf32, #tpu.memory_space<vmem>>, vector<8x256xf32>
    %286 = arith.mulf %284, %285 : vector<8x256xf32>
    %c24_318 = arith.constant 24 : index
    %c0_319 = arith.constant 0 : index
    %287 = vector.load %arg10[%c24_318, %c0_319] : memref<72x256xf32, #tpu.memory_space<vmem>>, vector<8x256xf32>
    tpu.vector_store %arg10[%c24_318, %c0_319], %286 {strides = array<i32>} : memref<72x256xf32, #tpu.memory_space<vmem>>, vector<8x256xf32>,
    %c32_320 = arith.constant 32 : index
    %c0_321 = arith.constant 0 : index
    %288 = vector.load %arg2[%c32_320, %c0_321] : memref<72x256xf32, #tpu.memory_space<vmem>>, vector<8x256xf32>
    %289 = arith.mulf %271, %288 : vector<8x256xf32>
    %c32_322 = arith.constant 32 : index
    %c0_323 = arith.constant 0 : index
    %290 = vector.load %arg10[%c32_322, %c0_323] : memref<72x256xf32, #tpu.memory_space<vmem>>, vector<8x256xf32>
    tpu.vector_store %arg10[%c32_322, %c0_323], %289 {strides = array<i32>} : memref<72x256xf32, #tpu.memory_space<vmem>>, vector<8x256xf32>,
    %c255_i32_324 = arith.constant 255 : i32
    %291 = tpu.dynamic_rotate %271 by %c255_i32_324 dim 1 : vector<8x256xf32>, i32 -> vector<8x256xf32>
    %c40_325 = arith.constant 40 : index
    %c0_326 = arith.constant 0 : index
    %292 = vector.load %arg2[%c40_325, %c0_326] : memref<72x256xf32, #tpu.memory_space<vmem>>, vector<8x256xf32>
    %293 = arith.mulf %291, %292 : vector<8x256xf32>
    %c40_327 = arith.constant 40 : index
    %c0_328 = arith.constant 0 : index
    %294 = vector.load %arg10[%c40_327, %c0_328] : memref<72x256xf32, #tpu.memory_space<vmem>>, vector<8x256xf32>
    tpu.vector_store %arg10[%c40_327, %c0_328], %293 {strides = array<i32>} : memref<72x256xf32, #tpu.memory_space<vmem>>, vector<8x256xf32>,
    %c241_i32_329 = arith.constant 241 : i32
    %295 = tpu.dynamic_rotate %271 by %c241_i32_329 dim 1 : vector<8x256xf32>, i32 -> vector<8x256xf32>
    %c48_330 = arith.constant 48 : index
    %c0_331 = arith.constant 0 : index
    %296 = vector.load %arg2[%c48_330, %c0_331] : memref<72x256xf32, #tpu.memory_space<vmem>>, vector<8x256xf32>
    %297 = arith.mulf %295, %296 : vector<8x256xf32>
    %c48_332 = arith.constant 48 : index
    %c0_333 = arith.constant 0 : index
    %298 = vector.load %arg10[%c48_332, %c0_333] : memref<72x256xf32, #tpu.memory_space<vmem>>, vector<8x256xf32>
    tpu.vector_store %arg10[%c48_332, %c0_333], %297 {strides = array<i32>} : memref<72x256xf32, #tpu.memory_space<vmem>>, vector<8x256xf32>,
    %c240_i32_334 = arith.constant 240 : i32
    %299 = tpu.dynamic_rotate %271 by %c240_i32_334 dim 1 : vector<8x256xf32>, i32 -> vector<8x256xf32>
    %c56_335 = arith.constant 56 : index
    %c0_336 = arith.constant 0 : index
    %300 = vector.load %arg2[%c56_335, %c0_336] : memref<72x256xf32, #tpu.memory_space<vmem>>, vector<8x256xf32>
    %301 = arith.mulf %299, %300 : vector<8x256xf32>
    %c56_337 = arith.constant 56 : index
    %c0_338 = arith.constant 0 : index
    %302 = vector.load %arg10[%c56_337, %c0_338] : memref<72x256xf32, #tpu.memory_space<vmem>>, vector<8x256xf32>
    tpu.vector_store %arg10[%c56_337, %c0_338], %301 {strides = array<i32>} : memref<72x256xf32, #tpu.memory_space<vmem>>, vector<8x256xf32>,
    %c239_i32_339 = arith.constant 239 : i32
    %303 = tpu.dynamic_rotate %271 by %c239_i32_339 dim 1 : vector<8x256xf32>, i32 -> vector<8x256xf32>
    %c64_340 = arith.constant 64 : index
    %c0_341 = arith.constant 0 : index
    %304 = vector.load %arg2[%c64_340, %c0_341] : memref<72x256xf32, #tpu.memory_space<vmem>>, vector<8x256xf32>
    %305 = arith.mulf %303, %304 : vector<8x256xf32>
    %c64_342 = arith.constant 64 : index
    %c0_343 = arith.constant 0 : index
    %306 = vector.load %arg10[%c64_342, %c0_343] : memref<72x256xf32, #tpu.memory_space<vmem>>, vector<8x256xf32>
    tpu.vector_store %arg10[%c64_342, %c0_343], %305 {strides = array<i32>} : memref<72x256xf32, #tpu.memory_space<vmem>>, vector<8x256xf32>,
    %c1_344 = arith.constant 1 : index
    %c2_345 = arith.constant 2 : index
    %c0_346 = arith.constant 0 : index
    %c0_347 = arith.constant 0 : index
    %307 = vector.load %arg5[%c1_344, %c2_345, %c0_346, %c0_347] : memref<2x3x8x72xf32, #tpu.memory_space<vmem>>, vector<1x1x8x72xf32>
    %308 = vector.shape_cast %307 : vector<1x1x8x72xf32> to vector<8x72xf32>
    %c0_348 = arith.constant 0 : index
    %c0_349 = arith.constant 0 : index
    %309 = vector.load %arg10[%c0_348, %c0_349] : memref<72x256xf32, #tpu.memory_space<vmem>>, vector<72x256xf32>
    %cst_350 = arith.constant dense<0.000000e+00> : vector<8x256xf32>
    %310 = tpu.matmul %308, %309, %cst_350 {dimension_numbers = #tpu.dot_dimension_numbers<[1], [0], [0], [1], [0, 0, 1, 1], [], []>, precision = #tpu.contract_precision<fp32>} : vector<8x72xf32>, vector<72x256xf32>, vector<8x256xf32> -> vector<8x256xf32>
    %c1_351 = arith.constant 1 : index
    %c2_352 = arith.constant 2 : index
    %c0_353 = arith.constant 0 : index
    %c0_354 = arith.constant 0 : index
    %311 = vector.load %arg6[%c1_351, %c2_352, %c0_353, %c0_354] : memref<2x3x8x1xf32, #tpu.memory_space<vmem>>, vector<1x1x8x1xf32>
    %312 = vector.shape_cast %311 : vector<1x1x8x1xf32> to vector<8x1xf32>
    %313 = vector.broadcast %312 : vector<8x1xf32> to vector<8x256xf32>
    %314 = arith.addf %310, %313 : vector<8x256xf32>
    %cst_355 = arith.constant 0.000000e+00 : f32
    %315 = vector.broadcast %cst_355 : f32 to vector<8x256xf32>
    %316 = arith.maximumf %314, %315 : vector<8x256xf32>
    %c16_356 = arith.constant 16 : index
    %c0_357 = arith.constant 0 : index
    %317 = vector.load %arg11[%c16_356, %c0_357] : memref<32x256xf32, #tpu.memory_space<vmem>>, vector<8x256xf32>
    tpu.vector_store %arg11[%c16_356, %c0_357], %316 {strides = array<i32>} : memref<32x256xf32, #tpu.memory_space<vmem>>, vector<8x256xf32>,
    %318 = vector.extract_strided_slice %174 {offsets = [24, 0], sizes = [8, 256], strides = [1, 1]} : vector<32x256xf32> to vector<8x256xf32>
    %c24_358 = arith.constant 24 : index
    %c0_359 = arith.constant 0 : index
    %319 = vector.load %arg11[%c24_358, %c0_359] : memref<32x256xf32, #tpu.memory_space<vmem>>, vector<8x256xf32>
    tpu.vector_store %arg11[%c24_358, %c0_359], %318 {strides = array<i32>} : memref<32x256xf32, #tpu.memory_space<vmem>>, vector<8x256xf32>,
    %c1_360 = arith.constant 1 : index
    %c0_361 = arith.constant 0 : index
    %c0_362 = arith.constant 0 : index
    %320 = vector.load %arg7[%c1_360, %c0_361, %c0_362] : memref<2x16x32xf32, #tpu.memory_space<vmem>>, vector<1x16x32xf32>
    %321 = vector.shape_cast %320 : vector<1x16x32xf32> to vector<16x32xf32>
    %c0_363 = arith.constant 0 : index
    %c0_364 = arith.constant 0 : index
    %322 = vector.load %arg11[%c0_363, %c0_364] : memref<32x256xf32, #tpu.memory_space<vmem>>, vector<32x256xf32>
    %cst_365 = arith.constant dense<0.000000e+00> : vector<16x256xf32>
    %323 = tpu.matmul %321, %322, %cst_365 {dimension_numbers = #tpu.dot_dimension_numbers<[1], [0], [0], [1], [0, 0, 1, 1], [], []>, precision = #tpu.contract_precision<fp32>} : vector<16x32xf32>, vector<32x256xf32>, vector<16x256xf32> -> vector<16x256xf32>
    %c1_366 = arith.constant 1 : index
    %c0_367 = arith.constant 0 : index
    %c0_368 = arith.constant 0 : index
    %324 = vector.load %arg8[%c1_366, %c0_367, %c0_368] : memref<2x16x1xf32, #tpu.memory_space<vmem>>, vector<1x16x1xf32>
    %325 = vector.shape_cast %324 : vector<1x16x1xf32> to vector<16x1xf32>
    %326 = vector.broadcast %325 : vector<16x1xf32> to vector<16x256xf32>
    %327 = arith.addf %323, %326 : vector<16x256xf32>
    %328 = arith.addf %327, %165 : vector<16x256xf32>
    %cst_369 = arith.constant 0.000000e+00 : f32
    %329 = vector.broadcast %cst_369 : f32 to vector<16x256xf32>
    %330 = arith.maximumf %328, %329 : vector<16x256xf32>
    %c0_370 = arith.constant 0 : index
    %c0_371 = arith.constant 0 : index
    %331 = vector.load %arg9[%c0_370, %c0_371] : memref<16x256xf32, #tpu.memory_space<vmem>>, vector<16x256xf32>
    tpu.vector_store %arg9[%c0_370, %c0_371], %330 {strides = array<i32>} : memref<16x256xf32, #tpu.memory_space<vmem>>, vector<16x256xf32>,
    return
  }
  func.func @transform_0(%arg0: i32) -> (i32, i32) {
    %c0_i32 = arith.constant 0 : i32
    %c0_i32_0 = arith.constant 0 : i32
    return %c0_i32, %arg0 : i32, i32
  }
  func.func @transform_1(%arg0: i32) -> (i32, i32) {
    %c0_i32 = arith.constant 0 : i32
    %c0_i32_0 = arith.constant 0 : i32
    %c0_i32_1 = arith.constant 0 : i32
    return %c0_i32, %c0_i32_0 : i32, i32
  }
  func.func @transform_2(%arg0: i32) -> (i32, i32, i32) {
    %c0_i32 = arith.constant 0 : i32
    %c0_i32_0 = arith.constant 0 : i32
    %c0_i32_1 = arith.constant 0 : i32
    %c0_i32_2 = arith.constant 0 : i32
    return %c0_i32, %c0_i32_0, %c0_i32_1 : i32, i32, i32
  }
  func.func @transform_3(%arg0: i32) -> (i32, i32, i32) {
    %c0_i32 = arith.constant 0 : i32
    %c0_i32_0 = arith.constant 0 : i32
    %c0_i32_1 = arith.constant 0 : i32
    %c0_i32_2 = arith.constant 0 : i32
    return %c0_i32, %c0_i32_0, %c0_i32_1 : i32, i32, i32
  }
  func.func @transform_4(%arg0: i32) -> (i32, i32, i32, i32) {
    %c0_i32 = arith.constant 0 : i32
    %c0_i32_0 = arith.constant 0 : i32
    %c0_i32_1 = arith.constant 0 : i32
    %c0_i32_2 = arith.constant 0 : i32
    %c0_i32_3 = arith.constant 0 : i32
    return %c0_i32, %c0_i32_0, %c0_i32_1, %c0_i32_2 : i32, i32, i32, i32
  }
  func.func @transform_5(%arg0: i32) -> (i32, i32, i32, i32) {
    %c0_i32 = arith.constant 0 : i32
    %c0_i32_0 = arith.constant 0 : i32
    %c0_i32_1 = arith.constant 0 : i32
    %c0_i32_2 = arith.constant 0 : i32
    %c0_i32_3 = arith.constant 0 : i32
    return %c0_i32, %c0_i32_0, %c0_i32_1, %c0_i32_2 : i32, i32, i32, i32
  }
  func.func @transform_6(%arg0: i32) -> (i32, i32, i32) {
    %c0_i32 = arith.constant 0 : i32
    %c0_i32_0 = arith.constant 0 : i32
    %c0_i32_1 = arith.constant 0 : i32
    %c0_i32_2 = arith.constant 0 : i32
    return %c0_i32, %c0_i32_0, %c0_i32_1 : i32, i32, i32
  }
  func.func @transform_7(%arg0: i32) -> (i32, i32, i32) {
    %c0_i32 = arith.constant 0 : i32
    %c0_i32_0 = arith.constant 0 : i32
    %c0_i32_1 = arith.constant 0 : i32
    %c0_i32_2 = arith.constant 0 : i32
    return %c0_i32, %c0_i32_0, %c0_i32_1 : i32, i32, i32
  }
  func.func @transform_8(%arg0: i32) -> (i32, i32) {
    %c0_i32 = arith.constant 0 : i32
    %c0_i32_0 = arith.constant 0 : i32
    return %c0_i32, %arg0 : i32, i32
  }
}

</mosaic_0001>

<bundles_post_ra>
// kernel: first_resnet_forward.1
= control target key start
LH: loop header
LB: loop body
LE: loop exit
PB: predicated region body
PF: predicated region fallthrough
CT: control target
= control target key end

     0   :  { %s6465_s27 = smov 0   ;;  %s6467_s28 = smov 0   ;;  %s9901_s0 = inlined_call_operand.vmem [shape: f32[16,512], index: 0, kind: input, shape index: {}]   ;;  %s9902_s1 = inlined_call_operand.vmem [shape: f32[72,256], index: 1, kind: input, shape index: {}]   ;;  %s9903_s2 = inlined_call_operand.vmem [shape: f32[2,32,16], index: 2, kind: input, shape index: {}]   ;;  %s9904_s3 = inlined_call_operand.vmem [shape: f32[2,32,1], index: 3, kind: input, shape index: {}]   ;;  %s9905_s4 = inlined_call_operand.vmem [shape: f32[2,3,8,72], index: 4, kind: input, shape index: {}]   ;;  %s9906_s5 = inlined_call_operand.vmem [shape: f32[2,3,8,1], index: 5, kind: input, shape index: {}]   ;;  %s9907_s6 = inlined_call_operand.vmem [shape: f32[2,16,32], index: 6, kind: input, shape index: {}]   ;;  %s9908_s7 = inlined_call_operand.vmem [shape: f32[2,16,1], index: 7, kind: input, shape index: {}]   ;;  %s9909_s8 = inlined_call_operand.vmem [shape: f32[16,512], index: 8, kind: output, shape index: {}]  }
   0x1   :  { %s6469_s29 = smov 0  }
   0x2 LB: > { %s9939_s30 = sadd.s32 4294967295, %s6409_s29   ;;  %s6482_s9 = sadd.s32 1, %s6409_s29   ;;  %s6409_s29 = sphi %s6469_s29, %s10220_s29   ;;  %s6405_s28 = sphi %s6467_s28, %s10219_s28   ;;  %s6401_s27 = sphi %s6465_s27, %s10218_s27  }
   0x3   : > { %s22_s10 = ssub.s32 %s6409_s29, %s6482_s9  ;;  %s25_s11 = sadd.s32 1, %s6405_s28 }
   0x4   : > { %p23_p0 = scmp.eq.s32.totalorder %s22_s10, 0  ;;  %p32_p1 = scmp.ne.s32.totalorder %s6405_s28, %s6401_s27 }
   0x5   : > { %p33_p2 = scmp.eq.s32.totalorder %s6409_s29, 0  ;;  %p209_p3 = scmp.eq.s32.totalorder %s9939_s30, 1 }
   0x6   : > { %s6493_s12 = scalar_select %p23_p0, %s6405_s28, %s25_s11  }
   0x7   : > { %p34_p4 = por %p33_p2, %p32_p1  ;;  %p6495_p5 = por %p209_p3, %p32_p1 }
   0x8   : > { %p6311_p6 = scmp.ge.s32.totalorder %s6409_s29, 2 }
   0xa   : > { %252 = sbr.rel (%p6311_p6) target bundleno = 23 (0x17), region = 44 }
   0xf   : > { %255 = sbr.rel (!%p34_p4) target bundleno = 23 (0x17), region = 48  ;;  %s257_s14 = sand.u32 (%p34_p4), 1, %s6405_s28  }
  0x10   : > { %s6345_s15 = sshll.u32 (%p34_p4), %s6409_s29, 4  ;;  %s6312_s16 = sshll.u32 (%p34_p4), %s257_s14, 5 }
  0x11   : > { %s262_s19 = scalar_lea.vmem (%p34_p4), %s9901_s0, %s6345_s15  ;;  %s259_s20 = scalar_lea.vmem (%p34_p4), [#allocation4], %s6312_s16 }
  0x12   : > { %v275_v0 = vld [vmem:[%s262_s19] sm:$0xff] (%p34_p4)  ;;  %v277_v1 = vld [vmem:[%s262_s19 + $0x8] sm:$0xff] (%p34_p4) }
  0x13   : > { %v279_v2 = vld [vmem:[%s262_s19 + $0x20] sm:$0xff] (%p34_p4)  ;;  %276 = vst [vmem:[%s259_s20] sm:$0xff] (%p34_p4), %v275_v0  ;;  %v281_v3 = vld [vmem:[%s262_s19 + $0x28] sm:$0xff] (%p34_p4) }
  0x14   : > { %278 = vst [vmem:[%s259_s20 + $0x8] sm:$0xff] %v277_v1 }
  0x15   : > { %280 = vst [vmem:[%s259_s20 + $0x10] sm:$0xff] %v279_v2 }
  0x16   : > { %282 = vst [vmem:[%s259_s20 + $0x18] sm:$0xff] %v281_v3 }
  0x17 PF: > { %p6315_p7 = scmp.ge.s32.totalorder %s6409_s29, 1  ;;  %p287_p8 = scmp.lt.s32.totalorder %s6409_s29, 3 }
  0x19   : > { %p288_p9 = pnand %p6315_p7, %p287_p8 }
  0x1b   : > { %291 = sbr.rel (%p288_p9) target bundleno = 2732 (0xaac), region = 71 }
  0x20   : > { %s294_s21 = sand.u32 1, %s6401_s27   ;;  %v332_v4 = vld [vmem:[%s9903_s2] sm:$0xff]  ;;  %vm360_vm0 = vcmask 130048   ;;  %v333_v5 = vld [vmem:[%s9903_s2 + $0x8] sm:$0xff]  ;;  %v6411_v9 = vmov 0   ;;  %v334_v10 = vld [vmem:[%s9903_s2 + $0x10] sm:$0xff] }
  0x21   : > { %v336_v6 = vld [vmem:[%s9904_s3] sm:$0xff]  ;;  %s6517_s11 = sshll.u32 %s294_s21, 5  ;;  %v362_v7 = vsel %vm360_vm0, %v332_v4, 0  ;;  %v365_v8 = vsel %vm360_vm0, %v333_v5, 0  ;;  %6380 = vset.pattern.permute.xlu0 %v6411_v9  ;;  %6381 = vset.pattern.permute.xlu2 %v6411_v9  ;;  %v368_v15 = vsel %vm360_vm0, %v334_v10, 0  ;;  %v335_v39 = vld [vmem:[%s9903_s2 + $0x18] sm:$0xff] }
  0x22   : > { %v6524_v11 = vand.u32 4294901760, %v362_v7  ;;  %v6526_v12 = vand.u32 4294901760, %v365_v8  ;;  %342 = vperm.xlu0 %6380, %v336_v6   ;;  %6382 = vset.pattern.permute.xlu1 %v6411_v9  ;;  %s6529_s15 = scalar_lea.vmem [#allocation4], %s6517_s11  ;;  %v6545_v27 = vand.u32 4294901760, %v368_v15  ;;  %v371_v46 = vsel %vm360_vm0, %v335_v39, 0  ;;  %s6412_s18 = smov 113  }
  0x23   : > { %v330_v13 = vld [vmem:[%s6529_s15 + $0x10] sm:$0xff]  ;;  %v328_v14 = vld [vmem:[%s6529_s15] sm:$0xff]  ;;  %v331_v16 = vld [vmem:[%s6529_s15 + $0x18] sm:$0xff]  ;;  %v415_v51 = vand.u32 4294901760, %v371_v46  ;;  %s6413_s19 = smov 112   ;;  %s6414_s20 = smov 111  }
  0x24   : > { %v387_v17 = vand.u32 4294901760, %v330_v13  ;;  %v389_v18 = vand.u32 4294901760, %v328_v14  ;;  %v6536_v19 = vsub.f32 %v362_v7, %v6524_v11  ;;  %v6539_v20 = vsub.f32 %v365_v8, %v6526_v12  ;;  %v329_v21 = vld [vmem:[%s6529_s15 + $0x8] sm:$0xff]  ;;  %s6415_s21 = smov 15   ;;  %s6416_s22 = smov 127  }
  0x25   : > { %v639_v22 = vand.u32 4294901760, %v331_v16  ;;  %v641_v23 = vand.u32 4294901760, %v329_v21  ;;  %v6560_v45 = vsub.f32 %v368_v15, %v6545_v27  ;;  %v416_v53 = vsub.f32 %v371_v46, %v415_v51  ;;  %s6417_s23 = smov 1   ;;  %s9940_s24 = smov 16   ;;  %v1016_v46 = vld [vmem:[%s9906_s5] sm:$0xff] }
  0x26   : > { %388 = vmatpush.msra.mxu0 %v387_v17  ;;  %v439_v24 = vsub.f32 %v330_v13, %v387_v17  ;;  %v6543_v25 = vand.u32 4294901760, %v6536_v19  ;;  %v445_v26 = vsub.f32 %v328_v14, %v389_v18  ;;  %523 = vmatpush.msra.mxu3 %v387_v17  ;;  %v6550_v33 = vand.u32 4294901760, %v6539_v20  ;;  %s6419_s25 = smov 17  }
  0x27   : > { %v691_v28 = vsub.f32 %v331_v16, %v639_v22  ;;  %v697_v29 = vsub.f32 %v329_v21, %v641_v23  ;;  %v409_v50 = vand.u32 4294901760, %v6560_v45  ;;  %v417_v55 = vand.u32 4294901760, %v416_v53 }
  0x28   : > { %483 = vmatpush.msra.mxu2 %v439_v24  ;;  %390 = vmatpush.msra.mxu0 %v389_v18  ;;  %v394_v30 = vsub.f32 %v6536_v19, %v6543_v25  ;;  %v440_v31 = vand.u32 4294901760, %v439_v24  ;;  %v446_v32 = vand.u32 4294901760, %v445_v26  ;;  %v402_v44 = vsub.f32 %v6539_v20, %v6550_v33 }
  0x29   : > { %525 = vmatpush.msra.mxu3 %v389_v18  ;;  %v692_v34 = vand.u32 4294901760, %v691_v28  ;;  %v698_v35 = vand.u32 4294901760, %v697_v29  ;;  %v410_v52 = vsub.f32 %v6560_v45, %v409_v50  ;;  %v418_v56 = vsub.f32 %v416_v53, %v417_v55 }
  0x2a   : > { %v395_v36 = vand.u32 4294901760, %v394_v30  ;;  %486 = vmatpush.msra.mxu2 %v445_v26  ;;  %v441_v37 = vsub.f32 %v439_v24, %v440_v31  ;;  %529 = vmatmul.f32.vlgmr.msra.gmra.mxu3 %v6543_v25  ;;  %v447_v38 = vsub.f32 %v445_v26, %v446_v32  ;;  %v403_v49 = vand.u32 4294901760, %v402_v44 }
  0x2b   : > { %489 = vmatmul.f32.vlgmr.msra.gmra.mxu2 %v6536_v19  ;;  %568 = vmatpush.msrb.mxu0 %v440_v31  ;;  %v693_v40 = vsub.f32 %v691_v28, %v692_v34  ;;  %v699_v41 = vsub.f32 %v697_v29, %v698_v35  ;;  %v411_v54 = vand.u32 4294901760, %v410_v52  ;;  %v419_v57 = vand.u32 4294901760, %v418_v56 }
  0x2c   : > { %396 = vmatmul.f32.vlgmr.msra.gmra.mxu0 %v395_v36  ;;  %v442_v42 = vand.u32 4294901760, %v441_v37  ;;  %v448_v43 = vand.u32 4294901760, %v447_v38  ;;  %640 = vmatpush.msrb.mxu2 %v639_v22  ;;  %vm1022_vm4 = vcmask 588800   ;;  %vm2830_vm10 = vcmask 261120  }
  0x2d   : > { %572 = vmatpush.msrb.mxu0 %v446_v32  ;;  %v694_v47 = vand.u32 4294901760, %v693_v40  ;;  %v700_v48 = vand.u32 4294901760, %v699_v41 }
  0x2e   : > { %443 = vmatpush.msra.mxu1 %v442_v42  ;;  %642 = vmatpush.msrb.mxu2 %v641_v23 }
  0x2f   : > { %695 = vmatpush.msrb.mxu3 %v694_v47  ;;  %735 = vmatpush.msra.mxu0 %v691_v28 }
  0x30   : > { %449 = vmatpush.msra.mxu1 %v448_v43  ;;  %820 = vmatpush.msra.mxu2 %v692_v34 }
  0x31   : > { %451 = vmatmul.f32.vlgmr.msra.gmra.mxu1 %v6524_v11  ;;  %701 = vmatpush.msrb.mxu3 %v700_v48 }
  0x32   : > { %535 = vmatmul.f32.gmra.mxu3 %v6550_v33  ;;  %605 = vmatpush.msrb.mxu1 %v387_v17 }
  0x33   : > { %494 = vmatmul.f32.gmra.mxu2 %v6539_v20  ;;  %738 = vmatpush.msra.mxu0 %v697_v29 }
  0x34   : > { %404 = vmatmul.f32.gmra.mxu0 %v403_v49  ;;  %607 = vmatpush.msrb.mxu1 %v389_v18 }
  0x35   : > { %824 = vmatpush.msra.mxu2 %v698_v35  ;;  %857 = vmatpush.msra.mxu3 %v639_v22 }
  0x36   : > { %775 = vmatpush.msra.mxu1 %v639_v22 }
  0x37   : > { %859 = vmatpush.msra.mxu3 %v641_v23 }
  0x38   : > { %777 = vmatpush.msra.mxu1 %v641_v23 }
  0x39   : > { %455 = vmatmul.f32.gmra.mxu1 %v6526_v12 }
  0x3a   : > { %541 = vmatmul.f32.gmra.mxu3 %v409_v50 }
  0x3b   : > { %499 = vmatmul.f32.gmra.mxu2 %v6560_v45 }
  0x3c   : > { %412 = vmatmul.f32.gmra.mxu0 %v411_v54 }
  0x41   : > { %459 = vmatmul.f32.gmra.mxu1 %v6545_v27 }
  0x42   : > { %547 = vmatmul.f32.gmra.mxu3 %v417_v55 }
  0x43   : > { %504 = vmatmul.f32.gmra.mxu2 %v416_v53 }
  0x44   : > { %420 = vmatmul.f32.gmra.mxu0 %v419_v57 }
  0x49   : > { %463 = vmatmul.f32.gmra.mxu1 %v415_v51 }
  0x4a   : > { %703 = vmatmul.f32.vlgmr.msrb.gmra.mxu3 %v6524_v11 }
  0x4b   : > { %648 = vmatmul.f32.vlgmr.msrb.gmra.mxu2 %v395_v36 }
  0x4c   : > { %574 = vmatmul.f32.vlgmr.msrb.gmra.mxu0 %v6524_v11 }
  0x51   : > { %609 = vmatmul.f32.vlgmr.msrb.gmra.mxu1 %v6524_v11 }
  0x52   : > { %707 = vmatmul.f32.gmra.mxu3 %v6526_v12 }
  0x53   : > { %656 = vmatmul.f32.gmra.mxu2 %v403_v49 }
  0x54   : > { %578 = vmatmul.f32.gmra.mxu0 %v6526_v12 }
  0x59   : > { %613 = vmatmul.f32.gmra.mxu1 %v6526_v12 }
  0x5a   : > { %711 = vmatmul.f32.gmra.mxu3 %v6545_v27 }
  0x5b   : > { %664 = vmatmul.f32.gmra.mxu2 %v411_v54 }
  0x5c   : > { %582 = vmatmul.f32.gmra.mxu0 %v6545_v27 }
  0x61   : > { %617 = vmatmul.f32.gmra.mxu1 %v6545_v27 }
  0x62   : > { %715 = vmatmul.f32.gmra.mxu3 %v415_v51 }
  0x63   : > { %672 = vmatmul.f32.gmra.mxu2 %v419_v57  ;;  %v6687_v57 = vld [vmem:[%s9902_s1 + $0x70] sm:$0xff] }
  0x64   : > { %586 = vmatmul.f32.gmra.mxu0 %v415_v51  ;;  %10011 = vst [vmem:[#allocation23_spill] sm:$0xff] %v6687_v57 }
  0x69   : > { %621 = vmatmul.f32.gmra.mxu1 %v415_v51 }
  0x6a   : > { %861 = vmatmul.f32.vlgmr.msra.gmra.mxu3 %v6524_v11 }
  0x6b   : > { %826 = vmatmul.f32.vlgmr.msra.gmra.mxu2 %v6524_v11 }
  0x6c   : > { %741 = vmatmul.f32.vlgmr.msra.gmra.mxu0 %v6536_v19 }
  0x71   : > { %781 = vmatmul.f32.vlgmr.msra.gmra.mxu1 %v6543_v25 }
  0x72   : > { %865 = vmatmul.f32.gmra.mxu3 %v6526_v12 }
  0x73   : > { %830 = vmatmul.f32.gmra.mxu2 %v6526_v12 }
  0x74   : > { %746 = vmatmul.f32.gmra.mxu0 %v6539_v20 }
  0x79   : > { %787 = vmatmul.f32.gmra.mxu1 %v6550_v33 }
  0x7a   : > { %869 = vmatmul.f32.gmra.mxu3 %v6545_v27 }
  0x7b   : > { %834 = vmatmul.f32.gmra.mxu2 %v6545_v27 }
  0x7c   : > { %751 = vmatmul.f32.gmra.mxu0 %v6560_v45  ;;  %v337_v45 = vld [vmem:[%s9904_s3 + $0x8] sm:$0xff] }
  0x81   : > { %793 = vmatmul.f32.gmra.mxu1 %v409_v50  ;;  %v889_v50 = vlaneseq }
  0x82   : > { %873 = vmatmul.f32.gmra.mxu3 %v415_v51 }
  0x83   : > { %838 = vmatmul.f32.gmra.mxu2 %v415_v51  ;;  %v6675_v54 = vand.u32 127, %v889_v50 }
  0x84   : > { %756 = vmatmul.f32.gmra.mxu0 %v416_v53 }
  0x85   : > { %vm975_vm1 = vcmp.lt.s32.totalorder %v6675_v54, 112  ;;  %vm949_vm2 = vcmp.lt.s32.totalorder %v6675_v54, 127  ;;  %vm988_vm3 = vcmp.lt.s32.totalorder %v6675_v54, 111  ;;  %vm962_vm5 = vcmp.lt.s32.totalorder %v6675_v54, 113 }
  0x86   : > { %vm904_vm6 = vcmp.lt.s32.totalorder %v6675_v54, 16  ;;  %vm930_vm7 = vcmp.lt.s32.totalorder %v6675_v54, 1  ;;  %vm917_vm8 = vcmp.lt.s32.totalorder %v6675_v54, 15  ;;  %vm891_vm9 = vcmp.lt.s32.totalorder %v6675_v54, 17 }
  0x89   : > { %799 = vmatmul.f32.gmra.mxu1 %v417_v55  ;;  %v6680_v55 = vld [vmem:[%s9902_s1 + $0x40] sm:$0xff] }
  0x8a   : > { %10010 = vst [vmem:[#allocation22_spill] sm:$0xff] %v6680_v55 }
  0x94   : > { %v343_v3 = vpop.permute.xlu0 %342 }
  0xa9   : > { %v397_v58 = vpop.f32.mrf.mxu0 }
  0xaa   : > { %v398_v7 = vadd.f32 %v397_v58, %v343_v3 }
  0xad   : > { %v530_v59 = vpop.f32.mrf.mxu3 }
  0xae   : > { %v452_v60 = vpop.f32.mrf.mxu1  ;;  %v490_v61 = vpop.f32.mrf.mxu2 }
  0xaf   : > { %v453_v9 = vadd.f32 %v452_v60, %v398_v7 }
  0xb1   : > { %v6591_v62 = vpop.f32.mrf.mxu0  ;;  %v491_v13 = vadd.f32 %v490_v61, %v453_v9 }
  0xb3   : > { %v531_v15 = vadd.f32 %v530_v59, %v491_v13  ;;  %v6694_v59 = vld [vmem:[%s9902_s1 + $0x78] sm:$0xff] }
  0xb4   : > { %10012 = vst [vmem:[#allocation24_spill] sm:$0xff] %v6694_v59 }
  0xb5   : > { %v6593_v63 = vpop.f32.mrf.mxu3 }
  0xb6   : > { %v6595_v0 = vpop.f32.mrf.mxu1  ;;  %v6597_v1 = vpop.f32.mrf.mxu2 }
  0xb9   : > { %v6599_v2 = vpop.f32.mrf.mxu0 }
  0xba   : > { %9994 = vst [vmem:[#allocation6_spill] sm:$0xff] %v6599_v2 }
  0xbd   : > { %v6601_v4 = vpop.f32.mrf.mxu3 }
  0xbe   : > { %9995 = vst [vmem:[#allocation7_spill] sm:$0xff] %v6601_v4  ;;  %v6603_v5 = vpop.f32.mrf.mxu1  ;;  %v6605_v6 = vpop.f32.mrf.mxu2 }
  0xbf   : > { %9996 = vst [vmem:[#allocation8_spill] sm:$0xff] %v6603_v5 }
  0xc0   : > { %9997 = vst [vmem:[#allocation9_spill] sm:$0xff] %v6605_v6 }
  0xc1   : > { %v6607_v8 = vpop.f32.mrf.mxu0 }
  0xc2   : > { %9998 = vst [vmem:[#allocation10_spill] sm:$0xff] %v6607_v8 }
  0xc5   : > { %v6609_v10 = vpop.f32.mrf.mxu3 }
  0xc6   : > { %9999 = vst [vmem:[#allocation11_spill] sm:$0xff] %v6609_v10  ;;  %v6611_v11 = vpop.f32.mrf.mxu1  ;;  %v6613_v12 = vpop.f32.mrf.mxu2 }
  0xc7   : > { %10000 = vst [vmem:[#allocation12_spill] sm:$0xff] %v6611_v11 }
  0xc8   : > { %10001 = vst [vmem:[#allocation13_spill] sm:$0xff] %v6613_v12 }
  0xc9   : > { %v575_v14 = vpop.f32.mrf.mxu0 }
  0xca   : > { %v576_v16 = vadd.f32 %v575_v14, %v531_v15  ;;  %v6710_v15 = vld [vmem:[%s9902_s1 + $0x50] sm:$0xff] }
  0xcb   : > { %10013 = vst [vmem:[#allocation25_spill] sm:$0xff] %v6710_v15 }
  0xcd   : > { %v704_v17 = vpop.f32.mrf.mxu3 }
  0xce   : > { %v610_v18 = vpop.f32.mrf.mxu1  ;;  %v649_v19 = vpop.f32.mrf.mxu2 }
  0xcf   : > { %v611_v20 = vadd.f32 %v610_v18, %v576_v16  ;;  %v650_v34 = vadd.f32 %v649_v19, %v343_v3  ;;  %v997_v19 = vld [vmem:[%s9905_s4] sm:$0xff] }
  0xd1   : > { %v877_v21 = vmax.f32 %v611_v20, 0.0  ;;  %v6615_v22 = vpop.f32.mrf.mxu0  ;;  %v705_v36 = vadd.f32 %v704_v17, %v650_v34 }
  0xd3   : > { %958 = vrot.lane.b32.xlu2 %v877_v21, %s6412_s18  ;;  %971 = vrot.lane.b32.xlu1 %v877_v21, %s6413_s19  ;;  %v941_v56 = vmul.f32 %v6680_v55, %v877_v21 }
  0xd4   : > { %984 = vrot.lane.b32.xlu0 %v877_v21, %s6414_s20 }
  0xd5   : > { %v6620_v23 = vpop.f32.mrf.mxu3  ;;  %v6702_v9 = vand.u32 4294901760, %v941_v56 }
  0xd6   : > { %v6622_v24 = vpop.f32.mrf.mxu1  ;;  %v6624_v25 = vpop.f32.mrf.mxu2 }
  0xd7   : > { %v6715_v17 = vsub.f32 %v941_v56, %v6702_v9 }
  0xd9   : > { %v6626_v26 = vpop.f32.mrf.mxu0 }
  0xda   : > { %10002 = vst [vmem:[#allocation14_spill] sm:$0xff] %v6626_v26 }
  0xdb   : > { %913 = vrot.lane.b32.xlu2 %v877_v21, %s6415_s21  ;;  %945 = vrot.lane.b32.xlu1 %v877_v21, %s6416_s22 }
  0xdc   : > { %926 = vrot.lane.b32.xlu0 %v877_v21, %s6417_s23 }
  0xdd   : > { %v6631_v27 = vpop.f32.mrf.mxu3 }
  0xde   : > { %10003 = vst [vmem:[#allocation15_spill] sm:$0xff] %v6631_v27  ;;  %v6633_v28 = vpop.f32.mrf.mxu1  ;;  %v6635_v29 = vpop.f32.mrf.mxu2 }
  0xdf   : > { %10004 = vst [vmem:[#allocation16_spill] sm:$0xff] %v6633_v28 }
  0xe0   : > { %10005 = vst [vmem:[#allocation17_spill] sm:$0xff] %v6635_v29 }
  0xe1   : > { %v6637_v30 = vpop.f32.mrf.mxu0 }
  0xe2   : > { %10006 = vst [vmem:[#allocation18_spill] sm:$0xff] %v6637_v30 }
  0xe3   : > { %900 = vrot.lane.b32.xlu1 %v877_v21, %s9940_s24 }
  0xe5   : > { %v6640_v31 = vpop.f32.mrf.mxu3 }
  0xe6   : > { %10007 = vst [vmem:[#allocation19_spill] sm:$0xff] %v6640_v31  ;;  %v6642_v32 = vpop.f32.mrf.mxu1  ;;  %v6644_v33 = vpop.f32.mrf.mxu2 }
  0xe7   : > { %10008 = vst [vmem:[#allocation20_spill] sm:$0xff] %v6642_v32 }
  0xe8   : > { %10009 = vst [vmem:[#allocation21_spill] sm:$0xff] %v6644_v33 }
  0xe9   : > { %v742_v35 = vpop.f32.mrf.mxu0 }
  0xea   : > { %v743_v37 = vadd.f32 %v742_v35, %v705_v36  ;;  %v6735_v35 = vld [vmem:[%s9902_s1 + $0x88] sm:$0xff] }
  0xeb   : > { %10014 = vst [vmem:[#allocation26_spill] sm:$0xff] %v6735_v35 }
  0xed   : > { %v862_v41 = vpop.f32.mrf.mxu3 }
  0xee   : > { %v782_v38 = vpop.f32.mrf.mxu1  ;;  %v827_v39 = vpop.f32.mrf.mxu2 }
  0xef   : > { %v783_v40 = vadd.f32 %v782_v38, %v743_v37  ;;  %v6740_v37 = vld [vmem:[%s9902_s1 + $0x60] sm:$0xff] }
  0xf0   : > { %10015 = vst [vmem:[#allocation27_spill] sm:$0xff] %v6740_v37 }
  0xf1   : > { %v828_v42 = vadd.f32 %v827_v39, %v783_v40 }
  0xf3   : > { %v863_v43 = vadd.f32 %v862_v41, %v828_v42  ;;  %v9910_v41 = vand.u32 4294901760, %v6715_v17  ;;  %v1024_v42 = vsel %vm1022_vm4, %v997_v19, 0  ;;  %v6782_v19 = vld [vmem:[%s9902_s1 + $0x48] sm:$0xff] }
  0xf4   : > { %10016 = vst [vmem:[#allocation28_spill] sm:$0xff] %v6782_v19 }
  0xf5   : > { %v6646_v44 = vmax.f32 %v863_v43, 0.0 }
  0xf7   : > { %973 = vrot.lane.b32.xlu2 %v6646_v44, %s6413_s19  ;;  %986 = vrot.lane.b32.xlu1 %v6646_v44, %s6414_s20 }
  0xf8   : > { %960 = vrot.lane.b32.xlu0 %v6646_v44, %s6412_s18 }
  0xff   : > { %947 = vrot.lane.b32.xlu2 %v6646_v44, %s6416_s22  ;;  %928 = vrot.lane.b32.xlu1 %v6646_v44, %s6417_s23 }
 0x100   : > { %915 = vrot.lane.b32.xlu0 %v6646_v44, %s6415_s21 }
 0x107   : > { %902 = vrot.lane.b32.xlu2 %v6646_v44, %s9940_s24  ;;  %887 = vrot.lane.b32.xlu1 %v6646_v44, %s6419_s25 }
 0x108   : > { %885 = vrot.lane.b32.xlu0 %v877_v21, %s6419_s25  ;;  %v6728_v21 = vld [vmem:[%s9902_s1 + $0x80] sm:$0xff] }
 0x10f   : > { %347 = vperm.xlu2 %6381, %v337_v45  }
 0x110   : > { %1019 = vperm.xlu0 %6380, %v1016_v46  }
 0x12d   : > { %v6671_v47 = vpop.permute.xlu2 %958 }
 0x135   : > { %v6673_v49 = vpop.permute.xlu2 %913 }
 0x145   : > { %v972_v48 = vpop.permute.xlu1 %971 }
 0x146   : > { %v985_v52 = vpop.permute.xlu0 %984 }
 0x14d   : > { %v946_v51 = vpop.permute.xlu1 %945 }
 0x14e   : > { %v6700_v3 = vpop.permute.xlu0 %926 }
 0x151   : > { %v974_v53 = vpop.permute.xlu2 %973 }
 0x152   : > { %v976_v58 = vsel %vm975_vm1, %v972_v48, %v974_v53  ;;  %v977_v60 = vsel %vm975_vm1, %v974_v53, %v972_v48 }
 0x153   : > { %v980_v13 = vmul.f32 %v6687_v57, %v976_v58  ;;  %v981_v14 = vmul.f32 %v6694_v59, %v977_v60  ;;  %v6767_v60 = vand.u32 4294901760, %v1024_v42 }
 0x155   : > { %v6698_v61 = vpop.permute.xlu1 %900  ;;  %v6717_v18 = vand.u32 4294901760, %v980_v13  ;;  %v6723_v20 = vand.u32 4294901760, %v981_v14 }
 0x157   : > { %v6753_v46 = vsub.f32 %v980_v13, %v6717_v18  ;;  %v6756_v48 = vsub.f32 %v981_v14, %v6723_v20  ;;  %v6777_v14 = vsub.f32 %v6715_v17, %v9910_v41  ;;  %v6830_v41 = vld [vmem:[%s9902_s1 + $0x20] sm:$0xff] }
 0x158   : > { %10021 = vst [vmem:[#allocation33_spill] sm:$0xff] %v6830_v41 }
 0x159   : > { %v948_v7 = vpop.permute.xlu2 %947  ;;  %v10023_v27 = vand.u32 4294901760, %v6756_v48  ;;  %v10039_v55 = vand.u32 4294901760, %v6753_v46 }
 0x15a   : > { %v950_v16 = vsel %vm949_vm2, %v946_v51, %v948_v7  ;;  %v951_v13 = vsel %vm949_vm2, %v948_v7, %v946_v51  ;;  %v6792_v51 = vld [vmem:[%s9902_s1 + $0x10] sm:$0xff] }
 0x15b   : > { %v954_v34 = vmul.f32 %v6710_v15, %v950_v16  ;;  %10018 = vst [vmem:[#allocation30_spill] sm:$0xff] %v6792_v51  ;;  %v6868_v29 = vsub.f32 %v6756_v48, %v10023_v27  ;;  %v6887_v27 = vld [vmem:[%s9902_s1 + $0x38] sm:$0xff] }
 0x15c   : > { %10025 = vst [vmem:[#allocation34_spill] sm:$0xff] %v6887_v27 }
 0x15d   : > { %v6763_v56 = vand.u32 4294901760, %v954_v34 }
 0x15f   : > { %v6833_v30 = vsub.f32 %v954_v34, %v6763_v56 }
 0x161   : > { %v6759_v50 = vpop.permute.xlu2 %902 }
 0x162   : > { %v906_v7 = vsel %vm904_vm6, %v6759_v50, %v6698_v61 }
 0x163   : > { %v909_v10 = vmul.f32 %v6792_v51, %v906_v7 }
 0x165   : > { %v6880_v4 = vand.u32 4294901760, %v909_v10 }
 0x169   : > { %v987_v36 = vpop.permute.xlu1 %986 }
 0x16a   : > { %v989_v38 = vsel %vm988_vm3, %v985_v52, %v987_v36  ;;  %v990_v39 = vsel %vm988_vm3, %v987_v36, %v985_v52  ;;  %v961_v40 = vpop.permute.xlu0 %960  ;;  %v6787_v36 = vld [vmem:[%s9902_s1 + $0x58] sm:$0xff] }
 0x16b   : > { %v993_v43 = vmul.f32 %v6728_v21, %v989_v38  ;;  %v963_v45 = vsel %vm962_vm5, %v6671_v47, %v961_v40  ;;  %v994_v52 = vmul.f32 %v6735_v35, %v990_v39  ;;  %10017 = vst [vmem:[#allocation29_spill] sm:$0xff] %v6787_v36  ;;  %v6804_v39 = vld [vmem:[%s9902_s1 + $0x68] sm:$0xff] }
 0x16c   : > { %v967_v53 = vmul.f32 %v6740_v37, %v963_v45  ;;  %10019 = vst [vmem:[#allocation31_spill] sm:$0xff] %v6804_v39  ;;  %v964_v45 = vsel %vm962_vm5, %v961_v40, %v6671_v47  ;;  %v6840_v47 = vmul.f32 %v6782_v19, %v6646_v44  ;;  %v955_v40 = vmul.f32 %v6787_v36, %v951_v13 }
 0x16d   : > { %v6765_v58 = vand.u32 4294901760, %v993_v43  ;;  %v6812_v31 = vand.u32 4294901760, %v994_v52  ;;  %v968_v12 = vmul.f32 %v6804_v39, %v964_v45  ;;  %v10022_v13 = vand.u32 4294901760, %v6753_v46  ;;  %v6923_v39 = vld [vmem:[%s9902_s1] sm:$0xff] }
 0x16e   : > { %v6771_v16 = vand.u32 4294901760, %v967_v53  ;;  %10028 = vst [vmem:[#allocation36_spill] sm:$0xff] %v6923_v39 }
 0x16f   : > { %v6799_v38 = vsub.f32 %v993_v43, %v6765_v58  ;;  %1034 = vmatpush.msrb.mxu0 %v6765_v58  ;;  %1174 = vmatpush.msrb.mxu3 %v6765_v58  ;;  %v6817_v43 = vld [vmem:[%s9902_s1 + $0x30] sm:$0xff]  ;;  %v1076_v7 = vsub.f32 %v6753_v46, %v10022_v13  ;;  %v6859_v45 = vsub.f32 %v994_v52, %v6812_v31 }
 0x170   : > { %10020 = vst [vmem:[#allocation32_spill] sm:$0xff] %v6817_v43  ;;  %v6821_v33 = vsub.f32 %v967_v53, %v6771_v16  ;;  %v6836_v53 = vsub.f32 %v1024_v42, %v6767_v60 }
 0x171   : > { %v929_v32 = vpop.permute.xlu1 %928  ;;  %1036 = vmatpush.msrb.mxu0 %v6717_v18  ;;  %1135 = vmatpush.msrb.mxu2 %v6799_v38  ;;  %v10024_v52 = vand.u32 4294901760, %v6799_v38 }
 0x172   : > { %v932_v11 = vsel %vm930_vm7, %v929_v32, %v6700_v3  ;;  %1176 = vmatpush.msrb.mxu3 %v6717_v18  ;;  %v916_v34 = vpop.permute.xlu0 %915  ;;  %v6878_v26 = vand.u32 4294901760, %v6836_v53  ;;  %v931_v6 = vsel %vm930_vm7, %v6700_v3, %v929_v32  ;;  %v10026_v2 = vand.u32 4294901760, %v6821_v33  ;;  %v6909_v3 = vld [vmem:[%s9902_s1 + $0x28] sm:$0xff] }
 0x173   : > { %v935_v42 = vmul.f32 %v6817_v43, %v932_v11  ;;  %v919_v44 = vsel %vm917_vm8, %v916_v34, %v6673_v49  ;;  %1038 = vmatpush.msrb.mxu0 %v6771_v16  ;;  %1138 = vmatpush.msrb.mxu2 %v6753_v46  ;;  %v1070_v13 = vsub.f32 %v6799_v38, %v10024_v52  ;;  %v6882_v11 = vand.u32 4294901760, %v968_v12 }
 0x174   : > { %v922_v8 = vmul.f32 %v6830_v41, %v919_v44  ;;  %1178 = vmatpush.msrb.mxu3 %v6771_v16  ;;  %v6896_v52 = vand.u32 4294901760, %v955_v40  ;;  %v1082_v43 = vsub.f32 %v6821_v33, %v10026_v2  ;;  %10027 = vst [vmem:[#allocation35_spill] sm:$0xff] %v6909_v3  ;;  %v918_v41 = vsel %vm917_vm8, %v6673_v49, %v916_v34 }
 0x175   : > { %v6870_v28 = vand.u32 4294901760, %v935_v42  ;;  %1040 = vmatpush.msrb.mxu0 %v6763_v56  ;;  %1141 = vmatpush.msrb.mxu2 %v6821_v33  ;;  %v1071_v44 = vand.u32 4294901760, %v1070_v13  ;;  %v1077_v13 = vand.u32 4294901760, %v1076_v7  ;;  %v10029_v49 = vand.u32 4294901760, %v6833_v30 }
 0x176   : > { %v6892_v5 = vand.u32 4294901760, %v922_v8  ;;  %1180 = vmatpush.msrb.mxu3 %v6763_v56  ;;  %v1054_v7 = vsub.f32 %v6836_v53, %v6878_v26  ;;  %v6953_v36 = vsub.f32 %v955_v40, %v6896_v52  ;;  %v923_v59 = vmul.f32 %v6909_v3, %v918_v41 }
 0x177   : > { %1042 = vmatpush.msrb.mxu0 %v6702_v9  ;;  %v6903_v19 = vsub.f32 %v935_v42, %v6870_v28  ;;  %1144 = vmatpush.msrb.mxu2 %v6833_v30  ;;  %v936_v42 = vmul.f32 %v6887_v27, %v931_v6  ;;  %v1088_v34 = vsub.f32 %v6833_v30, %v10029_v49  ;;  %v6935_v6 = vld [vmem:[%s9902_s1 + $0x18] sm:$0xff]  ;;  %v10032_v41 = vand.u32 4294901760, %v6859_v45 }
 0x178   : > { %1182 = vmatpush.msrb.mxu3 %v6702_v9  ;;  %v6917_v2 = vsub.f32 %v922_v8, %v6892_v5  ;;  %1072 = vmatpush.msrb.mxu1 %v1071_v44  ;;  %10030 = vst [vmem:[#allocation37_spill] sm:$0xff] %v6935_v6  ;;  %v905_v44 = vsel %vm904_vm6, %v6698_v61, %v6759_v50  ;;  %v6950_v8 = vand.u32 4294901760, %v6840_v47  ;;  %v1083_v61 = vand.u32 4294901760, %v1082_v43 }
 0x179   : > { %v888_v32 = vpop.permute.xlu1 %887  ;;  %1044 = vmatpush.msrb.mxu0 %v6870_v28  ;;  %v6942_v27 = vsub.f32 %v968_v12, %v6882_v11  ;;  %1147 = vmatpush.msrb.mxu2 %v6715_v17  ;;  %v6947_v49 = vsub.f32 %v909_v10, %v6880_v4  ;;  %v6962_v10 = vld [vmem:[%s9902_s1 + $0x8] sm:$0xff]  ;;  %v910_v3 = vmul.f32 %v6935_v6, %v905_v44  ;;  %v6974_v57 = vand.u32 4294901760, %v936_v42 }
 0x17a   : > { %v886_v51 = vpop.permute.xlu0 %885  ;;  %1184 = vmatpush.msrb.mxu3 %v6870_v28  ;;  %1078 = vmatpush.msrb.mxu1 %v1077_v13  ;;  %10031 = vst [vmem:[#allocation38_spill] sm:$0xff] %v6962_v10  ;;  %v1320_v13 = vsub.f32 %v6859_v45, %v10032_v41  ;;  %v6984_v41 = vand.u32 4294901760, %v1054_v7  ;;  %v1095_v6 = vand.u32 4294901760, %v6777_v14  ;;  %v10034_v43 = vand.u32 4294901760, %v6917_v2 }
 0x17b   : > { %v893_v12 = vsel %vm891_vm9, %v888_v32, %v886_v51  ;;  %1046 = vmatpush.msrb.mxu0 %v6892_v5  ;;  %v892_v50 = vsel %vm891_vm9, %v886_v51, %v888_v32  ;;  %1150 = vmatpush.msrb.mxu2 %v6903_v19  ;;  %v1089_v51 = vand.u32 4294901760, %v1088_v34  ;;  %v10033_v32 = vand.u32 4294901760, %v6903_v19 }
 0x17c   : > { %v896_v40 = vmul.f32 %v6923_v39, %v893_v12  ;;  %1186 = vmatpush.msrb.mxu3 %v6892_v5  ;;  %1084 = vmatpush.msrb.mxu1 %v1083_v61  ;;  %v6988_v61 = vand.u32 4294901760, %v923_v59  ;;  %v897_v34 = vmul.f32 %v6962_v10, %v892_v50  ;;  %v1321_v7 = vand.u32 4294901760, %v1320_v13 }
 0x17d   : > { %1048 = vmatpush.msrb.mxu0 %v6880_v4  ;;  %v1100_v12 = vsub.f32 %v6903_v19, %v10033_v32  ;;  %1153 = vmatpush.msrb.mxu2 %v6917_v2  ;;  %v6994_v32 = vsub.f32 %v6840_v47, %v6950_v8  ;;  %v1106_v35 = vsub.f32 %v6917_v2, %v10034_v43  ;;  %v10035_v13 = vand.u32 4294901760, %v6942_v27 }
 0x17e   : > { %v6980_v39 = vand.u32 4294901760, %v896_v40  ;;  %1188 = vmatpush.msrb.mxu3 %v6880_v4  ;;  %1090 = vmatpush.msrb.mxu1 %v1089_v51  ;;  %v7005_v51 = vand.u32 4294901760, %v910_v3  ;;  %v7008_v14 = vsub.f32 %v936_v42, %v6974_v57  ;;  %v10036_v50 = vand.u32 4294901760, %v6947_v49 }
 0x17f   : > { %1156 = vmatpush.msrb.mxu2 %v6947_v49  ;;  %v1101_v47 = vand.u32 4294901760, %v1100_v12  ;;  %v1332_v43 = vsub.f32 %v6942_v27, %v10035_v13  ;;  %v7023_v37 = vand.u32 4294901760, %v897_v34  ;;  %v10037_v12 = vand.u32 4294901760, %v6799_v38 }
 0x180   : > { %1050 = vmatpush.msrb.mxu0 %v6980_v39  ;;  %v6999_v44 = vsub.f32 %v896_v40, %v6980_v39  ;;  %1096 = vmatpush.msrb.mxu1 %v1095_v6  ;;  %v1327_v40 = vand.u32 4294901760, %v6868_v29  ;;  %v1112_v10 = vsub.f32 %v6947_v49, %v10036_v50  ;;  %v7021_v6 = vsub.f32 %v923_v59, %v6988_v61 }
 0x181   : > { %1190 = vmatpush.msrb.mxu3 %v6980_v39  ;;  %1056 = vmatmul.f32.vlgmr.msrb.gmra.mxu0 %v6984_v41  ;;  %v1343_v29 = vand.u32 4294901760, %v6994_v32  ;;  %v10038_v13 = vand.u32 4294901760, %v6953_v36  ;;  %v7034_v59 = vsub.f32 %v910_v3, %v7005_v51  ;;  %v1349_v38 = vand.u32 4294901760, %v7008_v14 }
 0x182   : > { %v1117_v42 = vand.u32 4294901760, %v6999_v44  ;;  %1208 = vmatpush.msra.mxu0 %v10037_v12  ;;  %1102 = vmatpush.msrb.mxu1 %v1101_v47  ;;  %v1113_v47 = vand.u32 4294901760, %v1112_v10  ;;  %v1355_v46 = vand.u32 4294901760, %v7021_v6  ;;  %v10041_v10 = vand.u32 4294901760, %v6833_v30 }
 0x183   : > { %1322 = vmatpush.msra.mxu3 %v1321_v7  ;;  %1159 = vmatpush.msrb.mxu2 %v6999_v44  ;;  %v1107_v7 = vand.u32 4294901760, %v1106_v35  ;;  %v1338_v50 = vsub.f32 %v6953_v36, %v10038_v13  ;;  %v1333_v35 = vand.u32 4294901760, %v1332_v43 }
 0x184   : > { %v1118_v15 = vsub.f32 %v6999_v44, %v1117_v42  ;;  %1212 = vmatpush.msra.mxu0 %v10039_v55  ;;  %1162 = vmatmul.f32.vlgmr.msrb.gmra.mxu2 %v6836_v53  ;;  %v10040_v44 = vand.u32 4294901760, %v6821_v33  ;;  %v1344_v55 = vsub.f32 %v6994_v32, %v1343_v29  ;;  %v1350_v33 = vsub.f32 %v7008_v14, %v1349_v38 }
 0x185   : > { %1328 = vmatpush.msra.mxu3 %v1327_v40  ;;  %1284 = vmatpush.msra.mxu2 %v6812_v31  ;;  %v7042_v40 = vsub.f32 %v897_v34, %v7023_v37  ;;  %v1339_v12 = vand.u32 4294901760, %v1338_v50  ;;  %v10042_v34 = vand.u32 4294901760, %v6715_v17  ;;  %v10043_v50 = vand.u32 4294901760, %v6903_v19 }
 0x186   : > { %1108 = vmatpush.msrb.mxu1 %v1107_v7  ;;  %1216 = vmatpush.msra.mxu0 %v10040_v44  ;;  %v1119_v3 = vand.u32 4294901760, %v1118_v15  ;;  %v1361_v15 = vand.u32 4294901760, %v7034_v59  ;;  %v1345_v43 = vand.u32 4294901760, %v1344_v55  ;;  %v1356_v7 = vsub.f32 %v7021_v6, %v1355_v46 }
 0x187   : > { %1286 = vmatpush.msra.mxu2 %v6723_v20  ;;  %1334 = vmatpush.msra.mxu3 %v1333_v35  ;;  %v1367_v30 = vand.u32 4294901760, %v7042_v40  ;;  %v1351_v13 = vand.u32 4294901760, %v1350_v33  ;;  %v10045_v44 = vand.u32 4294901760, %v6947_v49 }
 0x188   : > { %1114 = vmatpush.msrb.mxu1 %v1113_v47  ;;  %1194 = vmatmul.f32.vlgmr.msrb.gmra.mxu3 %v6878_v26  ;;  %v1362_v17 = vsub.f32 %v7034_v59, %v1361_v15  ;;  %v1357_v35 = vand.u32 4294901760, %v1356_v7 }
 0x189   : > { %1220 = vmatpush.msra.mxu0 %v10041_v10  ;;  %1288 = vmatpush.msra.mxu2 %v6882_v11  ;;  %v1368_v47 = vsub.f32 %v7042_v40, %v1367_v30 }
 0x18a   : > { %1340 = vmatpush.msra.mxu3 %v1339_v12  ;;  %1120 = vmatpush.msrb.mxu1 %v1119_v3  ;;  %v1363_v19 = vand.u32 4294901760, %v1362_v17 }
 0x18b   : > { %1224 = vmatpush.msra.mxu0 %v10042_v34  ;;  %1122 = vmatmul.f32.vlgmr.msrb.gmra.mxu1 %v6767_v60 }
 0x18c   : > { %1290 = vmatpush.msra.mxu2 %v6896_v52  ;;  %1254 = vmatpush.msra.mxu1 %v6765_v58  ;;  %v10044_v58 = vand.u32 4294901760, %v6917_v2  ;;  %v1020_v2 = vpop.permute.xlu0 %1019 }
 0x18d   : > { %1346 = vmatpush.msra.mxu3 %v1345_v43  ;;  %1228 = vmatpush.msra.mxu0 %v10043_v50 }
 0x18e   : > { %1292 = vmatpush.msra.mxu2 %v6950_v8  ;;  %1256 = vmatpush.msra.mxu1 %v6717_v18  ;;  %v1369_v18 = vand.u32 4294901760, %v1368_v47 }
 0x18f   : > { %1352 = vmatpush.msra.mxu3 %v1351_v13  ;;  %1232 = vmatpush.msra.mxu0 %v10044_v58 }
 0x190   : > { %1294 = vmatpush.msra.mxu2 %v6974_v57  ;;  %1258 = vmatpush.msra.mxu1 %v6771_v16  ;;  %v866_v16 = vpop.f32.mrf.mxu3 }
 0x191   : > { %1358 = vmatpush.msra.mxu3 %v1357_v35  ;;  %1236 = vmatpush.msra.mxu0 %v10045_v44  ;;  %v338_v44 = vld [vmem:[%s9904_s3 + $0x10] sm:$0xff] }
 0x192   : > { %1296 = vmatpush.msra.mxu2 %v6988_v61  ;;  %1260 = vmatpush.msra.mxu1 %v6763_v56  ;;  %v10046_v56 = vand.u32 4294901760, %v6859_v45 }
 0x193   : > { %1364 = vmatpush.msra.mxu3 %v1363_v19  ;;  %1240 = vmatpush.msra.mxu0 %v1117_v42 }
 0x194   : > { %1298 = vmatpush.msra.mxu2 %v7005_v51  ;;  %1262 = vmatpush.msra.mxu1 %v6702_v9  ;;  %v10047_v9 = vand.u32 4294901760, %v6756_v48 }
 0x195   : > { %1370 = vmatpush.msra.mxu3 %v1369_v18  ;;  %1242 = vmatmul.f32.vlgmr.msra.gmra.mxu0 %v6767_v60  ;;  %v6319_v18 = vld [vmem:[%s9906_s5 + $0x8] sm:$0xff] }
 0x196   : > { %1385 = vmatpush.msrb.mxu0 %v6859_v45  ;;  %1264 = vmatpush.msra.mxu1 %v6870_v28  ;;  %v10048_v28 = vand.u32 4294901760, %v6942_v27 }
 0x197   : > { %1504 = vmatpush.msrb.mxu3 %v6812_v31  ;;  %1300 = vmatpush.msra.mxu2 %v7023_v37 }
 0x198   : > { %1306 = vmatmul.f32.vlgmr.msra.gmra.mxu2 %v6984_v41  ;;  %1388 = vmatpush.msrb.mxu0 %v6756_v48 }
 0x199   : > { %1506 = vmatpush.msrb.mxu3 %v6723_v20  ;;  %1458 = vmatpush.msrb.mxu2 %v10046_v56 }
 0x19a   : > { %1266 = vmatpush.msra.mxu1 %v6892_v5  ;;  %1372 = vmatmul.f32.vlgmr.msra.gmra.mxu3 %v6767_v60  ;;  %v10049_v5 = vand.u32 4294901760, %v6953_v36 }
 0x19b   : > { %1391 = vmatpush.msrb.mxu0 %v6942_v27  ;;  %1462 = vmatpush.msrb.mxu2 %v10047_v9 }
 0x19c   : > { %1508 = vmatpush.msrb.mxu3 %v6882_v11  ;;  %1268 = vmatpush.msra.mxu1 %v6880_v4  ;;  %v747_v4 = vpop.f32.mrf.mxu0 }
 0x19d   : > { %1394 = vmatpush.msrb.mxu0 %v6953_v36  ;;  %1466 = vmatpush.msrb.mxu2 %v10048_v28 }
 0x19e   : > { %1510 = vmatpush.msrb.mxu3 %v6896_v52  ;;  %1270 = vmatpush.msra.mxu1 %v6980_v39 }
 0x19f   : > { %1397 = vmatpush.msrb.mxu0 %v6994_v32  ;;  %1272 = vmatmul.f32.vlgmr.msra.gmra.mxu1 %v6767_v60 }
 0x1a0   : > { %1470 = vmatpush.msrb.mxu2 %v10049_v5  ;;  %1424 = vmatpush.msrb.mxu1 %v6812_v31  ;;  %v788_v31 = vpop.f32.mrf.mxu1 }
 0x1a1   : > { %1512 = vmatpush.msrb.mxu3 %v6950_v8  ;;  %1400 = vmatpush.msrb.mxu0 %v7008_v14 }
 0x1a2   : > { %1474 = vmatpush.msrb.mxu2 %v1343_v29  ;;  %1426 = vmatpush.msrb.mxu1 %v6723_v20  ;;  %v831_v20 = vpop.f32.mrf.mxu2 }
 0x1a3   : > { %1514 = vmatpush.msrb.mxu3 %v6974_v57  ;;  %1403 = vmatpush.msrb.mxu0 %v7021_v6 }
 0x1a4   : > { %1478 = vmatpush.msrb.mxu2 %v1349_v38  ;;  %1428 = vmatpush.msrb.mxu1 %v6882_v11  ;;  %v7146_v48 = vpop.f32.mrf.mxu0 }
 0x1a5   : > { %1516 = vmatpush.msrb.mxu3 %v6988_v61  ;;  %1406 = vmatpush.msrb.mxu0 %v7034_v59 }
 0x1a6   : > { %1482 = vmatpush.msrb.mxu2 %v1355_v46  ;;  %1430 = vmatpush.msrb.mxu1 %v6896_v52 }
 0x1a7   : > { %1518 = vmatpush.msrb.mxu3 %v7005_v51  ;;  %1409 = vmatpush.msrb.mxu0 %v7042_v40 }
 0x1a8   : > { %1486 = vmatpush.msrb.mxu2 %v1361_v15  ;;  %1432 = vmatpush.msrb.mxu1 %v6950_v8  ;;  %v7148_v36 = vpop.f32.mrf.mxu1 }
 0x1a9   : > { %1520 = vmatpush.msrb.mxu3 %v7023_v37  ;;  %1412 = vmatmul.f32.vlgmr.msrb.gmra.mxu0 %v6836_v53  ;;  %v348_v53 = vpop.permute.xlu2 %347 }
 0x1aa   : > { %1490 = vmatpush.msrb.mxu2 %v1367_v30  ;;  %1434 = vmatpush.msrb.mxu1 %v6974_v57  ;;  %v7150_v57 = vpop.f32.mrf.mxu2  ;;  %v658_v40 = vadd.f32 %v6624_v25, %v348_v53 }
 0x1ab   : > { %1492 = vmatmul.f32.vlgmr.msrb.gmra.mxu2 %v6767_v60  ;;  %1522 = vmatmul.f32.vlgmr.msrb.gmra.mxu3 %v6767_v60  ;;  %v7154_v60 = vpop.f32.mrf.mxu3 }
 0x1ac   : > { %1436 = vmatpush.msrb.mxu1 %v6988_v61  ;;  %v7152_v39 = vpop.f32.mrf.mxu0  ;;  %v709_v46 = vadd.f32 %v6620_v23, %v658_v40  ;;  %v10052_v40 = vld [vmem:[#allocation27_spill] sm:$0xff] }
 0x1ae   : > { %1438 = vmatpush.msrb.mxu1 %v7005_v51  ;;  %v748_v12 = vadd.f32 %v747_v4, %v709_v46 }
 0x1b0   : > { %1440 = vmatpush.msrb.mxu1 %v7023_v37  ;;  %v7156_v45 = vpop.f32.mrf.mxu1  ;;  %v406_v37 = vadd.f32 %v6591_v62, %v348_v53  ;;  %v789_v33 = vadd.f32 %v788_v31, %v748_v12 }
 0x1b1   : > { %1444 = vmatmul.f32.vlgmr.msrb.gmra.mxu1 %v6878_v26 }
 0x1b2   : > { %v7159_v26 = vpop.f32.mrf.mxu2  ;;  %v457_v11 = vadd.f32 %v6595_v0, %v406_v37  ;;  %v832_v23 = vadd.f32 %v831_v20, %v789_v33 }
 0x1b3   : > { %v7162_v52 = vpop.f32.mrf.mxu3 }
 0x1b4   : > { %v496_v49 = vadd.f32 %v6597_v1, %v457_v11  ;;  %v867_v17 = vadd.f32 %v866_v16, %v832_v23  ;;  %v10054_v23 = vld [vmem:[#allocation23_spill] sm:$0xff] }
 0x1b6   : > { %v537_v51 = vadd.f32 %v6593_v63, %v496_v49  ;;  %v880_v47 = vmax.f32 %v867_v17, 0.0 }
 0x1b8   : > { %v580_v62 = vadd.f32 %v6615_v22, %v537_v51 }
 0x1ba   : > { %v615_v0 = vadd.f32 %v6622_v24, %v580_v62 }
 0x1bc   : > { %v879_v55 = vmax.f32 %v615_v0, 0.0 }
 0x1fe   : > { %v1057_v27 = vpop.f32.mrf.mxu0 }
 0x1ff   : > { %v1058_v41 = vadd.f32 %v1057_v27, %v1020_v2 }
 0x207   : > { %v1163_v32 = vpop.f32.mrf.mxu2 }
 0x208   : > { %v1123_v8 = vpop.f32.mrf.mxu1 }
 0x209   : > { %v1124_v61 = vadd.f32 %v1123_v8, %v1058_v41  ;;  %v10050_v8 = vld [vmem:[#allocation22_spill] sm:$0xff] }
 0x20b   : > { %v1164_v14 = vadd.f32 %v1163_v32, %v1124_v61  ;;  %v1195_v42 = vpop.f32.mrf.mxu3 }
 0x20d   : > { %v1196_v29 = vadd.f32 %v1195_v42, %v1164_v14  ;;  %v6318_v14 = vld [vmem:[%s9905_s4 + $0x8] sm:$0xff]  ;;  %v10051_v42 = vld [vmem:[#allocation25_spill] sm:$0xff] }
 0x212   : > { %v1243_v6 = vpop.f32.mrf.mxu0 }
 0x213   : > { %v1244_v59 = vadd.f32 %v1243_v6, %v1196_v29 }
 0x21b   : > { %v1307_v22 = vpop.f32.mrf.mxu2 }
 0x21c   : > { %v1273_v38 = vpop.f32.mrf.mxu1  ;;  %v1308_v24 = vadd.f32 %v1307_v22, %v1020_v2 }
 0x21d   : > { %v1274_v3 = vadd.f32 %v1273_v38, %v1244_v59  ;;  %v1373_v10 = vpop.f32.mrf.mxu3  ;;  %v1662_v59 = vsel %vm1022_vm4, %v6318_v14, 0 }
 0x21e   : > { %v1374_v15 = vadd.f32 %v1373_v10, %v1308_v24  ;;  %v7247_v46 = vand.u32 4294901760, %v1662_v59  ;;  %v10053_v10 = vld [vmem:[#allocation26_spill] sm:$0xff] }
 0x21f   : > { %v7169_v1 = vmax.f32 %v1274_v3, 0.0 }
 0x221   : > { %v1530_v63 = vadd.f32 %v7169_v1, %v879_v55 }
 0x223   : > { %1598 = vrot.lane.b32.xlu2 %v1530_v63, %s6412_s18  ;;  %1610 = vrot.lane.b32.xlu0 %v1530_v63, %s6413_s19  ;;  %v1582_v49 = vmul.f32 %v1530_v63, %v10050_v8  ;;  %v10059_v8 = vld [vmem:[#allocation33_spill] sm:$0xff] }
 0x224   : > { %1622 = vrot.lane.b32.xlu1 %v1530_v63, %s6414_s20 }
 0x225   : > { %v7230_v32 = vand.u32 4294901760, %v1582_v49 }
 0x226   : > { %v1413_v25 = vpop.f32.mrf.mxu0 }
 0x227   : > { %v1414_v34 = vadd.f32 %v1413_v25, %v1374_v15  ;;  %v7239_v29 = vsub.f32 %v1582_v49, %v7230_v32 }
 0x229   : > { %v9928_v24 = vand.u32 4294901760, %v7239_v29 }
 0x22b   : > { %1556 = vrot.lane.b32.xlu2 %v1530_v63, %s6415_s21  ;;  %1568 = vrot.lane.b32.xlu0 %v1530_v63, %s6417_s23 }
 0x22c   : > { %1586 = vrot.lane.b32.xlu1 %v1530_v63, %s6416_s22 }
 0x22e   : > { %v1445_v43 = vpop.f32.mrf.mxu1  ;;  %v1493_v7 = vpop.f32.mrf.mxu2 }
 0x22f   : > { %v1446_v30 = vadd.f32 %v1445_v43, %v1414_v34  ;;  %v1523_v13 = vpop.f32.mrf.mxu3 }
 0x231   : > { %v1494_v50 = vadd.f32 %v1493_v7, %v1446_v30 }
 0x233   : > { %v1524_v35 = vadd.f32 %v1523_v13, %v1494_v50  ;;  %v7276_v50 = vsub.f32 %v1662_v59, %v7247_v46 }
 0x234   : > { %1544 = vrot.lane.b32.xlu1 %v1530_v63, %s9940_s24 }
 0x235   : > { %v7180_v58 = vmax.f32 %v1524_v35, 0.0  ;;  %v10055_v35 = vld [vmem:[#allocation24_spill] sm:$0xff] }
 0x237   : > { %v7183_v19 = vadd.f32 %v7180_v58, %v880_v47 }
 0x239   : > { %1624 = vrot.lane.b32.xlu2 %v7183_v19, %s6414_s20  ;;  %1600 = vrot.lane.b32.xlu0 %v7183_v19, %s6412_s18 }
 0x23c   : > { %1612 = vrot.lane.b32.xlu1 %v7183_v19, %s6413_s19 }
 0x241   : > { %1588 = vrot.lane.b32.xlu2 %v7183_v19, %s6416_s22  ;;  %1558 = vrot.lane.b32.xlu0 %v7183_v19, %s6415_s21 }
 0x244   : > { %1570 = vrot.lane.b32.xlu1 %v7183_v19, %s6417_s23 }
 0x249   : > { %1546 = vrot.lane.b32.xlu2 %v7183_v19, %s9940_s24  ;;  %1532 = vrot.lane.b32.xlu0 %v1530_v63, %s6419_s25 }
 0x24c   : > { %1534 = vrot.lane.b32.xlu1 %v7183_v19, %s6419_s25 }
 0x251   : > { %352 = vperm.xlu2 %6381, %v338_v44   ;;  %1658 = vperm.xlu0 %6380, %v6319_v18  }
 0x27d   : > { %v1599_v56 = vpop.permute.xlu2 %1598 }
 0x285   : > { %v7208_v9 = vpop.permute.xlu2 %1556 }
 0x293   : > { %v1625_v28 = vpop.permute.xlu2 %1624 }
 0x295   : > { %v1611_v20 = vpop.permute.xlu0 %1610 }
 0x296   : > { %v1623_v5 = vpop.permute.xlu1 %1622 }
 0x297   : > { %v1626_v4 = vsel %vm988_vm3, %v1623_v5, %v1625_v28  ;;  %v1627_v38 = vsel %vm988_vm3, %v1625_v28, %v1623_v5  ;;  %v7285_v28 = vsub.f32 %v7239_v29, %v9928_v24 }
 0x298   : > { %v1630_v31 = vmul.f32 %v1626_v4, %v6728_v21  ;;  %v1631_v33 = vmul.f32 %v1627_v38, %v10053_v10  ;;  %v10056_v4 = vld [vmem:[#allocation29_spill] sm:$0xff] }
 0x299   : > { %v1733_v10 = vand.u32 4294901760, %v7285_v28 }
 0x29a   : > { %v7213_v16 = vand.u32 4294901760, %v1630_v31  ;;  %v7287_v5 = vand.u32 4294901760, %v1631_v33 }
 0x29b   : > { %v1589_v41 = vpop.permute.xlu2 %1588 }
 0x29c   : > { %v7216_v53 = vsub.f32 %v1630_v31, %v7213_v16  ;;  %1672 = vmatpush.msra.mxu0 %v7213_v16  ;;  %1812 = vmatpush.msra.mxu3 %v7213_v16  ;;  %v10057_v31 = vld [vmem:[#allocation30_spill] sm:$0xff] }
 0x29d   : > { %v7225_v2 = vpop.permute.xlu0 %1568 }
 0x29e   : > { %v9932_v37 = vand.u32 4294901760, %v7216_v53  ;;  %1773 = vmatpush.msra.mxu2 %v7216_v53  ;;  %v1587_v11 = vpop.permute.xlu1 %1586 }
 0x29f   : > { %v1590_v51 = vsel %vm949_vm2, %v1587_v11, %v1589_v41  ;;  %v1591_v43 = vsel %vm949_vm2, %v1589_v41, %v1587_v11 }
 0x2a0   : > { %v1708_v27 = vsub.f32 %v7216_v53, %v9932_v37  ;;  %v1594_v62 = vmul.f32 %v1590_v51, %v10051_v42  ;;  %v7304_v42 = vand.u32 4294901760, %v7276_v50 }
 0x2a2   : > { %v1709_v21 = vand.u32 4294901760, %v1708_v27  ;;  %v7249_v63 = vand.u32 4294901760, %v1594_v62  ;;  %v10058_v27 = vld [vmem:[#allocation31_spill] sm:$0xff] }
 0x2a3   : > { %v7257_v25 = vpop.permute.xlu2 %1546 }
 0x2a4   : > { %1710 = vmatpush.msra.mxu1 %v1709_v21  ;;  %v7280_v18 = vsub.f32 %v1594_v62, %v7249_v63  ;;  %v10060_v62 = vld [vmem:[#allocation28_spill] sm:$0xff] }
 0x2a6   : > { %v7228_v61 = vpop.permute.xlu1 %1544 }
 0x2a7   : > { %v1549_v7 = vsel %vm904_vm6, %v7257_v25, %v7228_v61 }
 0x2ab   : > { %v1601_v6 = vpop.permute.xlu0 %1600 }
 0x2ac   : > { %v1602_v0 = vsel %vm962_vm5, %v1599_v56, %v1601_v6  ;;  %v1603_v13 = vsel %vm962_vm5, %v1601_v6, %v1599_v56  ;;  %v1595_v56 = vmul.f32 %v1591_v43, %v10056_v4  ;;  %v7308_v6 = vmul.f32 %v7183_v19, %v10060_v62 }
 0x2ad   : > { %v1606_v3 = vmul.f32 %v1602_v0, %v10052_v40  ;;  %v1607_v21 = vmul.f32 %v1603_v13, %v10058_v27  ;;  %v9929_v40 = vand.u32 4294901760, %v7280_v18 }
 0x2ae   : > { %v1613_v55 = vpop.permute.xlu1 %1612 }
 0x2af   : > { %v7251_v22 = vand.u32 4294901760, %v1606_v3  ;;  %v1614_v12 = vsel %vm975_vm1, %v1611_v20, %v1613_v55  ;;  %v1615_v15 = vsel %vm975_vm1, %v1613_v55, %v1611_v20  ;;  %v1552_v20 = vmul.f32 %v1549_v7, %v10057_v31  ;;  %v10061_v55 = vld [vmem:[#allocation32_spill] sm:$0xff] }
 0x2b0   : > { %v1618_v34 = vmul.f32 %v1614_v12, %v10054_v23  ;;  %v1619_v47 = vmul.f32 %v1615_v15, %v10055_v35  ;;  %v7327_v15 = vsub.f32 %v1631_v33, %v7287_v5  ;;  %v7329_v23 = vand.u32 4294901760, %v1595_v56 }
 0x2b1   : > { %v7269_v30 = vsub.f32 %v1606_v3, %v7251_v22  ;;  %v7320_v3 = vand.u32 4294901760, %v1552_v20  ;;  %v1692_v31 = vsub.f32 %v7276_v50, %v7304_v42 }
 0x2b2   : > { %v7273_v17 = vand.u32 4294901760, %v1618_v34  ;;  %v7310_v59 = vand.u32 4294901760, %v1619_v47  ;;  %v7375_v62 = vsub.f32 %v1595_v56, %v7329_v23 }
 0x2b3   : > { %v1559_v44 = vpop.permute.xlu0 %1558  ;;  %v9930_v51 = vand.u32 4294901760, %v7269_v30 }
 0x2b4   : > { %v1561_v11 = vsel %vm917_vm8, %v1559_v44, %v7208_v9  ;;  %1674 = vmatpush.msra.mxu0 %v7273_v17  ;;  %1814 = vmatpush.msra.mxu3 %v7273_v17  ;;  %v7299_v41 = vsub.f32 %v1618_v34, %v7273_v17  ;;  %v7331_v34 = vand.u32 4294901760, %v1607_v21  ;;  %v7351_v4 = vsub.f32 %v1619_v47, %v7310_v59 }
 0x2b5   : > { %v1564_v49 = vmul.f32 %v1561_v11, %v10059_v8  ;;  %v1720_v43 = vsub.f32 %v7269_v30, %v9930_v51  ;;  %v7361_v11 = vand.u32 4294901760, %v7308_v6  ;;  %v1560_v27 = vsel %vm917_vm8, %v7208_v9, %v1559_v44  ;;  %v10062_v9 = vld [vmem:[#allocation34_spill] sm:$0xff]  ;;  %v10065_v51 = vld [vmem:[#allocation37_spill] sm:$0xff] }
 0x2b6   : > { %1676 = vmatpush.msra.mxu0 %v7251_v22  ;;  %v1571_v14 = vpop.permute.xlu1 %1570  ;;  %1776 = vmatpush.msra.mxu2 %v7299_v41  ;;  %v9931_v19 = vand.u32 4294901760, %v7299_v41 }
 0x2b7   : > { %v7312_v0 = vand.u32 4294901760, %v1564_v49  ;;  %1816 = vmatpush.msra.mxu3 %v7251_v22  ;;  %v1573_v38 = vsel %vm930_vm7, %v1571_v14, %v7225_v2  ;;  %v1572_v7 = vsel %vm930_vm7, %v7225_v2, %v1571_v14  ;;  %v1726_v2 = vsub.f32 %v7280_v18, %v9929_v40 }
 0x2b8   : > { %v1576_v12 = vmul.f32 %v1573_v38, %v10061_v55  ;;  %1678 = vmatpush.msra.mxu0 %v7249_v63  ;;  %1779 = vmatpush.msra.mxu2 %v7269_v30  ;;  %v1714_v33 = vsub.f32 %v7299_v41, %v9931_v19  ;;  %v9934_v14 = vand.u32 4294901760, %v7327_v15  ;;  %v1548_v38 = vsel %vm904_vm6, %v7228_v61, %v7257_v25  ;;  %v10063_v61 = vld [vmem:[#allocation35_spill] sm:$0xff] }
 0x2b9   : > { %1818 = vmatpush.msra.mxu3 %v7249_v63  ;;  %v7348_v35 = vsub.f32 %v1564_v49, %v7312_v0  ;;  %v7371_v49 = vsub.f32 %v1552_v20, %v7320_v3  ;;  %v1577_v44 = vmul.f32 %v1572_v7, %v10062_v9  ;;  %v7385_v55 = vsub.f32 %v1607_v21, %v7331_v34  ;;  %v10064_v9 = vld [vmem:[#allocation36_spill] sm:$0xff] }
 0x2ba   : > { %v7341_v13 = vand.u32 4294901760, %v1576_v12  ;;  %1680 = vmatpush.msra.mxu0 %v7230_v32  ;;  %1782 = vmatpush.msra.mxu2 %v7280_v18  ;;  %v1715_v47 = vand.u32 4294901760, %v1714_v33  ;;  %v1565_v25 = vmul.f32 %v1560_v27, %v10063_v61  ;;  %v1727_v21 = vand.u32 4294901760, %v1726_v2 }
 0x2bb   : > { %1820 = vmatpush.msra.mxu3 %v7230_v32  ;;  %v1533_v20 = vpop.permute.xlu0 %1532  ;;  %v9937_v24 = vand.u32 4294901760, %v7348_v35  ;;  %v9936_v61 = vand.u32 4294901760, %v7371_v49  ;;  %v1553_v19 = vmul.f32 %v1548_v38, %v10065_v51  ;;  %v7405_v37 = vand.u32 4294901760, %v1577_v44 }
 0x2bc   : > { %1682 = vmatpush.msra.mxu0 %v7341_v13  ;;  %v7368_v8 = vsub.f32 %v1576_v12, %v7341_v13  ;;  %1785 = vmatpush.msra.mxu2 %v7239_v29  ;;  %v1721_v12 = vand.u32 4294901760, %v1720_v43  ;;  %v7409_v2 = vand.u32 4294901760, %v1692_v31  ;;  %v9938_v38 = vand.u32 4294901760, %v7385_v55 }
 0x2bd   : > { %1822 = vmatpush.msra.mxu3 %v7341_v13  ;;  %1716 = vmatpush.msra.mxu1 %v1715_v47  ;;  %v9935_v47 = vand.u32 4294901760, %v7351_v4  ;;  %v1744_v51 = vsub.f32 %v7348_v35, %v9937_v24 }
 0x2be   : > { %v1535_v33 = vpop.permute.xlu1 %1534  ;;  %1684 = vmatpush.msra.mxu0 %v7312_v0  ;;  %v9933_v56 = vand.u32 4294901760, %v7368_v8  ;;  %1788 = vmatpush.msra.mxu2 %v7368_v8 }
 0x2bf   : > { %v1537_v7 = vsel %vm891_vm9, %v1535_v33, %v1533_v20  ;;  %1824 = vmatpush.msra.mxu3 %v7312_v0  ;;  %1722 = vmatpush.msra.mxu1 %v1721_v12  ;;  %v1536_v43 = vsel %vm891_vm9, %v1533_v20, %v1535_v33  ;;  %v1958_v20 = vsub.f32 %v7327_v15, %v9934_v14  ;;  %v7441_v14 = vand.u32 4294901760, %v1553_v19 }
 0x2c0   : > { %v1540_v40 = vmul.f32 %v1537_v7, %v10064_v9  ;;  %1686 = vmatpush.msra.mxu0 %v7320_v3  ;;  %v1738_v27 = vsub.f32 %v7368_v8, %v9933_v56  ;;  %1791 = vmatpush.msra.mxu2 %v7348_v35  ;;  %v7420_v7 = vand.u32 4294901760, %v1565_v25  ;;  %v10066_v9 = vld [vmem:[#allocation38_spill] sm:$0xff]  ;;  %v1964_v31 = vsub.f32 %v7351_v4, %v9935_v47 }
 0x2c1   : > { %1826 = vmatpush.msra.mxu3 %v7320_v3  ;;  %1728 = vmatpush.msra.mxu1 %v1727_v21  ;;  %v1541_v56 = vmul.f32 %v1536_v43, %v10066_v9  ;;  %v7429_v21 = vsub.f32 %v7308_v6, %v7361_v11  ;;  %v1750_v43 = vsub.f32 %v7371_v49, %v9936_v61  ;;  %v1975_v9 = vand.u32 4294901760, %v7375_v62 }
 0x2c2   : > { %v7414_v12 = vand.u32 4294901760, %v1540_v40  ;;  %v1739_v33 = vand.u32 4294901760, %v1738_v27  ;;  %1794 = vmatpush.msra.mxu2 %v7371_v49  ;;  %v7444_v47 = vsub.f32 %v1577_v44, %v7405_v37  ;;  %v1959_v28 = vand.u32 4294901760, %v1958_v20 }
 0x2c3   : > { %1734 = vmatpush.msra.mxu1 %v1733_v10  ;;  %v10067_v6 = vand.u32 4294901760, %v7216_v53  ;;  %v1970_v10 = vsub.f32 %v7385_v55, %v9938_v38  ;;  %v7455_v24 = vsub.f32 %v1565_v25, %v7420_v7  ;;  %v7457_v44 = vand.u32 4294901760, %v1541_v56 }
 0x2c4   : > { %1688 = vmatpush.msra.mxu0 %v7414_v12  ;;  %v7435_v27 = vsub.f32 %v1540_v40, %v7414_v12  ;;  %1828 = vmatpush.msra.mxu3 %v7414_v12  ;;  %v1745_v40 = vand.u32 4294901760, %v1744_v51  ;;  %v1965_v20 = vand.u32 4294901760, %v1964_v31  ;;  %v10068_v53 = vand.u32 4294901760, %v7299_v41 }
 0x2c5   : > { %1694 = vmatmul.f32.vlgmr.msra.gmra.mxu0 %v7409_v2  ;;  %1740 = vmatpush.msra.mxu1 %v1739_v33  ;;  %v1981_v33 = vand.u32 4294901760, %v7429_v21  ;;  %v1751_v51 = vand.u32 4294901760, %v1750_v43  ;;  %v7468_v38 = vsub.f32 %v1553_v19, %v7441_v14  ;;  %v1987_v31 = vand.u32 4294901760, %v7444_v47 }
 0x2c6   : > { %1846 = vmatpush.msrb.mxu0 %v10067_v6  ;;  %v1755_v61 = vand.u32 4294901760, %v7435_v27  ;;  %1960 = vmatpush.msrb.mxu3 %v1959_v28  ;;  %v1976_v6 = vsub.f32 %v7375_v62, %v1975_v9  ;;  %v1971_v41 = vand.u32 4294901760, %v1970_v10  ;;  %v7474_v43 = vsub.f32 %v1541_v56, %v7457_v44 }
 0x2c7   : > { %1797 = vmatpush.msra.mxu2 %v7435_v27  ;;  %1746 = vmatpush.msra.mxu1 %v1745_v40  ;;  %v10069_v40 = vand.u32 4294901760, %v7269_v30  ;;  %v1982_v19 = vsub.f32 %v7429_v21, %v1981_v33  ;;  %v10070_v10 = vand.u32 4294901760, %v7280_v18  ;;  %v1988_v30 = vsub.f32 %v7444_v47, %v1987_v31 }
 0x2c8   : > { %1850 = vmatpush.msrb.mxu0 %v10068_v53  ;;  %v1756_v25 = vsub.f32 %v7435_v27, %v1755_v61  ;;  %1966 = vmatpush.msrb.mxu3 %v1965_v20  ;;  %v1993_v27 = vand.u32 4294901760, %v7455_v24  ;;  %v1977_v20 = vand.u32 4294901760, %v1976_v6  ;;  %v1999_v56 = vand.u32 4294901760, %v7468_v38 }
 0x2c9   : > { %1922 = vmatpush.msrb.mxu2 %v7287_v5  ;;  %1752 = vmatpush.msra.mxu1 %v1751_v51  ;;  %v10071_v53 = vand.u32 4294901760, %v7239_v29  ;;  %v1983_v51 = vand.u32 4294901760, %v1982_v19  ;;  %v2005_v6 = vand.u32 4294901760, %v7474_v43 }
 0x2ca   : > { %1800 = vmatmul.f32.vlgmr.msra.gmra.mxu2 %v7276_v50  ;;  %v1757_v28 = vand.u32 4294901760, %v1756_v25  ;;  %1854 = vmatpush.msrb.mxu0 %v10069_v40  ;;  %v1994_v18 = vsub.f32 %v7455_v24, %v1993_v27  ;;  %v10072_v25 = vand.u32 4294901760, %v7368_v8  ;;  %v2000_v29 = vsub.f32 %v7468_v38, %v1999_v56 }
 0x2cb   : > { %1924 = vmatpush.msrb.mxu2 %v7310_v59  ;;  %1972 = vmatpush.msrb.mxu3 %v1971_v41  ;;  %v1989_v41 = vand.u32 4294901760, %v1988_v30  ;;  %v2006_v40 = vsub.f32 %v7474_v43, %v2005_v6  ;;  %v10074_v8 = vand.u32 4294901760, %v7371_v49 }
 0x2cc   : > { %1758 = vmatpush.msra.mxu1 %v1757_v28  ;;  %1832 = vmatmul.f32.vlgmr.msra.gmra.mxu3 %v7304_v42  ;;  %v10073_v28 = vand.u32 4294901760, %v7348_v35 }
 0x2cd   : > { %1858 = vmatpush.msrb.mxu0 %v10070_v10  ;;  %1926 = vmatpush.msrb.mxu2 %v7331_v34  ;;  %v2007_v35 = vand.u32 4294901760, %v2006_v40 }
 0x2ce   : > { %1978 = vmatpush.msrb.mxu3 %v1977_v20  ;;  %1760 = vmatmul.f32.vlgmr.msra.gmra.mxu1 %v7247_v46 }
 0x2cf   : > { %1862 = vmatpush.msrb.mxu0 %v10071_v53  ;;  %1892 = vmatpush.msrb.mxu1 %v7213_v16  ;;  %v1995_v16 = vand.u32 4294901760, %v1994_v18 }
 0x2d0   : > { %1928 = vmatpush.msrb.mxu2 %v7329_v23  ;;  %1984 = vmatpush.msrb.mxu3 %v1983_v51 }
 0x2d1   : > { %1866 = vmatpush.msrb.mxu0 %v10072_v25  ;;  %1894 = vmatpush.msrb.mxu1 %v7273_v17  ;;  %v2001_v17 = vand.u32 4294901760, %v2000_v29 }
 0x2d2   : > { %1930 = vmatpush.msrb.mxu2 %v7361_v11  ;;  %1990 = vmatpush.msrb.mxu3 %v1989_v41 }
 0x2d3   : > { %1870 = vmatpush.msrb.mxu0 %v10073_v28  ;;  %1896 = vmatpush.msrb.mxu1 %v7251_v22  ;;  %v10077_v22 = vand.u32 4294901760, %v7385_v55 }
 0x2d4   : > { %1932 = vmatpush.msrb.mxu2 %v7405_v37  ;;  %1996 = vmatpush.msrb.mxu3 %v1995_v16 }
 0x2d5   : > { %1874 = vmatpush.msrb.mxu0 %v10074_v8  ;;  %1898 = vmatpush.msrb.mxu1 %v7249_v63  ;;  %v10075_v63 = vand.u32 4294901760, %v7327_v15 }
 0x2d6   : > { %1934 = vmatpush.msrb.mxu2 %v7420_v7  ;;  %2002 = vmatpush.msrb.mxu3 %v2001_v17 }
 0x2d7   : > { %1878 = vmatpush.msrb.mxu0 %v1755_v61  ;;  %1900 = vmatpush.msrb.mxu1 %v7230_v32  ;;  %v10076_v32 = vand.u32 4294901760, %v7351_v4 }
 0x2d8   : > { %1936 = vmatpush.msrb.mxu2 %v7441_v14  ;;  %2008 = vmatpush.msrb.mxu3 %v2007_v35 }
 0x2d9   : > { %1880 = vmatmul.f32.vlgmr.msrb.gmra.mxu0 %v7247_v46  ;;  %1902 = vmatpush.msrb.mxu1 %v7341_v13 }
 0x2da   : > { %2023 = vmatpush.msra.mxu0 %v7327_v15  ;;  %2142 = vmatpush.msra.mxu3 %v7287_v5 }
 0x2db   : > { %1938 = vmatpush.msrb.mxu2 %v7457_v44  ;;  %1904 = vmatpush.msrb.mxu1 %v7312_v0 }
 0x2dc   : > { %1944 = vmatmul.f32.vlgmr.msrb.gmra.mxu2 %v7409_v2  ;;  %2026 = vmatpush.msra.mxu0 %v7351_v4 }
 0x2dd   : > { %2096 = vmatpush.msra.mxu2 %v10075_v63  ;;  %2144 = vmatpush.msra.mxu3 %v7310_v59  ;;  %v2818_v63 = vld [vmem:[%s9908_s7] sm:$0xff] }
 0x2de   : > { %2010 = vmatmul.f32.vlgmr.msrb.gmra.mxu3 %v7247_v46  ;;  %2029 = vmatpush.msra.mxu0 %v7385_v55  ;;  %v10082_v55 = vld [vmem:[#allocation14_spill] sm:$0xff] }
 0x2df   : > { %2100 = vmatpush.msra.mxu2 %v10076_v32  ;;  %2146 = vmatpush.msra.mxu3 %v7331_v34  ;;  %v6326_v32 = vld [vmem:[%s9904_s3 + $0x20] sm:$0xff] }
 0x2e0   : > { %1906 = vmatpush.msrb.mxu1 %v7320_v3  ;;  %2032 = vmatpush.msra.mxu0 %v7375_v62  ;;  %v1659_v3 = vpop.permute.xlu0 %1658 }
 0x2e1   : > { %2104 = vmatpush.msra.mxu2 %v10077_v22  ;;  %2148 = vmatpush.msra.mxu3 %v7329_v23 }
 0x2e2   : > { %1908 = vmatpush.msrb.mxu1 %v7414_v12  ;;  %2035 = vmatpush.msra.mxu0 %v7429_v21  ;;  %v10083_v12 = vld [vmem:[#allocation16_spill] sm:$0xff]  ;;  %v10084_v21 = vld [vmem:[#allocation17_spill] sm:$0xff] }
 0x2e3   : > { %1910 = vmatmul.f32.vlgmr.msrb.gmra.mxu1 %v7247_v46  ;;  %2108 = vmatpush.msra.mxu2 %v1975_v9 }
 0x2e4   : > { %2062 = vmatpush.msra.mxu1 %v7287_v5  ;;  %2150 = vmatpush.msra.mxu3 %v7361_v11  ;;  %v10078_v5 = vld [vmem:[#allocation6_spill] sm:$0xff] }
 0x2e5   : > { %2038 = vmatpush.msra.mxu0 %v7444_v47  ;;  %2112 = vmatpush.msra.mxu2 %v1981_v33 }
 0x2e6   : > { %2064 = vmatpush.msra.mxu1 %v7310_v59  ;;  %2152 = vmatpush.msra.mxu3 %v7405_v37  ;;  %v10079_v59 = vld [vmem:[#allocation8_spill] sm:$0xff] }
 0x2e7   : > { %2041 = vmatpush.msra.mxu0 %v7455_v24  ;;  %2116 = vmatpush.msra.mxu2 %v1987_v31  ;;  %v353_v24 = vpop.permute.xlu2 %352 }
 0x2e8   : > { %2066 = vmatpush.msra.mxu1 %v7331_v34  ;;  %2154 = vmatpush.msra.mxu3 %v7420_v7  ;;  %v666_v9 = vadd.f32 %v10084_v21, %v353_v24 }
 0x2e9   : > { %2044 = vmatpush.msra.mxu0 %v7468_v38  ;;  %2120 = vmatpush.msra.mxu2 %v1993_v27 }
 0x2ea   : > { %2068 = vmatpush.msra.mxu1 %v7329_v23  ;;  %2156 = vmatpush.msra.mxu3 %v7441_v14  ;;  %v10080_v23 = vld [vmem:[#allocation9_spill] sm:$0xff] }
 0x2eb   : > { %2047 = vmatpush.msra.mxu0 %v7474_v43  ;;  %2124 = vmatpush.msra.mxu2 %v1999_v56  ;;  %v10085_v43 = vld [vmem:[#allocation15_spill] sm:$0xff] }
 0x2ec   : > { %2070 = vmatpush.msra.mxu1 %v7361_v11  ;;  %2158 = vmatpush.msra.mxu3 %v7457_v44  ;;  %v10081_v11 = vld [vmem:[#allocation7_spill] sm:$0xff]  ;;  %v713_v19 = vadd.f32 %v10085_v43, %v666_v9 }
 0x2ed   : > { %2050 = vmatmul.f32.vlgmr.msra.gmra.mxu0 %v7276_v50  ;;  %2128 = vmatpush.msra.mxu2 %v2005_v6  ;;  %v414_v50 = vadd.f32 %v10078_v5, %v353_v24  ;;  %v2266_v5 = vld [vmem:[%s9902_s1 + $0x80] sm:$0xff] }
 0x2ee   : > { %2072 = vmatpush.msra.mxu1 %v7405_v37  ;;  %2130 = vmatmul.f32.vlgmr.msra.gmra.mxu2 %v7247_v46  ;;  %v753_v10 = vadd.f32 %v7146_v48, %v713_v19 }
 0x2ef   : > { %2160 = vmatmul.f32.vlgmr.msra.gmra.mxu3 %v7247_v46  ;;  %v461_v37 = vadd.f32 %v10079_v59, %v414_v50 }
 0x2f0   : > { %2074 = vmatpush.msra.mxu1 %v7420_v7  ;;  %v795_v53 = vadd.f32 %v7148_v36, %v753_v10 }
 0x2f1   : > { %v501_v34 = vadd.f32 %v10080_v23, %v461_v37 }
 0x2f2   : > { %2076 = vmatpush.msra.mxu1 %v7441_v14  ;;  %v836_v6 = vadd.f32 %v7150_v57, %v795_v53  ;;  %v339_v57 = vld [vmem:[%s9904_s3 + $0x18] sm:$0xff] }
 0x2f3   : > { %v543_v49 = vadd.f32 %v10081_v11, %v501_v34 }
 0x2f4   : > { %2078 = vmatpush.msra.mxu1 %v7457_v44  ;;  %v871_v36 = vadd.f32 %v7154_v60, %v836_v6  ;;  %v6321_v60 = vld [vmem:[%s9906_s5 + $0x10] sm:$0xff] }
 0x2f5   : > { %2082 = vmatmul.f32.vlgmr.msra.gmra.mxu1 %v7304_v42  ;;  %v584_v47 = vadd.f32 %v10082_v55, %v543_v49 }
 0x2f6   : > { %v882_v8 = vmax.f32 %v871_v36, 0.0 }
 0x2f7   : > { %v619_v38 = vadd.f32 %v10083_v12, %v584_v47  ;;  %v2242_v12 = vld [vmem:[%s9902_s1 + $0x60] sm:$0xff] }
 0x2f9   : > { %v881_v33 = vmax.f32 %v619_v38, 0.0 }
 0x342   : > { %v1695_v0 = vpop.f32.mrf.mxu0 }
 0x343   : > { %v1696_v13 = vadd.f32 %v1695_v0, %v1659_v3 }
 0x34b   : > { %v1761_v15 = vpop.f32.mrf.mxu1 }
 0x34c   : > { %v1762_v46 = vadd.f32 %v1761_v15, %v1696_v13 }
 0x34d   : > { %v1801_v4 = vpop.f32.mrf.mxu2 }
 0x34e   : > { %v1802_v14 = vadd.f32 %v1801_v4, %v1762_v46  ;;  %v2218_v4 = vld [vmem:[%s9902_s1 + $0x40] sm:$0xff] }
 0x34f   : > { %v1833_v62 = vpop.f32.mrf.mxu3 }
 0x350   : > { %v1834_v61 = vadd.f32 %v1833_v62, %v1802_v14 }
 0x356   : > { %v1881_v42 = vpop.f32.mrf.mxu0 }
 0x357   : > { %v1882_v2 = vadd.f32 %v1881_v42, %v1834_v61  ;;  %v2230_v42 = vld [vmem:[%s9902_s1 + $0x50] sm:$0xff] }
 0x35f   : > { %v1945_v20 = vpop.f32.mrf.mxu2 }
 0x360   : > { %v1911_v7 = vpop.f32.mrf.mxu1  ;;  %v1946_v30 = vadd.f32 %v1945_v20, %v1659_v3 }
 0x361   : > { %v1912_v44 = vadd.f32 %v1911_v7, %v1882_v2  ;;  %v2011_v56 = vpop.f32.mrf.mxu3  ;;  %v6320_v2 = vld [vmem:[%s9905_s4 + $0x10] sm:$0xff] }
 0x362   : > { %v2012_v18 = vadd.f32 %v2011_v56, %v1946_v30  ;;  %v2300_v9 = vsel %vm1022_vm4, %v6320_v2, 0 }
 0x363   : > { %v7585_v31 = vmax.f32 %v1912_v44, 0.0  ;;  %v7698_v10 = vand.u32 4294901760, %v2300_v9 }
 0x365   : > { %v7589_v27 = vadd.f32 %v7585_v31, %v881_v33  ;;  %v2267_v33 = vld [vmem:[%s9902_s1 + $0x88] sm:$0xff] }
 0x367   : > { %2236 = vrot.lane.b32.xlu2 %v7589_v27, %s6412_s18  ;;  %2248 = vrot.lane.b32.xlu0 %v7589_v27, %s6413_s19  ;;  %v2220_v14 = vmul.f32 %v2218_v4, %v7589_v27 }
 0x368   : > { %2260 = vrot.lane.b32.xlu1 %v7589_v27, %s6414_s20 }
 0x369   : > { %v7671_v47 = vand.u32 4294901760, %v2220_v14 }
 0x36a   : > { %v2051_v51 = vpop.f32.mrf.mxu0 }
 0x36b   : > { %v2052_v25 = vadd.f32 %v2051_v51, %v2012_v18  ;;  %v7685_v21 = vsub.f32 %v2220_v14, %v7671_v47 }
 0x36d   : > { %v9942_v51 = vand.u32 4294901760, %v7685_v21 }
 0x36f   : > { %2194 = vrot.lane.b32.xlu2 %v7589_v27, %s6415_s21  ;;  %2206 = vrot.lane.b32.xlu0 %v7589_v27, %s6417_s23 }
 0x370   : > { %2224 = vrot.lane.b32.xlu1 %v7589_v27, %s6416_s22 }
 0x371   : > { %v2131_v48 = vpop.f32.mrf.mxu2 }
 0x372   : > { %v2083_v41 = vpop.f32.mrf.mxu1  ;;  %v2161_v28 = vpop.f32.mrf.mxu3 }
 0x373   : > { %v2084_v29 = vadd.f32 %v2083_v41, %v2052_v25  ;;  %v2255_v25 = vld [vmem:[%s9902_s1 + $0x78] sm:$0xff] }
 0x375   : > { %v2132_v16 = vadd.f32 %v2131_v48, %v2084_v29  ;;  %v2231_v29 = vld [vmem:[%s9902_s1 + $0x58] sm:$0xff] }
 0x377   : > { %v2162_v40 = vadd.f32 %v2161_v28, %v2132_v16  ;;  %v2188_v16 = vld [vmem:[%s9902_s1 + $0x10] sm:$0xff] }
 0x378   : > { %2182 = vrot.lane.b32.xlu1 %v7589_v27, %s9940_s24 }
 0x379   : > { %v7609_v17 = vmax.f32 %v2162_v40, 0.0 }
 0x37b   : > { %v7612_v35 = vadd.f32 %v7609_v17, %v882_v8  ;;  %v2243_v8 = vld [vmem:[%s9902_s1 + $0x68] sm:$0xff] }
 0x37d   : > { %2262 = vrot.lane.b32.xlu2 %v7612_v35, %s6414_s20  ;;  %2238 = vrot.lane.b32.xlu0 %v7612_v35, %s6412_s18 }
 0x380   : > { %2250 = vrot.lane.b32.xlu1 %v7612_v35, %s6413_s19 }
 0x385   : > { %2226 = vrot.lane.b32.xlu2 %v7612_v35, %s6416_s22  ;;  %2196 = vrot.lane.b32.xlu0 %v7612_v35, %s6415_s21 }
 0x388   : > { %2208 = vrot.lane.b32.xlu1 %v7612_v35, %s6417_s23 }
 0x38d   : > { %2184 = vrot.lane.b32.xlu2 %v7612_v35, %s9940_s24  ;;  %2170 = vrot.lane.b32.xlu0 %v7589_v27, %s6419_s25  ;;  %v2254_v27 = vld [vmem:[%s9902_s1 + $0x70] sm:$0xff] }
 0x390   : > { %2172 = vrot.lane.b32.xlu1 %v7612_v35, %s6419_s25 }
 0x395   : > { %357 = vperm.xlu2 %6381, %v339_v57   ;;  %2296 = vperm.xlu0 %6380, %v6321_v60  }
 0x39d   : > { %2822 = vperm.xlu2 %6381, %v2818_v63   ;;  %3289 = vperm.xlu0 %6380, %v6326_v32   ;;  %v2200_v63 = vld [vmem:[%s9902_s1 + $0x20] sm:$0xff]  ;;  %v7740_v32 = vsub.f32 %v2300_v9, %v7698_v10 }
 0x39f   : > { %v7769_v2 = vand.u32 4294901760, %v7740_v32 }
 0x3c1   : > { %v2237_v22 = vpop.permute.xlu2 %2236 }
 0x3c9   : > { %v7644_v24 = vpop.permute.xlu2 %2194 }
 0x3d7   : > { %v2263_v50 = vpop.permute.xlu2 %2262 }
 0x3d9   : > { %v2249_v3 = vpop.permute.xlu0 %2248 }
 0x3da   : > { %v2261_v59 = vpop.permute.xlu1 %2260 }
 0x3db   : > { %v2264_v37 = vsel %vm988_vm3, %v2261_v59, %v2263_v50  ;;  %v2265_v43 = vsel %vm988_vm3, %v2263_v50, %v2261_v59 }
 0x3dc   : > { %v2268_v0 = vmul.f32 %v2266_v5, %v2264_v37  ;;  %v2269_v18 = vmul.f32 %v2267_v33, %v2265_v43  ;;  %v7748_v37 = vsub.f32 %v7685_v21, %v9942_v51 }
 0x3de   : > { %v7651_v15 = vand.u32 4294901760, %v2268_v0 }
 0x3df   : > { %v2227_v62 = vpop.permute.xlu2 %2226 }
 0x3e0   : > { %v7654_v23 = vsub.f32 %v2268_v0, %v7651_v15  ;;  %2310 = vmatpush.msrb.mxu0 %v7651_v15  ;;  %2450 = vmatpush.msrb.mxu3 %v7651_v15  ;;  %v7753_v0 = vand.u32 4294901760, %v2269_v18 }
 0x3e1   : > { %v7666_v49 = vpop.permute.xlu0 %2206 }
 0x3e2   : > { %v2345_v34 = vand.u32 4294901760, %v7654_v23  ;;  %2411 = vmatpush.msrb.mxu2 %v7654_v23  ;;  %v2225_v13 = vpop.permute.xlu1 %2224 }
 0x3e3   : > { %v2228_v61 = vsel %vm949_vm2, %v2225_v13, %v2227_v62  ;;  %v2229_v28 = vsel %vm949_vm2, %v2227_v62, %v2225_v13  ;;  %v2212_v62 = vld [vmem:[%s9902_s1 + $0x30] sm:$0xff] }
 0x3e4   : > { %v2346_v46 = vsub.f32 %v7654_v23, %v2345_v34  ;;  %v2232_v38 = vmul.f32 %v2230_v42, %v2228_v61 }
 0x3e6   : > { %v2347_v11 = vand.u32 4294901760, %v2346_v46  ;;  %v7700_v30 = vand.u32 4294901760, %v2232_v38 }
 0x3e7   : > { %v7707_v6 = vpop.permute.xlu2 %2184 }
 0x3e8   : > { %2348 = vmatpush.msrb.mxu1 %v2347_v11  ;;  %v7743_v59 = vsub.f32 %v2232_v38, %v7700_v30 }
 0x3ea   : > { %v7669_v55 = vpop.permute.xlu1 %2182 }
 0x3eb   : > { %v2187_v36 = vsel %vm904_vm6, %v7707_v6, %v7669_v55 }
 0x3ec   : > { %v2190_v13 = vmul.f32 %v2188_v16, %v2187_v36  ;;  %v2330_v36 = vsub.f32 %v7740_v32, %v7769_v2 }
 0x3ee   : > { %v7784_v33 = vand.u32 4294901760, %v2190_v13 }
 0x3ef   : > { %v2239_v7 = vpop.permute.xlu0 %2238 }
 0x3f0   : > { %v2240_v44 = vsel %vm962_vm5, %v2237_v22, %v2239_v7  ;;  %v2241_v57 = vsel %vm962_vm5, %v2239_v7, %v2237_v22  ;;  %v2219_v22 = vld [vmem:[%s9902_s1 + $0x48] sm:$0xff] }
 0x3f1   : > { %v2244_v19 = vmul.f32 %v2242_v12, %v2240_v44  ;;  %v2245_v4 = vmul.f32 %v2243_v8, %v2241_v57  ;;  %v7772_v12 = vmul.f32 %v2219_v22, %v7612_v35  ;;  %v9943_v44 = vand.u32 4294901760, %v7743_v59  ;;  %v2201_v57 = vld [vmem:[%s9902_s1 + $0x28] sm:$0xff] }
 0x3f2   : > { %v2251_v20 = vpop.permute.xlu1 %2250 }
 0x3f3   : > { %v7702_v56 = vand.u32 4294901760, %v2244_v19  ;;  %v2252_v53 = vsel %vm975_vm1, %v2249_v3, %v2251_v20  ;;  %v2253_v41 = vsel %vm975_vm1, %v2251_v20, %v2249_v3  ;;  %v2233_v3 = vmul.f32 %v2231_v29, %v2229_v28 }
 0x3f4   : > { %v2256_v48 = vmul.f32 %v2254_v27, %v2252_v53  ;;  %v2257_v5 = vmul.f32 %v2255_v25, %v2253_v41  ;;  %v7790_v27 = vsub.f32 %v2269_v18, %v7753_v0  ;;  %v7794_v53 = vand.u32 4294901760, %v2245_v4  ;;  %v2213_v41 = vld [vmem:[%s9902_s1 + $0x38] sm:$0xff] }
 0x3f5   : > { %v7727_v40 = vsub.f32 %v2244_v19, %v7702_v56  ;;  %v2371_v19 = vand.u32 4294901760, %v7748_v37  ;;  %v7792_v20 = vand.u32 4294901760, %v2233_v3  ;;  %v7827_v8 = vand.u32 4294901760, %v7772_v12 }
 0x3f6   : > { %v7734_v60 = vand.u32 4294901760, %v2256_v48  ;;  %v7774_v38 = vand.u32 4294901760, %v2257_v5 }
 0x3f7   : > { %v2197_v50 = vpop.permute.xlu0 %2196  ;;  %v9944_v42 = vand.u32 4294901760, %v7727_v40 }
 0x3f8   : > { %v2199_v46 = vsel %vm917_vm8, %v2197_v50, %v7644_v24  ;;  %2312 = vmatpush.msrb.mxu0 %v7734_v60  ;;  %2452 = vmatpush.msrb.mxu3 %v7734_v60  ;;  %v7761_v14 = vsub.f32 %v2256_v48, %v7734_v60  ;;  %v7817_v16 = vsub.f32 %v2257_v5, %v7774_v38 }
 0x3f9   : > { %v2202_v11 = vmul.f32 %v2200_v63, %v2199_v46  ;;  %v2358_v25 = vsub.f32 %v7727_v40, %v9944_v42  ;;  %v2198_v63 = vsel %vm917_vm8, %v7644_v24, %v2197_v50  ;;  %v7840_v46 = vsub.f32 %v2190_v13, %v7784_v33  ;;  %v2176_v50 = vld [vmem:[%s9902_s1] sm:$0xff]  ;;  %v2189_v13 = vld [vmem:[%s9902_s1 + $0x18] sm:$0xff] }
 0x3fa   : > { %2314 = vmatpush.msrb.mxu0 %v7702_v56  ;;  %v2209_v61 = vpop.permute.xlu1 %2208  ;;  %2414 = vmatpush.msrb.mxu2 %v7761_v14  ;;  %v2351_v35 = vand.u32 4294901760, %v7761_v14  ;;  %v9947_v51 = vand.u32 4294901760, %v7817_v16 }
 0x3fb   : > { %v7776_v7 = vand.u32 4294901760, %v2202_v11  ;;  %2454 = vmatpush.msrb.mxu3 %v7702_v56  ;;  %v2211_v9 = vsel %vm930_vm7, %v2209_v61, %v7666_v49  ;;  %v2210_v18 = vsel %vm930_vm7, %v7666_v49, %v2209_v61  ;;  %v2364_v49 = vsub.f32 %v7743_v59, %v9943_v44 }
 0x3fc   : > { %v2214_v43 = vmul.f32 %v2212_v62, %v2211_v9  ;;  %2316 = vmatpush.msrb.mxu0 %v7700_v30  ;;  %2417 = vmatpush.msrb.mxu2 %v7727_v40  ;;  %v2352_v29 = vsub.f32 %v7761_v14, %v2351_v35  ;;  %v7844_v62 = vsub.f32 %v2233_v3, %v7792_v20 }
 0x3fd   : > { %2456 = vmatpush.msrb.mxu3 %v7700_v30  ;;  %v7814_v28 = vsub.f32 %v2202_v11, %v7776_v7  ;;  %v9946_v11 = vand.u32 4294901760, %v7790_v27  ;;  %v2186_v61 = vsel %vm904_vm6, %v7669_v55, %v7707_v6  ;;  %v2215_v24 = vmul.f32 %v2213_v41, %v2210_v18 }
 0x3fe   : > { %v7807_v48 = vand.u32 4294901760, %v2214_v43  ;;  %2318 = vmatpush.msrb.mxu0 %v7671_v47  ;;  %2420 = vmatpush.msrb.mxu2 %v7743_v59  ;;  %v2353_v5 = vand.u32 4294901760, %v2352_v29  ;;  %v7859_v3 = vsub.f32 %v2245_v4, %v7794_v53  ;;  %v2203_v18 = vmul.f32 %v2201_v57, %v2198_v63 }
 0x3ff   : > { %2458 = vmatpush.msrb.mxu3 %v7671_v47  ;;  %v2171_v9 = vpop.permute.xlu0 %2170  ;;  %v9949_v41 = vand.u32 4294901760, %v7814_v28  ;;  %v2365_v4 = vand.u32 4294901760, %v2364_v49  ;;  %v9948_v63 = vand.u32 4294901760, %v7840_v46  ;;  %v2191_v49 = vmul.f32 %v2189_v13, %v2186_v61 }
 0x400   : > { %2320 = vmatpush.msrb.mxu0 %v7807_v48  ;;  %v7837_v22 = vsub.f32 %v2214_v43, %v7807_v48  ;;  %2423 = vmatpush.msrb.mxu2 %v7685_v21  ;;  %v2359_v43 = vand.u32 4294901760, %v2358_v25  ;;  %v2177_v25 = vld [vmem:[%s9902_s1 + $0x8] sm:$0xff]  ;;  %v7879_v42 = vand.u32 4294901760, %v2215_v24  ;;  %v9950_v13 = vand.u32 4294901760, %v7859_v3 }
 0x401   : > { %2460 = vmatpush.msrb.mxu3 %v7807_v48  ;;  %2354 = vmatpush.msrb.mxu1 %v2353_v5  ;;  %v2382_v61 = vsub.f32 %v7814_v28, %v9949_v41 }
 0x402   : > { %v2173_v55 = vpop.permute.xlu1 %2172  ;;  %2322 = vmatpush.msrb.mxu0 %v7776_v7  ;;  %v9945_v6 = vand.u32 4294901760, %v7837_v22  ;;  %2426 = vmatpush.msrb.mxu2 %v7837_v22 }
 0x403   : > { %v2175_v29 = vsel %vm891_vm9, %v2173_v55, %v2171_v9  ;;  %2462 = vmatpush.msrb.mxu3 %v7776_v7  ;;  %2360 = vmatpush.msrb.mxu1 %v2359_v43  ;;  %v2174_v5 = vsel %vm891_vm9, %v2171_v9, %v2173_v55  ;;  %v7883_v43 = vand.u32 4294901760, %v2330_v36  ;;  %v2602_v36 = vsub.f32 %v7817_v16, %v9947_v51 }
 0x404   : > { %v2178_v44 = vmul.f32 %v2176_v50, %v2175_v29  ;;  %2324 = vmatpush.msrb.mxu0 %v7784_v33  ;;  %v2376_v57 = vsub.f32 %v7837_v22, %v9945_v6  ;;  %2429 = vmatpush.msrb.mxu2 %v7814_v28  ;;  %v2596_v50 = vsub.f32 %v7790_v27, %v9946_v11  ;;  %v7894_v29 = vand.u32 4294901760, %v2203_v18 }
 0x405   : > { %2464 = vmatpush.msrb.mxu3 %v7784_v33  ;;  %2366 = vmatpush.msrb.mxu1 %v2365_v4  ;;  %v2179_v6 = vmul.f32 %v2177_v25, %v2174_v5  ;;  %v7902_v11 = vsub.f32 %v7772_v12, %v7827_v8  ;;  %v2388_v25 = vsub.f32 %v7840_v46, %v9948_v63  ;;  %v2613_v5 = vand.u32 4294901760, %v7844_v62  ;;  %v7921_v12 = vpop.permute.xlu2 %357 }
 0x406   : > { %v7888_v9 = vand.u32 4294901760, %v2178_v44  ;;  %v2377_v55 = vand.u32 4294901760, %v2376_v57  ;;  %2432 = vmatpush.msrb.mxu2 %v7840_v46  ;;  %v7914_v57 = vand.u32 4294901760, %v2191_v49  ;;  %v7917_v51 = vsub.f32 %v2215_v24, %v7879_v42 }
 0x407   : > { %2372 = vmatpush.msrb.mxu1 %v2371_v19  ;;  %v2597_v37 = vand.u32 4294901760, %v2596_v50  ;;  %v2608_v19 = vsub.f32 %v7859_v3, %v9950_v13  ;;  %v7930_v24 = vsub.f32 %v2203_v18, %v7894_v29  ;;  %v7932_v41 = vand.u32 4294901760, %v2179_v6 }
 0x408   : > { %2326 = vmatpush.msrb.mxu0 %v7888_v9  ;;  %v7908_v4 = vsub.f32 %v2178_v44, %v7888_v9  ;;  %2466 = vmatpush.msrb.mxu3 %v7888_v9  ;;  %v2383_v44 = vand.u32 4294901760, %v2382_v61  ;;  %v2603_v50 = vand.u32 4294901760, %v2602_v36  ;;  %v2389_v23 = vand.u32 4294901760, %v2388_v25 }
 0x409   : > { %2332 = vmatmul.f32.vlgmr.msrb.gmra.mxu0 %v7883_v43  ;;  %2378 = vmatpush.msrb.mxu1 %v2377_v55  ;;  %v2619_v55 = vand.u32 4294901760, %v7902_v11  ;;  %v7943_v61 = vsub.f32 %v2191_v49, %v7914_v57  ;;  %v2625_v36 = vand.u32 4294901760, %v7917_v51  ;;  %v2609_v14 = vand.u32 4294901760, %v2608_v19 }
 0x40a   : > { %2484 = vmatpush.msra.mxu0 %v2345_v34  ;;  %v2393_v63 = vand.u32 4294901760, %v7908_v4  ;;  %2598 = vmatpush.msra.mxu3 %v2597_v37  ;;  %v2614_v34 = vsub.f32 %v7844_v62, %v2613_v5  ;;  %v10086_v37 = vld [vmem:[#allocation10_spill] sm:$0xff]  ;;  %v7951_v25 = vsub.f32 %v2179_v6, %v7932_v41  ;;  %v10089_v6 = vand.u32 4294901760, %v7743_v59 }
 0x40b   : > { %2435 = vmatpush.msrb.mxu2 %v7908_v4  ;;  %2384 = vmatpush.msrb.mxu1 %v2383_v44  ;;  %v422_v13 = vadd.f32 %v10086_v37, %v7921_v12  ;;  %v2620_v49 = vsub.f32 %v7902_v11, %v2619_v55  ;;  %v2631_v44 = vand.u32 4294901760, %v7930_v24 }
 0x40c   : > { %2488 = vmatpush.msra.mxu0 %v2351_v35  ;;  %v2394_v18 = vsub.f32 %v7908_v4, %v2393_v63  ;;  %2604 = vmatpush.msra.mxu3 %v2603_v50  ;;  %v10087_v4 = vand.u32 4294901760, %v7727_v40  ;;  %v2615_v50 = vand.u32 4294901760, %v2614_v34  ;;  %v2626_v40 = vsub.f32 %v7917_v51, %v2625_v36 }
 0x40d   : > { %2560 = vmatpush.msra.mxu2 %v7753_v0  ;;  %2390 = vmatpush.msrb.mxu1 %v2389_v23  ;;  %v10088_v23 = vld [vmem:[#allocation12_spill] sm:$0xff]  ;;  %v10090_v34 = vand.u32 4294901760, %v7685_v21  ;;  %v2632_v59 = vsub.f32 %v7930_v24, %v2631_v44  ;;  %v2643_v37 = vand.u32 4294901760, %v7951_v25 }
 0x40e   : > { %2438 = vmatmul.f32.vlgmr.msrb.gmra.mxu2 %v7740_v32  ;;  %v2395_v35 = vand.u32 4294901760, %v2394_v18  ;;  %2492 = vmatpush.msra.mxu0 %v10087_v4  ;;  %v465_v19 = vadd.f32 %v10088_v23, %v422_v13  ;;  %v2637_v18 = vand.u32 4294901760, %v7943_v61  ;;  %v2621_v13 = vand.u32 4294901760, %v2620_v49 }
 0x40f   : > { %2562 = vmatpush.msra.mxu2 %v7774_v38  ;;  %2610 = vmatpush.msra.mxu3 %v2609_v14  ;;  %v10091_v14 = vld [vmem:[#allocation13_spill] sm:$0xff]  ;;  %v10092_v4 = vand.u32 4294901760, %v7837_v22  ;;  %v2633_v49 = vand.u32 4294901760, %v2632_v59  ;;  %v2644_v23 = vsub.f32 %v7951_v25, %v2643_v37  ;;  %v10094_v22 = vld [vmem:[#allocation11_spill] sm:$0xff] }
 0x410   : > { %2396 = vmatpush.msrb.mxu1 %v2395_v35  ;;  %2470 = vmatmul.f32.vlgmr.msrb.gmra.mxu3 %v7769_v2  ;;  %v506_v35 = vadd.f32 %v10091_v14, %v465_v19  ;;  %v2638_v21 = vsub.f32 %v7943_v61, %v2637_v18  ;;  %v8106_v14 = vand.u32 4294901760, %v7169_v1 }
 0x411   : > { %2496 = vmatpush.msra.mxu0 %v10089_v6  ;;  %2564 = vmatpush.msra.mxu2 %v7794_v53 }
 0x412   : > { %2616 = vmatpush.msra.mxu3 %v2615_v50  ;;  %2398 = vmatmul.f32.vlgmr.msrb.gmra.mxu1 %v7698_v10  ;;  %v2627_v50 = vand.u32 4294901760, %v2626_v40  ;;  %v549_v19 = vadd.f32 %v10094_v22, %v506_v35  ;;  %v2639_v6 = vand.u32 4294901760, %v2638_v21 }
 0x413   : > { %2500 = vmatpush.msra.mxu0 %v10090_v34  ;;  %2530 = vmatpush.msra.mxu1 %v7651_v15  ;;  %v10093_v15 = vand.u32 4294901760, %v7814_v28  ;;  %v2645_v28 = vand.u32 4294901760, %v2644_v23  ;;  %v2905_v23 = vsub.f32 %v7169_v1, %v8106_v14 }
 0x414   : > { %2566 = vmatpush.msra.mxu2 %v7792_v20  ;;  %2622 = vmatpush.msra.mxu3 %v2621_v13 }
 0x415   : > { %2504 = vmatpush.msra.mxu0 %v10092_v4  ;;  %2532 = vmatpush.msra.mxu1 %v7734_v60  ;;  %v10095_v60 = vand.u32 4294901760, %v7840_v46 }
 0x416   : > { %2568 = vmatpush.msra.mxu2 %v7827_v8  ;;  %2628 = vmatpush.msra.mxu3 %v2627_v50 }
 0x417   : > { %2508 = vmatpush.msra.mxu0 %v10093_v15  ;;  %2534 = vmatpush.msra.mxu1 %v7702_v56  ;;  %v10096_v56 = vld [vmem:[#allocation18_spill] sm:$0xff] }
 0x418   : > { %2570 = vmatpush.msra.mxu2 %v7879_v42  ;;  %2634 = vmatpush.msra.mxu3 %v2633_v49  ;;  %v588_v40 = vadd.f32 %v10096_v56, %v549_v19 }
 0x419   : > { %2512 = vmatpush.msra.mxu0 %v10095_v60  ;;  %2536 = vmatpush.msra.mxu1 %v7700_v30  ;;  %v10098_v30 = vld [vmem:[#allocation20_spill] sm:$0xff] }
 0x41a   : > { %2572 = vmatpush.msra.mxu2 %v7894_v29  ;;  %2640 = vmatpush.msra.mxu3 %v2639_v6  ;;  %v623_v46 = vadd.f32 %v10098_v30, %v588_v40  ;;  %v2906_v40 = vand.u32 4294901760, %v2905_v23 }
 0x41b   : > { %2516 = vmatpush.msra.mxu0 %v2393_v63  ;;  %2538 = vmatpush.msra.mxu1 %v7671_v47  ;;  %v10097_v47 = vand.u32 4294901760, %v7790_v27 }
 0x41c   : > { %2574 = vmatpush.msra.mxu2 %v7914_v57  ;;  %2646 = vmatpush.msra.mxu3 %v2645_v28  ;;  %v883_v63 = vmax.f32 %v623_v46, 0.0 }
 0x41d   : > { %2518 = vmatmul.f32.vlgmr.msra.gmra.mxu0 %v7698_v10  ;;  %2540 = vmatpush.msra.mxu1 %v7807_v48  ;;  %v10099_v48 = vand.u32 4294901760, %v7817_v16 }
 0x41e   : > { %2661 = vmatpush.msrb.mxu0 %v7790_v27  ;;  %2780 = vmatpush.msrb.mxu3 %v7753_v0  ;;  %v10100_v27 = vand.u32 4294901760, %v7859_v3 }
 0x41f   : > { %2576 = vmatpush.msra.mxu2 %v7932_v41  ;;  %2542 = vmatpush.msra.mxu1 %v7776_v7  ;;  %v8031_v7 = vand.u32 4294901760, %v883_v63 }
 0x420   : > { %2582 = vmatmul.f32.vlgmr.msra.gmra.mxu2 %v7883_v43  ;;  %2664 = vmatpush.msrb.mxu0 %v7817_v16 }
 0x421   : > { %2734 = vmatpush.msrb.mxu2 %v10097_v47  ;;  %2782 = vmatpush.msrb.mxu3 %v7774_v38 }
 0x422   : > { %2648 = vmatmul.f32.vlgmr.msra.gmra.mxu3 %v7698_v10  ;;  %2667 = vmatpush.msrb.mxu0 %v7859_v3 }
 0x423   : > { %2738 = vmatpush.msrb.mxu2 %v10099_v48  ;;  %2784 = vmatpush.msrb.mxu3 %v7794_v53 }
 0x424   : > { %2544 = vmatpush.msra.mxu1 %v7784_v33  ;;  %2670 = vmatpush.msrb.mxu0 %v7844_v62  ;;  %v2297_v62 = vpop.permute.xlu0 %2296 }
 0x425   : > { %2742 = vmatpush.msrb.mxu2 %v10100_v27  ;;  %2786 = vmatpush.msrb.mxu3 %v7792_v20 }
 0x426   : > { %2546 = vmatpush.msra.mxu1 %v7888_v9  ;;  %2673 = vmatpush.msrb.mxu0 %v7902_v11 }
 0x427   : > { %2548 = vmatmul.f32.vlgmr.msra.gmra.mxu1 %v7698_v10  ;;  %2746 = vmatpush.msrb.mxu2 %v2613_v5 }
 0x428   : > { %2700 = vmatpush.msrb.mxu1 %v7753_v0  ;;  %2788 = vmatpush.msrb.mxu3 %v7827_v8  ;;  %v8044_v0 = vsub.f32 %v883_v63, %v8031_v7 }
 0x429   : > { %2676 = vmatpush.msrb.mxu0 %v7917_v51  ;;  %2750 = vmatpush.msrb.mxu2 %v2619_v55 }
 0x42a   : > { %2702 = vmatpush.msrb.mxu1 %v7774_v38  ;;  %2790 = vmatpush.msrb.mxu3 %v7879_v42  ;;  %v2888_v51 = vand.u32 4294901760, %v8044_v0  ;;  %v10101_v38 = vld [vmem:[#allocation21_spill] sm:$0xff] }
 0x42b   : > { %2679 = vmatpush.msrb.mxu0 %v7930_v24  ;;  %2754 = vmatpush.msrb.mxu2 %v2625_v36  ;;  %v674_v33 = vadd.f32 %v10101_v38, %v7921_v12  ;;  %v2809_v24 = vld [vmem:[%s9907_s6 + $0x8] sm:$0xff] }
 0x42c   : > { %2704 = vmatpush.msrb.mxu1 %v7794_v53  ;;  %2792 = vmatpush.msrb.mxu3 %v7894_v29  ;;  %v2835_v36 = vsel %vm2830_vm10, %v2809_v24, 0 }
 0x42d   : > { %2682 = vmatpush.msrb.mxu0 %v7943_v61  ;;  %2758 = vmatpush.msrb.mxu2 %v2631_v44 }
 0x42e   : > { %2706 = vmatpush.msrb.mxu1 %v7792_v20  ;;  %2794 = vmatpush.msrb.mxu3 %v7914_v57  ;;  %v10102_v20 = vld [vmem:[#allocation19_spill] sm:$0xff] }
 0x42f   : > { %2685 = vmatpush.msrb.mxu0 %v7951_v25  ;;  %2762 = vmatpush.msrb.mxu2 %v2637_v18  ;;  %v717_v53 = vadd.f32 %v10102_v20, %v674_v33  ;;  %v8098_v18 = vand.u32 4294901760, %v7585_v31 }
 0x430   : > { %2708 = vmatpush.msrb.mxu1 %v7827_v8  ;;  %2796 = vmatpush.msrb.mxu3 %v7932_v41 }
 0x431   : > { %2688 = vmatmul.f32.vlgmr.msrb.gmra.mxu0 %v7740_v32  ;;  %2766 = vmatpush.msrb.mxu2 %v2643_v37  ;;  %v2889_v32 = vsub.f32 %v8044_v0, %v2888_v51  ;;  %v758_v16 = vadd.f32 %v7152_v39, %v717_v53  ;;  %v8103_v37 = vand.u32 4294901760, %v2835_v36  ;;  %v2899_v50 = vsub.f32 %v7585_v31, %v8098_v18  ;;  %v2819_v31 = vld [vmem:[%s9908_s7 + $0x8] sm:$0xff] }
 0x432   : > { %2850 = vmatpush.msra.mxu0 %v8031_v7  ;;  %2967 = vmatpush.msra.mxu3 %v8031_v7 }
 0x433   : > { %2710 = vmatpush.msrb.mxu1 %v7879_v42  ;;  %2933 = vmatpush.msra.mxu2 %v8044_v0  ;;  %v2890_v42 = vand.u32 4294901760, %v2889_v32  ;;  %v8114_v49 = vsub.f32 %v2835_v36, %v8103_v37  ;;  %v2900_v6 = vand.u32 4294901760, %v2899_v50 }
 0x434   : > { %2798 = vmatmul.f32.vlgmr.msrb.gmra.mxu3 %v7698_v10  ;;  %2768 = vmatmul.f32.vlgmr.msrb.gmra.mxu2 %v7698_v10  ;;  %v801_v10 = vadd.f32 %v7156_v45, %v758_v16 }
 0x435   : > { %2712 = vmatpush.msrb.mxu1 %v7894_v29  ;;  %2827 = vperm.xlu1 %6382, %v2819_v31   ;;  %v8128_v56 = vand.u32 4294901760, %v8114_v49  ;;  %v2901_v48 = vsub.f32 %v2899_v50, %v2900_v6 }
 0x436   : > { %v840_v8 = vadd.f32 %v7159_v26, %v801_v10 }
 0x437   : > { %2714 = vmatpush.msrb.mxu1 %v7914_v57  ;;  %v2868_v32 = vsub.f32 %v8114_v49, %v8128_v56  ;;  %v2902_v20 = vand.u32 4294901760, %v2901_v48 }
 0x439   : > { %2716 = vmatpush.msrb.mxu1 %v7932_v41  ;;  %v2808_v41 = vld [vmem:[%s9907_s6] sm:$0xff]  ;;  %v2869_v0 = vand.u32 4294901760, %v2868_v32 }
 0x43a   : > { %2720 = vmatmul.f32.vlgmr.msrb.gmra.mxu1 %v7769_v2  ;;  %v875_v2 = vadd.f32 %v7162_v52, %v840_v8  ;;  %v2832_v29 = vsel %vm2830_vm10, %v2808_v41, 0 }
 0x43b   : > { %2891 = vmatpush.msra.mxu1 %v2890_v42  ;;  %v8083_v57 = vand.u32 4294901760, %v2832_v29  ;;  %v2907_v42 = vsub.f32 %v2905_v23, %v2906_v40 }
 0x43c   : > { %v884_v39 = vmax.f32 %v875_v2, 0.0  ;;  %v3071_v2 = vand.u32 4294901760, %v7180_v58 }
 0x43d   : > { %v8091_v61 = vsub.f32 %v2832_v29, %v8083_v57  ;;  %v2908_v53 = vand.u32 4294901760, %v2907_v42 }
 0x43e   : > { %v8085_v12 = vand.u32 4294901760, %v884_v39 }
 0x43f   : > { %v8101_v13 = vand.u32 4294901760, %v8091_v61 }
 0x440   : > { %v8095_v44 = vsub.f32 %v884_v39, %v8085_v12 }
 0x441   : > { %v2860_v21 = vsub.f32 %v8091_v61, %v8101_v13 }
 0x442   : > { %v3104_v4 = vand.u32 4294901760, %v8095_v44 }
 0x443   : > { %v8124_v60 = vand.u32 4294901760, %v2860_v21 }
 0x444   : > { %v3105_v19 = vsub.f32 %v8095_v44, %v3104_v4 }
 0x446   : > { %v3106_v47 = vand.u32 4294901760, %v3105_v19 }
 0x486   : > { %v2333_v11 = vpop.f32.mrf.mxu0 }
 0x487   : > { %v2334_v43 = vadd.f32 %v2333_v11, %v2297_v62 }
 0x48f   : > { %v2399_v3 = vpop.f32.mrf.mxu1 }
 0x490   : > { %v2400_v9 = vadd.f32 %v2399_v3, %v2334_v43  ;;  %v3069_v3 = vand.u32 4294901760, %v7609_v17 }
 0x491   : > { %v2439_v5 = vpop.f32.mrf.mxu2 }
 0x492   : > { %v2440_v45 = vadd.f32 %v2439_v5, %v2400_v9  ;;  %v3115_v9 = vsub.f32 %v7609_v17, %v3069_v3 }
 0x493   : > { %v2471_v26 = vpop.f32.mrf.mxu3 }
 0x494   : > { %v2472_v52 = vadd.f32 %v2471_v26, %v2440_v45  ;;  %v3116_v39 = vand.u32 4294901760, %v3115_v9 }
 0x496   : > { %v3117_v24 = vsub.f32 %v3115_v9, %v3116_v39 }
 0x49a   : > { %v2519_v55 = vpop.f32.mrf.mxu0 }
 0x49b   : > { %v2520_v25 = vadd.f32 %v2519_v55, %v2472_v52  ;;  %v3118_v52 = vand.u32 4294901760, %v3117_v24 }
 0x4a3   : > { %v2583_v28 = vpop.f32.mrf.mxu2 }
 0x4a4   : > { %v2549_v34 = vpop.f32.mrf.mxu1  ;;  %v2584_v46 = vadd.f32 %v2583_v28, %v2297_v62 }
 0x4a5   : > { %v2550_v59 = vadd.f32 %v2549_v34, %v2520_v25  ;;  %v2649_v27 = vpop.f32.mrf.mxu3 }
 0x4a6   : > { %v2650_v33 = vadd.f32 %v2649_v27, %v2584_v46 }
 0x4a7   : > { %v2802_v35 = vmax.f32 %v2550_v59, 0.0 }
 0x4a9   : > { %v2851_v15 = vand.u32 4294901760, %v2802_v35 }
 0x4ab   : > { %2852 = vmatpush.msra.mxu0 %v2851_v15  ;;  %2969 = vmatpush.msra.mxu3 %v2851_v15  ;;  %v2893_v22 = vsub.f32 %v2802_v35, %v2851_v15 }
 0x4ad   : > { %2854 = vmatpush.msra.mxu0 %v8098_v18  ;;  %2936 = vmatpush.msra.mxu2 %v2893_v22  ;;  %v2894_v1 = vand.u32 4294901760, %v2893_v22 }
 0x4ae   : > { %2971 = vmatpush.msra.mxu3 %v8098_v18  ;;  %v2689_v38 = vpop.f32.mrf.mxu0 }
 0x4af   : > { %2856 = vmatpush.msra.mxu0 %v8106_v14  ;;  %2939 = vmatpush.msra.mxu2 %v2899_v50  ;;  %v2895_v30 = vsub.f32 %v2893_v22, %v2894_v1 }
 0x4b0   : > { %2973 = vmatpush.msra.mxu3 %v8106_v14  ;;  %2862 = vmatmul.f32.vlgmr.msra.gmra.mxu0 %v8124_v60 }
 0x4b1   : > { %3002 = vmatpush.msrb.mxu0 %v2888_v51  ;;  %v2896_v63 = vand.u32 4294901760, %v2895_v30  ;;  %2942 = vmatpush.msra.mxu2 %v2905_v23  ;;  %v2690_v51 = vadd.f32 %v2689_v38, %v2650_v33 }
 0x4b2   : > { %3107 = vmatpush.msrb.mxu3 %v3106_v47  ;;  %2945 = vmatmul.f32.vlgmr.msra.gmra.mxu2 %v8091_v61 }
 0x4b3   : > { %2977 = vmatmul.f32.vlgmr.msra.gmra.mxu3 %v8101_v13  ;;  %3006 = vmatpush.msrb.mxu0 %v2894_v1  ;;  %v6323_v1 = vld [vmem:[%s9903_s2 + $0x28] sm:$0xff] }
 0x4b4   : > { %3066 = vmatpush.msrb.mxu2 %v8085_v12  ;;  %2897 = vmatpush.msra.mxu1 %v2896_v63  ;;  %v3311_v63 = vsel %vm360_vm0, %v6323_v1, 0  ;;  %v6385_v1 = vld [vmem:[%s6529_s15 + $0x8] sm:$0xff] }
 0x4b5   : > { %3010 = vmatpush.msrb.mxu0 %v2900_v6  ;;  %v8194_v33 = vand.u32 4294901760, %v3311_v63 }
 0x4b6   : > { %2903 = vmatpush.msra.mxu1 %v2902_v20 }
 0x4b7   : > { %v2721_v16 = vpop.f32.mrf.mxu1  ;;  %3014 = vmatpush.msrb.mxu0 %v2906_v40  ;;  %v2769_v8 = vpop.f32.mrf.mxu2 }
 0x4b8   : > { %v2722_v10 = vadd.f32 %v2721_v16, %v2690_v51  ;;  %2909 = vmatpush.msra.mxu1 %v2908_v53  ;;  %2870 = vmatmul.f32.gmra.mxu0 %v2869_v0  ;;  %v2799_v11 = vpop.f32.mrf.mxu3  ;;  %v6324_v51 = vld [vmem:[%s9903_s2 + $0x30] sm:$0xff] }
 0x4b9   : > { %3149 = vmatpush.msra.mxu0 %v8095_v44  ;;  %2911 = vmatmul.f32.vlgmr.msra.gmra.mxu1 %v8083_v57  ;;  %v6384_v53 = vld [vmem:[%s6529_s15 + $0x10] sm:$0xff] }
 0x4ba   : > { %v2770_v62 = vadd.f32 %v2769_v8, %v2722_v10  ;;  %3037 = vmatpush.msrb.mxu1 %v8031_v7  ;;  %2950 = vmatmul.f32.gmra.mxu2 %v8114_v49  ;;  %v3121_v7 = vsub.f32 %v7180_v58, %v3071_v2 }
 0x4bb   : > { %2983 = vmatmul.f32.gmra.mxu3 %v8128_v56 }
 0x4bc   : > { %v2800_v41 = vadd.f32 %v2799_v11, %v2770_v62  ;;  %3039 = vmatpush.msrb.mxu1 %v2851_v15  ;;  %v3122_v17 = vand.u32 4294901760, %v3121_v7  ;;  %v8206_v62 = vsub.f32 %v3311_v63, %v8194_v33 }
 0x4be   : > { %v2803_v43 = vmax.f32 %v2800_v41, 0.0  ;;  %3041 = vmatpush.msrb.mxu1 %v8098_v18  ;;  %v3123_v55 = vsub.f32 %v3121_v7, %v3122_v17  ;;  %v2823_v18 = vpop.permute.xlu2 %2822 }
 0x4c0   : > { %v3067_v29 = vand.u32 4294901760, %v2803_v43  ;;  %3043 = vmatpush.msrb.mxu1 %v8106_v14  ;;  %3016 = vmatmul.f32.vlgmr.msrb.gmra.mxu0 %v8083_v57  ;;  %v3124_v36 = vand.u32 4294901760, %v3123_v55  ;;  %v8172_v14 = vpop.permute.xlu1 %2827 }
 0x4c1   : > { %2915 = vmatmul.f32.gmra.mxu1 %v8103_v37 }
 0x4c2   : > { %3183 = vmatpush.msra.mxu1 %v8085_v12  ;;  %3068 = vmatpush.msrb.mxu2 %v3067_v29  ;;  %v3109_v5 = vsub.f32 %v2803_v43, %v3067_v29  ;;  %v3314_v43 = vsel %vm360_vm0, %v6324_v51, 0 }
 0x4c4   : > { %3185 = vmatpush.msra.mxu1 %v3067_v29  ;;  %3070 = vmatpush.msrb.mxu2 %v3069_v3  ;;  %v3110_v45 = vand.u32 4294901760, %v3109_v5 }
 0x4c5   : > { %3152 = vmatpush.msra.mxu0 %v3109_v5 }
 0x4c6   : > { %3187 = vmatpush.msra.mxu1 %v3069_v3  ;;  %3072 = vmatpush.msrb.mxu2 %v3071_v2  ;;  %v3111_v26 = vsub.f32 %v3109_v5, %v3110_v45 }
 0x4c7   : > { %3155 = vmatpush.msra.mxu0 %v3115_v9  ;;  %3078 = vmatmul.f32.vlgmr.msrb.gmra.mxu2 %v8124_v60 }
 0x4c8   : > { %3189 = vmatpush.msra.mxu1 %v3071_v2  ;;  %3218 = vmatpush.msra.mxu2 %v3104_v4  ;;  %v3112_v58 = vand.u32 4294901760, %v3111_v26 }
 0x4c9   : > { %3158 = vmatpush.msra.mxu0 %v3121_v7  ;;  %3045 = vmatmul.f32.vlgmr.msrb.gmra.mxu1 %v8083_v57 }
 0x4ca   : > { %3020 = vmatmul.f32.gmra.mxu0 %v8103_v37  ;;  %3222 = vmatpush.msra.mxu2 %v3110_v45  ;;  %v8219_v45 = vand.u32 4294901760, %v3314_v43 }
 0x4cb   : > { %3113 = vmatpush.msrb.mxu3 %v3112_v58  ;;  %v6325_v58 = vld [vmem:[%s9903_s2 + $0x38] sm:$0xff] }
 0x4cc   : > { %3226 = vmatpush.msra.mxu2 %v3116_v39  ;;  %v8217_v39 = vand.u32 4294901760, %v8206_v62 }
 0x4cd   : > { %3119 = vmatpush.msrb.mxu3 %v3118_v52 }
 0x4ce   : > { %3230 = vmatpush.msra.mxu2 %v3122_v17 }
 0x4cf   : > { %3125 = vmatpush.msrb.mxu3 %v3124_v36  ;;  %3086 = vmatmul.f32.gmra.mxu2 %v2869_v0 }
 0x4d0   : > { %3127 = vmatmul.f32.vlgmr.msrb.gmra.mxu3 %v8083_v57 }
 0x4d1   : > { %3253 = vmatpush.msra.mxu3 %v8085_v12  ;;  %3049 = vmatmul.f32.gmra.mxu1 %v8103_v37 }
 0x4d2   : > { %3161 = vmatmul.f32.vlgmr.msra.gmra.mxu0 %v8091_v61 }
 0x4d3   : > { %3255 = vmatpush.msra.mxu3 %v3067_v29 }
 0x4d5   : > { %3257 = vmatpush.msra.mxu3 %v3069_v3 }
 0x4d7   : > { %3259 = vmatpush.msra.mxu3 %v3071_v2  ;;  %3232 = vmatmul.f32.vlgmr.msra.gmra.mxu2 %v8083_v57 }
 0x4d8   : > { %3131 = vmatmul.f32.gmra.mxu3 %v8103_v37 }
 0x4d9   : > { %3193 = vmatmul.f32.vlgmr.msra.gmra.mxu1 %v8101_v13 }
 0x4da   : > { %3166 = vmatmul.f32.gmra.mxu0 %v8114_v49 }
 0x4df   : > { %3236 = vmatmul.f32.gmra.mxu2 %v8103_v37 }
 0x4e0   : > { %3261 = vmatmul.f32.vlgmr.msra.gmra.mxu3 %v8083_v57 }
 0x4e1   : > { %3199 = vmatmul.f32.gmra.mxu1 %v8128_v56  ;;  %v6383_v56 = vld [vmem:[%s6529_s15] sm:$0xff] }
 0x4e8   : > { %3265 = vmatmul.f32.gmra.mxu3 %v8103_v37  ;;  %v6322_v37 = vld [vmem:[%s9903_s2 + $0x20] sm:$0xff] }
 0x4e9   : > { %v3308_v23 = vsel %vm360_vm0, %v6322_v37, 0 }
 0x4ea   : > { %v8179_v31 = vand.u32 4294901760, %v3308_v23 }
 0x4ec   : > { %v8186_v46 = vsub.f32 %v3308_v23, %v8179_v31 }
 0x4ee   : > { %v8192_v38 = vand.u32 4294901760, %v8186_v46 }
 0x4f0   : > { %v3340_v11 = vsub.f32 %v8186_v46, %v8192_v38 }
 0x4f2   : > { %v8214_v5 = vand.u32 4294901760, %v3340_v11 }
 0x52d   : > { %v2863_v12 = vpop.f32.mrf.mxu0 }
 0x52e   : > { %v2864_v34 = vadd.f32 %v2863_v12, %v2823_v18  ;;  %v3348_v12 = vsub.f32 %v8206_v62, %v8217_v39 }
 0x535   : > { %v2871_v25 = vpop.f32.mrf.mxu0  ;;  %v2946_v44 = vpop.f32.mrf.mxu2 }
 0x536   : > { %v2912_v61 = vpop.f32.mrf.mxu1  ;;  %v2978_v35 = vpop.f32.mrf.mxu3  ;;  %v2872_v50 = vadd.f32 %v2871_v25, %v8172_v14 }
 0x537   : > { %v2913_v59 = vadd.f32 %v2912_v61, %v2864_v34  ;;  %v8231_v61 = vsub.f32 %v3314_v43, %v8219_v45  ;;  %v3317_v34 = vsel %vm360_vm0, %v6325_v58, 0 }
 0x539   : > { %v2947_v13 = vadd.f32 %v2946_v44, %v2913_v59 }
 0x53b   : > { %v2979_v15 = vadd.f32 %v2978_v35, %v2947_v13 }
 0x53d   : > { %v2951_v57 = vpop.f32.mrf.mxu2  ;;  %v3017_v21 = vpop.f32.mrf.mxu0 }
 0x53e   : > { %v2916_v4 = vpop.f32.mrf.mxu1  ;;  %v3018_v22 = vadd.f32 %v3017_v21, %v2979_v15  ;;  %v2984_v28 = vpop.f32.mrf.mxu3  ;;  %v8242_v21 = vand.u32 4294901760, %v3317_v34 }
 0x53f   : > { %v2917_v49 = vadd.f32 %v2916_v4, %v2872_v50 }
 0x541   : > { %v2952_v60 = vadd.f32 %v2951_v57, %v2917_v49  ;;  %v8237_v57 = vand.u32 4294901760, %v3348_v12 }
 0x543   : > { %v2985_v48 = vadd.f32 %v2984_v28, %v2952_v60  ;;  %v8249_v60 = vsub.f32 %v3317_v34, %v8242_v21 }
 0x546   : > { %v3046_v19 = vpop.f32.mrf.mxu1 }
 0x547   : > { %v3047_v6 = vadd.f32 %v3046_v19, %v3018_v22  ;;  %v3021_v30 = vpop.f32.mrf.mxu0 }
 0x548   : > { %v3022_v32 = vadd.f32 %v3021_v30, %v2985_v48  ;;  %v8256_v30 = vand.u32 4294901760, %v8249_v60 }
 0x549   : > { %v3269_v40 = vadd.f32 %v6383_v56, %v3047_v6 }
 0x54a   : > { %v3079_v47 = vpop.f32.mrf.mxu2 }
 0x54b   : > { %v8188_v27 = vmax.f32 %v3269_v40, 0.0  ;;  %v3080_v3 = vadd.f32 %v3079_v47, %v2823_v18 }
 0x54d   : > { %10103 = vst [vmem:[#allocation22_spill] sm:$0xff] %v8188_v27  ;;  %v8197_v0 = vand.u32 4294901760, %v8188_v27 }
 0x54e   : > { %v3050_v42 = vpop.f32.mrf.mxu1 }
 0x54f   : > { %v3051_v20 = vadd.f32 %v3050_v42, %v3022_v32  ;;  %v3391_v2 = vsub.f32 %v8188_v27, %v8197_v0  ;;  %v3162_v9 = vpop.f32.mrf.mxu0  ;;  %v3364_v42 = vsub.f32 %v8249_v60, %v8256_v30 }
 0x551   : > { %v3271_v16 = vadd.f32 %v6384_v53, %v3051_v20  ;;  %v3392_v26 = vand.u32 4294901760, %v3391_v2 }
 0x552   : > { %v3087_v10 = vpop.f32.mrf.mxu2 }
 0x553   : > { %v3128_v8 = vpop.f32.mrf.mxu3  ;;  %v8208_v41 = vmax.f32 %v3271_v16, 0.0  ;;  %v3088_v25 = vadd.f32 %v3087_v10, %v8172_v14  ;;  %v3393_v18 = vsub.f32 %v3391_v2, %v3392_v26  ;;  %v8240_v14 = vand.u32 4294901760, %v8231_v61 }
 0x554   : > { %v3129_v29 = vadd.f32 %v3128_v8, %v3080_v3  ;;  %v3365_v16 = vand.u32 4294901760, %v3364_v42 }
 0x555   : > { %10104 = vst [vmem:[#allocation25_spill] sm:$0xff] %v8208_v41  ;;  %v3333_v7 = vand.u32 4294901760, %v8208_v41  ;;  %v3394_v37 = vand.u32 4294901760, %v3393_v18  ;;  %v3356_v19 = vsub.f32 %v8231_v61, %v8240_v14 }
 0x556   : > { %v3194_v24 = vpop.f32.mrf.mxu1  ;;  %v3163_v55 = vadd.f32 %v3162_v9, %v3129_v29 }
 0x557   : > { %3334 = vmatpush.msrb.mxu0 %v3333_v7  ;;  %3469 = vmatpush.msrb.mxu3 %v3333_v7  ;;  %v3385_v17 = vsub.f32 %v8208_v41, %v3333_v7  ;;  %v3167_v50 = vpop.f32.mrf.mxu0  ;;  %v3357_v47 = vand.u32 4294901760, %v3356_v19  ;;  %v8502_v41 = vld [vmem:[%s9902_s1 + $0x68] sm:$0xff] }
 0x558   : > { %v3195_v35 = vadd.f32 %v3194_v24, %v3163_v55  ;;  %10131 = vst [vmem:[#allocation13_spill] sm:$0xff] %v8502_v41 }
 0x559   : > { %3336 = vmatpush.msrb.mxu0 %v8197_v0  ;;  %3429 = vmatpush.msrb.mxu2 %v3385_v17  ;;  %v3386_v52 = vand.u32 4294901760, %v3385_v17 }
 0x55a   : > { %3471 = vmatpush.msrb.mxu3 %v8197_v0  ;;  %3342 = vmatmul.f32.vlgmr.msrb.gmra.mxu0 %v8214_v5  ;;  %v3233_v59 = vpop.f32.mrf.mxu2 }
 0x55b   : > { %v3132_v36 = vpop.f32.mrf.mxu3  ;;  %3432 = vmatpush.msrb.mxu2 %v3391_v2  ;;  %3514 = vmatpush.msra.mxu0 %v3386_v52  ;;  %v3387_v44 = vsub.f32 %v3385_v17, %v3386_v52  ;;  %v3234_v15 = vadd.f32 %v3233_v59, %v3195_v35 }
 0x55c   : > { %3435 = vmatmul.f32.vlgmr.msrb.gmra.mxu2 %v8186_v46  ;;  %3475 = vmatmul.f32.vlgmr.msrb.gmra.mxu3 %v8192_v38  ;;  %v3133_v4 = vadd.f32 %v3132_v36, %v3088_v25  ;;  %v3290_v36 = vpop.permute.xlu0 %3289 }
 0x55d   : > { %3518 = vmatpush.msra.mxu0 %v3392_v26  ;;  %v3388_v13 = vand.u32 4294901760, %v3387_v44 }
 0x55e   : > { %v3168_v49 = vadd.f32 %v3167_v50, %v3133_v4  ;;  %v3200_v23 = vpop.f32.mrf.mxu1 }
 0x55f   : > { %3389 = vmatpush.msrb.mxu1 %v3388_v13 }
 0x560   : > { %v3201_v28 = vadd.f32 %v3200_v23, %v3168_v49 }
 0x561   : > { %3395 = vmatpush.msrb.mxu1 %v3394_v37 }
 0x562   : > { %3350 = vmatmul.f32.gmra.mxu0 %v8237_v57  ;;  %3397 = vmatmul.f32.vlgmr.msrb.gmra.mxu1 %v8179_v31  ;;  %v3237_v40 = vpop.f32.mrf.mxu2 }
 0x563   : > { %v3262_v22 = vpop.f32.mrf.mxu3  ;;  %3551 = vmatpush.msra.mxu1 %v3333_v7  ;;  %v3238_v63 = vadd.f32 %v3237_v40, %v3201_v28 }
 0x564   : > { %v3263_v6 = vadd.f32 %v3262_v22, %v3234_v15  ;;  %3440 = vmatmul.f32.gmra.mxu2 %v8206_v62  ;;  %3481 = vmatmul.f32.gmra.mxu3 %v8217_v39 }
 0x565   : > { %3553 = vmatpush.msra.mxu1 %v8197_v0  ;;  %v6386_v0 = vld [vmem:[%s6529_s15 + $0x18] sm:$0xff]  ;;  %s10120_s15 = smov 16  }
 0x566   : > { %v3270_v56 = vadd.f32 %v6385_v1, %v3263_v6 }
 0x568   : > { %v8258_v48 = vmax.f32 %v3270_v56, 0.0 }
 0x56a   : > { %10105 = vst [vmem:[#allocation27_spill] sm:$0xff] %v8258_v48  ;;  %3358 = vmatmul.f32.gmra.mxu0 %v3357_v47  ;;  %3401 = vmatmul.f32.gmra.mxu1 %v8194_v33  ;;  %v3587_v51 = vand.u32 4294901760, %v8258_v48 }
 0x56b   : > { %v3266_v32 = vpop.f32.mrf.mxu3 }
 0x56c   : > { %v3267_v20 = vadd.f32 %v3266_v32, %v3238_v63  ;;  %3445 = vmatmul.f32.gmra.mxu2 %v8231_v61  ;;  %3487 = vmatmul.f32.gmra.mxu3 %v8240_v14  ;;  %v3643_v8 = vsub.f32 %v8258_v48, %v3587_v51 }
 0x56e   : > { %v3272_v53 = vadd.f32 %v6386_v0, %v3267_v20  ;;  %v3644_v2 = vand.u32 4294901760, %v3643_v8 }
 0x570   : > { %v8267_v10 = vmax.f32 %v3272_v53, 0.0  ;;  %v3645_v29 = vsub.f32 %v3643_v8, %v3644_v2 }
 0x572   : > { %10106 = vst [vmem:[#allocation26_spill] sm:$0xff] %v8267_v10  ;;  %v3585_v11 = vand.u32 4294901760, %v8267_v10  ;;  %3366 = vmatmul.f32.gmra.mxu0 %v3365_v16  ;;  %3405 = vmatmul.f32.gmra.mxu1 %v8219_v45  ;;  %v3646_v17 = vand.u32 4294901760, %v3645_v29  ;;  %v8391_v29 = vld [vmem:[%s9902_s1 + $0x80] sm:$0xff] }
 0x574   : > { %3586 = vmatpush.msra.mxu2 %v3585_v11  ;;  %3721 = vmatpush.msrb.mxu1 %v3585_v11  ;;  %v3637_v3 = vsub.f32 %v8267_v10, %v3585_v11 }
 0x575   : > { %3450 = vmatmul.f32.gmra.mxu2 %v8249_v60  ;;  %3493 = vmatmul.f32.gmra.mxu3 %v8256_v30 }
 0x576   : > { %3588 = vmatpush.msra.mxu2 %v3587_v51  ;;  %3681 = vmatpush.msrb.mxu0 %v3637_v3  ;;  %v3638_v43 = vand.u32 4294901760, %v3637_v3 }
 0x577   : > { %3723 = vmatpush.msrb.mxu1 %v3587_v51 }
 0x578   : > { %3684 = vmatpush.msrb.mxu0 %v3643_v8  ;;  %3766 = vmatpush.msrb.mxu2 %v3638_v43  ;;  %v3639_v9 = vsub.f32 %v3637_v3, %v3638_v43  ;;  %v6331_v3 = vld [vmem:[%s9906_s5 + $0x18] sm:$0xff] }
 0x57a   : > { %3770 = vmatpush.msrb.mxu2 %v3644_v2  ;;  %v3640_v7 = vand.u32 4294901760, %v3639_v9  ;;  %3409 = vmatmul.f32.gmra.mxu1 %v8242_v21 }
 0x57b   : > { %3520 = vmatmul.f32.vlgmr.msra.gmra.mxu0 %v8179_v31 }
 0x57c   : > { %3641 = vmatpush.msra.mxu3 %v3640_v7 }
 0x57d   : > { %3594 = vmatmul.f32.vlgmr.msra.gmra.mxu2 %v8214_v5 }
 0x57e   : > { %3647 = vmatpush.msra.mxu3 %v3646_v17 }
 0x57f   : > { %3649 = vmatmul.f32.vlgmr.msra.gmra.mxu3 %v8179_v31 }
 0x580   : > { %3803 = vmatpush.msrb.mxu3 %v3585_v11  ;;  %v6327_v11 = vld [vmem:[%s9904_s3 + $0x28] sm:$0xff] }
 0x582   : > { %3805 = vmatpush.msrb.mxu3 %v3587_v51  ;;  %3555 = vmatmul.f32.vlgmr.msra.gmra.mxu1 %v8179_v31 }
 0x583   : > { %3524 = vmatmul.f32.gmra.mxu0 %v8194_v33 }
 0x585   : > { %3602 = vmatmul.f32.gmra.mxu2 %v8237_v57 }
 0x587   : > { %3653 = vmatmul.f32.gmra.mxu3 %v8194_v33 }
 0x58a   : > { %3559 = vmatmul.f32.gmra.mxu1 %v8194_v33 }
 0x58b   : > { %3528 = vmatmul.f32.gmra.mxu0 %v8219_v45 }
 0x58d   : > { %3610 = vmatmul.f32.gmra.mxu2 %v3357_v47 }
 0x58f   : > { %3657 = vmatmul.f32.gmra.mxu3 %v8219_v45 }
 0x592   : > { %3563 = vmatmul.f32.gmra.mxu1 %v8219_v45 }
 0x593   : > { %3532 = vmatmul.f32.gmra.mxu0 %v8242_v21 }
 0x595   : > { %3618 = vmatmul.f32.gmra.mxu2 %v3365_v16 }
 0x597   : > { %3661 = vmatmul.f32.gmra.mxu3 %v8242_v21 }
 0x59a   : > { %3567 = vmatmul.f32.gmra.mxu1 %v8242_v21 }
 0x59b   : > { %3687 = vmatmul.f32.vlgmr.msrb.gmra.mxu0 %v8186_v46 }
 0x59d   : > { %3772 = vmatmul.f32.vlgmr.msrb.gmra.mxu2 %v8179_v31 }
 0x59f   : > { %3807 = vmatmul.f32.vlgmr.msrb.gmra.mxu3 %v8179_v31 }
 0x5a2   : > { %3727 = vmatmul.f32.vlgmr.msrb.gmra.mxu1 %v8192_v38 }
 0x5a3   : > { %3692 = vmatmul.f32.gmra.mxu0 %v8206_v62 }
 0x5a5   : > { %3776 = vmatmul.f32.gmra.mxu2 %v8194_v33 }
 0x5a7   : > { %3811 = vmatmul.f32.gmra.mxu3 %v8194_v33 }
 0x5aa   : > { %3733 = vmatmul.f32.gmra.mxu1 %v8217_v39 }
 0x5ab   : > { %3697 = vmatmul.f32.gmra.mxu0 %v8231_v61 }
 0x5ad   : > { %3780 = vmatmul.f32.gmra.mxu2 %v8219_v45 }
 0x5af   : > { %3815 = vmatmul.f32.gmra.mxu3 %v8219_v45 }
 0x5b2   : > { %3739 = vmatmul.f32.gmra.mxu1 %v8240_v14 }
 0x5b3   : > { %3702 = vmatmul.f32.gmra.mxu0 %v8249_v60 }
 0x5b5   : > { %3784 = vmatmul.f32.gmra.mxu2 %v8242_v21 }
 0x5b7   : > { %3819 = vmatmul.f32.gmra.mxu3 %v8242_v21 }
 0x5ba   : > { %3745 = vmatmul.f32.gmra.mxu1 %v8256_v30 }
 0x5d7   : > { %v3343_v31 = vpop.f32.mrf.mxu0 }
 0x5d8   : > { %v3344_v12 = vadd.f32 %v3343_v31, %v3290_v36 }
 0x5df   : > { %v8306_v46 = vpop.f32.mrf.mxu0  ;;  %v3398_v38 = vpop.f32.mrf.mxu1 }
 0x5e0   : > { %v3436_v33 = vpop.f32.mrf.mxu2  ;;  %v3476_v62 = vpop.f32.mrf.mxu3  ;;  %v3399_v61 = vadd.f32 %v3398_v38, %v3344_v12 }
 0x5e2   : > { %v3437_v18 = vadd.f32 %v3436_v33, %v3399_v61  ;;  %v8408_v61 = vld [vmem:[%s9902_s1 + $0x40] sm:$0xff] }
 0x5e4   : > { %v3477_v35 = vadd.f32 %v3476_v62, %v3437_v18 }
 0x5e7   : > { %v8308_v5 = vpop.f32.mrf.mxu0  ;;  %v8310_v39 = vpop.f32.mrf.mxu1 }
 0x5e8   : > { %10107 = vst [vmem:[#allocation23_spill] sm:$0xff] %v8308_v5  ;;  %v8312_v45 = vpop.f32.mrf.mxu2  ;;  %v8314_v26 = vpop.f32.mrf.mxu3 }
 0x5ef   : > { %v8316_v24 = vpop.f32.mrf.mxu0  ;;  %v8318_v58 = vpop.f32.mrf.mxu1 }
 0x5f0   : > { %10108 = vst [vmem:[#allocation24_spill] sm:$0xff] %v8316_v24  ;;  %v8320_v55 = vpop.f32.mrf.mxu2  ;;  %v8322_v52 = vpop.f32.mrf.mxu3 }
 0x5f1   : > { %10109 = vst [vmem:[#allocation29_spill] sm:$0xff] %v8318_v58 }
 0x5f2   : > { %10110 = vst [vmem:[#allocation30_spill] sm:$0xff] %v8320_v55 }
 0x5f3   : > { %10111 = vst [vmem:[#allocation31_spill] sm:$0xff] %v8322_v52 }
 0x5f7   : > { %v8324_v25 = vpop.f32.mrf.mxu1 }
 0x5f8   : > { %10112 = vst [vmem:[#allocation33_spill] sm:$0xff] %v8324_v25  ;;  %v3521_v44 = vpop.f32.mrf.mxu0  ;;  %v8326_v34 = vpop.f32.mrf.mxu2 }
 0x5f9   : > { %10113 = vst [vmem:[#allocation28_spill] sm:$0xff] %v8326_v34  ;;  %v8328_v59 = vpop.f32.mrf.mxu3  ;;  %v3522_v4 = vadd.f32 %v3521_v44, %v3477_v35 }
 0x5fa   : > { %10114 = vst [vmem:[#allocation32_spill] sm:$0xff] %v8328_v59 }
 0x5ff   : > { %v3556_v50 = vpop.f32.mrf.mxu1 }
 0x600   : > { %v8330_v13 = vpop.f32.mrf.mxu0  ;;  %v3557_v57 = vadd.f32 %v3556_v50, %v3522_v4  ;;  %v3595_v14 = vpop.f32.mrf.mxu2 }
 0x601   : > { %v3596_v56 = vadd.f32 %v3595_v14, %v3290_v36 }
 0x602   : > { %v3823_v21 = vmax.f32 %v3557_v57, 0.0  ;;  %v3650_v37 = vpop.f32.mrf.mxu3 }
 0x603   : > { %v3651_v63 = vadd.f32 %v3650_v37, %v3596_v56  ;;  %v8423_v37 = vld [vmem:[%s9902_s1 + $0x50] sm:$0xff] }
 0x604   : > { %3897 = vrot.lane.b32.xlu2 %v3823_v21, %s6412_s18  ;;  %3909 = vrot.lane.b32.xlu0 %v3823_v21, %s6413_s19  ;;  %v3881_v35 = vmul.f32 %v8408_v61, %v3823_v21  ;;  %10124 = vst [vmem:[#allocation7_spill] sm:$0xff] %v8423_v37 }
 0x605   : > { %3921 = vrot.lane.b32.xlu1 %v3823_v21, %s6414_s20 }
 0x606   : > { %v8416_v57 = vand.u32 4294901760, %v3881_v35 }
 0x607   : > { %v8337_v49 = vpop.f32.mrf.mxu1 }
 0x608   : > { %v8335_v15 = vpop.f32.mrf.mxu0  ;;  %v8339_v23 = vpop.f32.mrf.mxu2 }
 0x609   : > { %10115 = vst [vmem:[#allocation34_spill] sm:$0xff] %v8335_v15 }
 0x60a   : > { %v8341_v22 = vpop.f32.mrf.mxu3 }
 0x60c   : > { %3855 = vrot.lane.b32.xlu2 %v3823_v21, %s6415_s21  ;;  %3867 = vrot.lane.b32.xlu0 %v3823_v21, %s6417_s23 }
 0x60d   : > { %3885 = vrot.lane.b32.xlu1 %v3823_v21, %s6416_s22 }
 0x60f   : > { %v8346_v19 = vpop.f32.mrf.mxu1 }
 0x610   : > { %10116 = vst [vmem:[#allocation35_spill] sm:$0xff] %v8346_v19  ;;  %v8348_v60 = vpop.f32.mrf.mxu2  ;;  %v8350_v6 = vpop.f32.mrf.mxu0 }
 0x611   : > { %10117 = vst [vmem:[#allocation36_spill] sm:$0xff] %v8348_v60 }
 0x612   : > { %10118 = vst [vmem:[#allocation37_spill] sm:$0xff] %v8350_v6  ;;  %v8352_v28 = vpop.f32.mrf.mxu3 }
 0x613   : > { %10119 = vst [vmem:[#allocation38_spill] sm:$0xff] %v8352_v28 }
 0x615   : > { %3843 = vrot.lane.b32.xlu1 %v3823_v21, %s10120_s15 }
 0x617   : > { %v8355_v1 = vpop.f32.mrf.mxu1 }
 0x618   : > { %10121 = vst [vmem:[#allocation6_spill] sm:$0xff] %v8355_v1  ;;  %v8357_v40 = vpop.f32.mrf.mxu2  ;;  %v3688_v30 = vpop.f32.mrf.mxu0 }
 0x619   : > { %10122 = vst [vmem:[#allocation8_spill] sm:$0xff] %v8357_v40  ;;  %v3689_v32 = vadd.f32 %v3688_v30, %v3651_v63  ;;  %v8435_v63 = vsub.f32 %v3881_v35, %v8416_v57 }
 0x61a   : > { %v8359_v47 = vpop.f32.mrf.mxu3 }
 0x61b   : > { %10123 = vst [vmem:[#allocation9_spill] sm:$0xff] %v8359_v47 }
 0x61f   : > { %v3728_v42 = vpop.f32.mrf.mxu1 }
 0x620   : > { %v3729_v20 = vadd.f32 %v3728_v42, %v3689_v32  ;;  %v3773_v51 = vpop.f32.mrf.mxu2  ;;  %v6330_v42 = vld [vmem:[%s9905_s4 + $0x18] sm:$0xff] }
 0x622   : > { %v3774_v0 = vadd.f32 %v3773_v51, %v3729_v20  ;;  %v3808_v53 = vpop.f32.mrf.mxu3  ;;  %v8445_v51 = vld [vmem:[%s9902_s1 + $0x60] sm:$0xff] }
 0x623   : > { %10126 = vst [vmem:[#allocation16_spill] sm:$0xff] %v8445_v51 }
 0x624   : > { %v3809_v16 = vadd.f32 %v3808_v53, %v3774_v0  ;;  %v8450_v53 = vld [vmem:[%s9902_s1 + $0x70] sm:$0xff] }
 0x625   : > { %10127 = vst [vmem:[#allocation17_spill] sm:$0xff] %v8450_v53 }
 0x626   : > { %v8361_v8 = vmax.f32 %v3809_v16, 0.0  ;;  %v9956_v16 = vand.u32 4294901760, %v8435_v63 }
 0x628   : > { %3923 = vrot.lane.b32.xlu2 %v8361_v8, %s6414_s20  ;;  %3899 = vrot.lane.b32.xlu0 %v8361_v8, %s6412_s18 }
 0x629   : > { %3911 = vrot.lane.b32.xlu1 %v8361_v8, %s6413_s19 }
 0x630   : > { %3887 = vrot.lane.b32.xlu2 %v8361_v8, %s6416_s22  ;;  %3857 = vrot.lane.b32.xlu0 %v8361_v8, %s6415_s21 }
 0x631   : > { %3869 = vrot.lane.b32.xlu1 %v8361_v8, %s6417_s23 }
 0x638   : > { %3845 = vrot.lane.b32.xlu2 %v8361_v8, %s10120_s15  ;;  %3831 = vrot.lane.b32.xlu0 %v3823_v21, %s6419_s25  ;;  %v8430_v21 = vld [vmem:[%s9902_s1 + $0x88] sm:$0xff] }
 0x639   : > { %3833 = vrot.lane.b32.xlu1 %v8361_v8, %s6419_s25  ;;  %10125 = vst [vmem:[#allocation14_spill] sm:$0xff] %v8430_v21 }
 0x640   : > { %3294 = vperm.xlu2 %6381, %v6327_v11   ;;  %3957 = vperm.xlu0 %6380, %v6331_v3  }
 0x65e   : > { %v3898_v2 = vpop.permute.xlu2 %3897 }
 0x666   : > { %v8386_v43 = vpop.permute.xlu2 %3855 }
 0x676   : > { %v3910_v33 = vpop.permute.xlu0 %3909 }
 0x677   : > { %v3922_v9 = vpop.permute.xlu1 %3921 }
 0x67e   : > { %v8414_v50 = vpop.permute.xlu0 %3867 }
 0x67f   : > { %v3886_v36 = vpop.permute.xlu1 %3885 }
 0x682   : > { %v3924_v7 = vpop.permute.xlu2 %3923 }
 0x683   : > { %v3925_v17 = vsel %vm988_vm3, %v3922_v9, %v3924_v7  ;;  %v3926_v30 = vsel %vm988_vm3, %v3924_v7, %v3922_v9  ;;  %v3961_v7 = vsel %vm1022_vm4, %v6330_v42, 0  ;;  %v8476_v42 = vld [vmem:[%s9902_s1 + $0x48] sm:$0xff] }
 0x684   : > { %v3929_v31 = vmul.f32 %v8391_v29, %v3925_v17  ;;  %v3930_v20 = vmul.f32 %v8430_v21, %v3926_v30  ;;  %10129 = vst [vmem:[#allocation10_spill] sm:$0xff] %v8476_v42  ;;  %v8497_v48 = vand.u32 4294901760, %v3961_v7 }
 0x686   : > { %v8396_v38 = vand.u32 4294901760, %v3929_v31 }
 0x687   : > { %v8418_v14 = vpop.permute.xlu1 %3843 }
 0x688   : > { %v8399_v62 = vsub.f32 %v3929_v31, %v8396_v38  ;;  %3971 = vmatpush.msra.mxu0 %v8396_v38  ;;  %4111 = vmatpush.msra.mxu3 %v8396_v38 }
 0x68a   : > { %v9951_v12 = vand.u32 4294901760, %v8399_v62  ;;  %4072 = vmatpush.msra.mxu2 %v8399_v62  ;;  %v3888_v4 = vpop.permute.xlu2 %3887 }
 0x68b   : > { %v3889_v56 = vsel %vm949_vm2, %v3886_v36, %v3888_v4 }
 0x68c   : > { %v4007_v44 = vsub.f32 %v8399_v62, %v9951_v12  ;;  %v3893_v32 = vmul.f32 %v8423_v37, %v3889_v56  ;;  %v8470_v56 = vand.u32 4294901760, %v3930_v20 }
 0x68e   : > { %v4008_v18 = vand.u32 4294901760, %v4007_v44  ;;  %v8458_v17 = vand.u32 4294901760, %v3893_v32  ;;  %v8464_v44 = vld [vmem:[%s9902_s1 + $0x78] sm:$0xff]  ;;  %v8517_v40 = vsub.f32 %v3930_v20, %v8470_v56 }
 0x68f   : > { %10128 = vst [vmem:[#allocation15_spill] sm:$0xff] %v8464_v44 }
 0x690   : > { %4009 = vmatpush.msra.mxu1 %v4008_v18 }
 0x692   : > { %v8453_v11 = vpop.permute.xlu2 %3845 }
 0x693   : > { %v3848_v12 = vsel %vm904_vm6, %v8453_v11, %v8418_v14 }
 0x69a   : > { %v3900_v0 = vpop.permute.xlu0 %3899 }
 0x69b   : > { %v3901_v3 = vsel %vm962_vm5, %v3898_v2, %v3900_v0  ;;  %v3912_v9 = vpop.permute.xlu1 %3911  ;;  %v3902_v27 = vsel %vm962_vm5, %v3900_v0, %v3898_v2  ;;  %v8525_v2 = vld [vmem:[%s9902_s1 + $0x20] sm:$0xff] }
 0x69c   : > { %v3905_v31 = vmul.f32 %v8445_v51, %v3901_v3  ;;  %v3913_v18 = vsel %vm975_vm1, %v3910_v33, %v3912_v9  ;;  %v3914_v35 = vsel %vm975_vm1, %v3912_v9, %v3910_v33  ;;  %v8481_v3 = vld [vmem:[%s9902_s1 + $0x10] sm:$0xff]  ;;  %v8492_v9 = vsub.f32 %v8435_v63, %v9956_v16  ;;  %10132 = vst [vmem:[#allocation11_spill] sm:$0xff] %v8525_v2 }
 0x69d   : > { %v3917_v30 = vmul.f32 %v8450_v53, %v3913_v18  ;;  %10130 = vst [vmem:[#allocation12_spill] sm:$0xff] %v8481_v3  ;;  %v3918_v18 = vmul.f32 %v8464_v44, %v3914_v35  ;;  %v8510_v16 = vsub.f32 %v3893_v32, %v8458_v17  ;;  %v8514_v35 = vmul.f32 %v8476_v42, %v8361_v8  ;;  %v8530_v32 = vld [vmem:[%s9902_s1 + $0x58] sm:$0xff]  ;;  %v8663_v44 = vld [vmem:[%s9902_s1 + $0x8] sm:$0xff] }
 0x69e   : > { %v8487_v33 = vand.u32 4294901760, %v3905_v31  ;;  %v3851_v1 = vmul.f32 %v8481_v3, %v3848_v12  ;;  %10133 = vst [vmem:[#allocation18_spill] sm:$0xff] %v8530_v32  ;;  %v3890_v8 = vsel %vm949_vm2, %v3888_v4, %v3886_v36  ;;  %v3906_v6 = vmul.f32 %v8502_v41, %v3902_v27  ;;  %v8549_v36 = vld [vmem:[%s9902_s1 + $0x30] sm:$0xff] }
 0x69f   : > { %v8495_v10 = vand.u32 4294901760, %v3917_v30  ;;  %v8540_v59 = vand.u32 4294901760, %v3918_v18  ;;  %10134 = vst [vmem:[#allocation20_spill] sm:$0xff] %v8549_v36  ;;  %v8560_v25 = vand.u32 4294901760, %v8514_v35  ;;  %v3894_v28 = vmul.f32 %v8530_v32, %v3890_v8  ;;  %v8629_v32 = vld [vmem:[%s9902_s1] sm:$0xff] }
 0x6a0   : > { %v8507_v47 = vsub.f32 %v3905_v31, %v8487_v33  ;;  %v8564_v60 = vand.u32 4294901760, %v3851_v1  ;;  %v8581_v15 = vand.u32 4294901760, %v3906_v6  ;;  %v10138_v58 = vand.u32 4294901760, %v8510_v16  ;;  %10141 = vst [vmem:[#allocation39_spill] sm:$0xff] %v8629_v32 }
 0x6a1   : > { %3973 = vmatpush.msra.mxu0 %v8495_v10  ;;  %4113 = vmatpush.msra.mxu3 %v8495_v10  ;;  %v8535_v12 = vsub.f32 %v3917_v30, %v8495_v10  ;;  %v8552_v30 = vsub.f32 %v3961_v7, %v8497_v48  ;;  %v8584_v52 = vsub.f32 %v3918_v18, %v8540_v59 }
 0x6a2   : > { %v3858_v20 = vpop.permute.xlu0 %3857  ;;  %v10136_v0 = vand.u32 4294901760, %v8507_v47  ;;  %v4025_v5 = vsub.f32 %v8510_v16, %v10138_v58  ;;  %10143 = vst [vmem:[#allocation41_spill] sm:$0xff] %v8663_v44  ;;  %v8698_v21 = vsub.f32 %v8514_v35, %v8560_v25 }
 0x6a3   : > { %v3860_v34 = vsel %vm917_vm8, %v3858_v20, %v8386_v43  ;;  %3975 = vmatpush.msra.mxu0 %v8487_v33  ;;  %v3870_v4 = vpop.permute.xlu1 %3869  ;;  %4075 = vmatpush.msra.mxu2 %v8535_v12  ;;  %v10135_v24 = vand.u32 4294901760, %v8535_v12  ;;  %v3859_v42 = vsel %vm917_vm8, %v8386_v43, %v3858_v20  ;;  %v10151_v37 = vand.u32 4294901760, %v8535_v12 }
 0x6a4   : > { %v3863_v31 = vmul.f32 %v8525_v2, %v3860_v34  ;;  %4115 = vmatpush.msra.mxu3 %v8487_v33  ;;  %v3872_v34 = vsel %vm930_vm7, %v3870_v4, %v8414_v50  ;;  %v4019_v19 = vsub.f32 %v8507_v47, %v10136_v0  ;;  %v3871_v55 = vsel %vm930_vm7, %v8414_v50, %v3870_v4  ;;  %v8613_v4 = vld [vmem:[%s9902_s1 + $0x28] sm:$0xff] }
 0x6a5   : > { %3977 = vmatpush.msra.mxu0 %v8458_v17  ;;  %v3875_v27 = vmul.f32 %v8549_v36, %v3872_v34  ;;  %4078 = vmatpush.msra.mxu2 %v8507_v47  ;;  %v4013_v8 = vsub.f32 %v8535_v12, %v10135_v24  ;;  %v8589_v34 = vld [vmem:[%s9902_s1 + $0x38] sm:$0xff]  ;;  %v8596_v24 = vand.u32 4294901760, %v8552_v30  ;;  %v8608_v50 = vand.u32 4294901760, %v3894_v28  ;;  %10139 = vst [vmem:[#allocation19_spill] sm:$0xff] %v8613_v4 }
 0x6a6   : > { %v8570_v7 = vand.u32 4294901760, %v3863_v31  ;;  %4117 = vmatpush.msra.mxu3 %v8458_v17  ;;  %10137 = vst [vmem:[#allocation21_spill] sm:$0xff] %v8589_v34  ;;  %v10140_v2 = vand.u32 4294901760, %v8517_v40  ;;  %v4020_v3 = vand.u32 4294901760, %v4019_v19  ;;  %v8645_v19 = vsub.f32 %v3906_v6, %v8581_v15 }
 0x6a7   : > { %3979 = vmatpush.msra.mxu0 %v8416_v57  ;;  %v8598_v0 = vand.u32 4294901760, %v3875_v27  ;;  %4081 = vmatpush.msra.mxu2 %v8510_v16  ;;  %v4014_v18 = vand.u32 4294901760, %v4013_v8  ;;  %v8619_v8 = vsub.f32 %v3851_v1, %v8564_v60  ;;  %v3864_v1 = vmul.f32 %v8613_v4, %v3859_v42 }
 0x6a8   : > { %4119 = vmatpush.msra.mxu3 %v8416_v57  ;;  %v8606_v36 = vsub.f32 %v3863_v31, %v8570_v7  ;;  %v4257_v58 = vsub.f32 %v8517_v40, %v10140_v2  ;;  %v3876_v31 = vmul.f32 %v8589_v34, %v3871_v55  ;;  %v8638_v2 = vld [vmem:[%s9902_s1 + $0x18] sm:$0xff]  ;;  %v3847_v55 = vsel %vm904_vm6, %v8418_v14, %v8453_v11 }
 0x6a9   : > { %3981 = vmatpush.msra.mxu0 %v8598_v0  ;;  %4015 = vmatpush.msra.mxu1 %v4014_v18  ;;  %v8632_v43 = vsub.f32 %v3875_v27, %v8598_v0  ;;  %10142 = vst [vmem:[#allocation40_spill] sm:$0xff] %v8638_v2  ;;  %v3991_v27 = vsub.f32 %v8552_v30, %v8596_v24  ;;  %v4026_v6 = vand.u32 4294901760, %v4025_v5  ;;  %v10145_v5 = vand.u32 4294901760, %v8584_v52 }
 0x6aa   : > { %v3832_v41 = vpop.permute.xlu0 %3831  ;;  %4084 = vmatpush.msra.mxu2 %v8435_v63  ;;  %4121 = vmatpush.msra.mxu3 %v8598_v0  ;;  %v8658_v11 = vsub.f32 %v3894_v28, %v8608_v50  ;;  %v3852_v18 = vmul.f32 %v8638_v2, %v3847_v55  ;;  %v8672_v28 = vand.u32 4294901760, %v3876_v31  ;;  %v10147_v2 = vand.u32 4294901760, %v8619_v8 }
 0x6ab   : > { %v3834_v20 = vpop.permute.xlu1 %3833  ;;  %4021 = vmatpush.msra.mxu1 %v4020_v3  ;;  %3983 = vmatpush.msra.mxu0 %v8570_v7  ;;  %v9968_v14 = vand.u32 4294901760, %v8632_v43  ;;  %v8685_v55 = vand.u32 4294901760, %v3991_v27  ;;  %v4258_v27 = vand.u32 4294901760, %v4257_v58 }
 0x6ac   : > { %v3836_v34 = vsel %vm891_vm9, %v3834_v20, %v3832_v41  ;;  %v3835_v42 = vsel %vm891_vm9, %v3832_v41, %v3834_v20  ;;  %4087 = vmatpush.msra.mxu2 %v8632_v43  ;;  %4123 = vmatpush.msra.mxu3 %v8570_v7  ;;  %v10144_v41 = vand.u32 4294901760, %v8606_v36 }
 0x6ad   : > { %v3839_v3 = vmul.f32 %v8629_v32, %v3836_v34  ;;  %3985 = vmatpush.msra.mxu0 %v8564_v60  ;;  %4027 = vmatpush.msra.mxu1 %v4026_v6  ;;  %v4037_v4 = vsub.f32 %v8632_v43, %v9968_v14  ;;  %v4263_v6 = vsub.f32 %v8584_v52, %v10145_v5  ;;  %v8691_v32 = vand.u32 4294901760, %v3864_v1 }
 0x6ae   : > { %v4043_v34 = vsub.f32 %v8606_v36, %v10144_v41  ;;  %4090 = vmatpush.msra.mxu2 %v8606_v36  ;;  %4125 = vmatpush.msra.mxu3 %v8564_v60  ;;  %v3840_v14 = vmul.f32 %v8663_v44, %v3835_v42  ;;  %v10146_v41 = vand.u32 4294901760, %v8492_v9  ;;  %v4049_v42 = vsub.f32 %v8619_v8, %v10147_v2 }
 0x6af   : > { %v8681_v20 = vand.u32 4294901760, %v3839_v3  ;;  %v4038_v53 = vand.u32 4294901760, %v4037_v4  ;;  %v8712_v4 = vsub.f32 %v3876_v31, %v8672_v28  ;;  %v4264_v58 = vand.u32 4294901760, %v4263_v6 }
 0x6b0   : > { %4033 = vmatpush.msra.mxu1 %v10146_v41  ;;  %4093 = vmatpush.msra.mxu2 %v8619_v8  ;;  %v8709_v41 = vand.u32 4294901760, %v3852_v18  ;;  %v4044_v35 = vand.u32 4294901760, %v4043_v34  ;;  %v8721_v9 = vsub.f32 %v3864_v1, %v8691_v32  ;;  %v8723_v51 = vand.u32 4294901760, %v3840_v14 }
 0x6b1   : > { %3987 = vmatpush.msra.mxu0 %v8681_v20  ;;  %v8703_v5 = vsub.f32 %v3839_v3, %v8681_v20  ;;  %4127 = vmatpush.msra.mxu3 %v8681_v20  ;;  %v10148_v3 = vand.u32 4294901760, %v8645_v19  ;;  %v4280_v31 = vand.u32 4294901760, %v8698_v21  ;;  %v4050_v34 = vand.u32 4294901760, %v4049_v42 }
 0x6b2   : > { %4039 = vmatpush.msra.mxu1 %v4038_v53  ;;  %3993 = vmatmul.f32.vlgmr.msra.gmra.mxu0 %v8685_v55  ;;  %v10149_v53 = vand.u32 4294901760, %v8399_v62  ;;  %v10150_v6 = vand.u32 4294901760, %v8658_v11  ;;  %v8734_v1 = vsub.f32 %v3852_v18, %v8709_v41  ;;  %v4286_v62 = vand.u32 4294901760, %v8712_v4 }
 0x6b3   : > { %4259 = vmatpush.msrb.mxu3 %v4258_v27  ;;  %v4269_v44 = vsub.f32 %v8645_v19, %v10148_v3  ;;  %v4054_v2 = vand.u32 4294901760, %v8703_v5  ;;  %4096 = vmatpush.msra.mxu2 %v8703_v5  ;;  %v4292_v12 = vand.u32 4294901760, %v8721_v9 }
 0x6b4   : > { %4145 = vmatpush.msrb.mxu0 %v10149_v53  ;;  %4045 = vmatpush.msra.mxu1 %v4044_v35  ;;  %v4275_v27 = vsub.f32 %v8658_v11, %v10150_v6  ;;  %v10154_v53 = vand.u32 4294901760, %v8435_v63 }
 0x6b5   : > { %4265 = vmatpush.msrb.mxu3 %v4264_v58  ;;  %v4055_v3 = vsub.f32 %v8703_v5, %v4054_v2  ;;  %4221 = vmatpush.msrb.mxu2 %v8470_v56  ;;  %v4270_v42 = vand.u32 4294901760, %v4269_v44  ;;  %v8742_v58 = vsub.f32 %v3840_v14, %v8723_v51  ;;  %v10152_v5 = vand.u32 4294901760, %v8507_v47 }
 0x6b6   : > { %4149 = vmatpush.msrb.mxu0 %v10151_v37  ;;  %4051 = vmatpush.msra.mxu1 %v4050_v34  ;;  %v4281_v37 = vsub.f32 %v8698_v21, %v4280_v31  ;;  %v4276_v18 = vand.u32 4294901760, %v4275_v27  ;;  %v10153_v44 = vand.u32 4294901760, %v8510_v16  ;;  %v4287_v47 = vsub.f32 %v8712_v4, %v4286_v62 }
 0x6b7   : > { %4099 = vmatmul.f32.vlgmr.msra.gmra.mxu2 %v8552_v30  ;;  %v4056_v35 = vand.u32 4294901760, %v4055_v3  ;;  %4271 = vmatpush.msrb.mxu3 %v4270_v42  ;;  %v4298_v14 = vand.u32 4294901760, %v8734_v1  ;;  %v4293_v16 = vsub.f32 %v8721_v9, %v4292_v12  ;;  %v4304_v6 = vand.u32 4294901760, %v8742_v58 }
 0x6b8   : > { %4153 = vmatpush.msrb.mxu0 %v10152_v5  ;;  %4223 = vmatpush.msrb.mxu2 %v8540_v59  ;;  %v4282_v34 = vand.u32 4294901760, %v4281_v37  ;;  %v10155_v27 = vand.u32 4294901760, %v8632_v43  ;;  %v4288_v3 = vand.u32 4294901760, %v4287_v47  ;;  %v10156_v42 = vand.u32 4294901760, %v8606_v36 }
 0x6b9   : > { %4057 = vmatpush.msra.mxu1 %v4056_v35  ;;  %4131 = vmatmul.f32.vlgmr.msra.gmra.mxu3 %v8596_v24  ;;  %v4299_v63 = vsub.f32 %v8734_v1, %v4298_v14  ;;  %v4305_v35 = vsub.f32 %v8742_v58, %v4304_v6  ;;  %v10157_v43 = vand.u32 4294901760, %v8619_v8 }
 0x6ba   : > { %4157 = vmatpush.msrb.mxu0 %v10153_v44  ;;  %4225 = vmatpush.msrb.mxu2 %v8581_v15 }
 0x6bb   : > { %4277 = vmatpush.msrb.mxu3 %v4276_v18  ;;  %4059 = vmatmul.f32.vlgmr.msra.gmra.mxu1 %v8497_v48  ;;  %v4306_v36 = vand.u32 4294901760, %v4305_v35 }
 0x6bc   : > { %4161 = vmatpush.msrb.mxu0 %v10154_v53  ;;  %4191 = vmatpush.msrb.mxu1 %v8396_v38  ;;  %v4294_v38 = vand.u32 4294901760, %v4293_v16 }
 0x6bd   : > { %4227 = vmatpush.msrb.mxu2 %v8608_v50  ;;  %4283 = vmatpush.msrb.mxu3 %v4282_v34 }
 0x6be   : > { %4165 = vmatpush.msrb.mxu0 %v10155_v27  ;;  %4193 = vmatpush.msrb.mxu1 %v8495_v10  ;;  %v4300_v10 = vand.u32 4294901760, %v4299_v63 }
 0x6bf   : > { %4229 = vmatpush.msrb.mxu2 %v8560_v25  ;;  %4289 = vmatpush.msrb.mxu3 %v4288_v3 }
 0x6c0   : > { %4169 = vmatpush.msrb.mxu0 %v10156_v42  ;;  %4195 = vmatpush.msrb.mxu1 %v8487_v33 }
 0x6c1   : > { %4231 = vmatpush.msrb.mxu2 %v8672_v28  ;;  %4295 = vmatpush.msrb.mxu3 %v4294_v38 }
 0x6c2   : > { %4173 = vmatpush.msrb.mxu0 %v10157_v43  ;;  %4197 = vmatpush.msrb.mxu1 %v8458_v17  ;;  %v10158_v17 = vand.u32 4294901760, %v8517_v40 }
 0x6c3   : > { %4233 = vmatpush.msrb.mxu2 %v8691_v32  ;;  %4301 = vmatpush.msrb.mxu3 %v4300_v10 }
 0x6c4   : > { %4177 = vmatpush.msrb.mxu0 %v4054_v2  ;;  %4199 = vmatpush.msrb.mxu1 %v8416_v57  ;;  %v10159_v57 = vand.u32 4294901760, %v8584_v52 }
 0x6c5   : > { %4235 = vmatpush.msrb.mxu2 %v8709_v41  ;;  %4307 = vmatpush.msrb.mxu3 %v4306_v36  ;;  %v6328_v36 = vld [vmem:[%s9904_s3 + $0x30] sm:$0xff] }
 0x6c6   : > { %4179 = vmatmul.f32.vlgmr.msrb.gmra.mxu0 %v8497_v48  ;;  %4201 = vmatpush.msrb.mxu1 %v8598_v0 }
 0x6c7   : > { %4322 = vmatpush.msra.mxu0 %v8517_v40  ;;  %4441 = vmatpush.msra.mxu3 %v8470_v56  ;;  %v10160_v40 = vand.u32 4294901760, %v8645_v19 }
 0x6c8   : > { %4237 = vmatpush.msrb.mxu2 %v8723_v51  ;;  %4203 = vmatpush.msrb.mxu1 %v8570_v7 }
 0x6c9   : > { %4243 = vmatmul.f32.vlgmr.msrb.gmra.mxu2 %v8685_v55  ;;  %4325 = vmatpush.msra.mxu0 %v8584_v52  ;;  %v10161_v52 = vand.u32 4294901760, %v8658_v11 }
 0x6ca   : > { %4395 = vmatpush.msra.mxu2 %v10158_v17  ;;  %4443 = vmatpush.msra.mxu3 %v8540_v59  ;;  %v6333_v17 = vld [vmem:[%s9906_s5 + $0x20] sm:$0xff] }
 0x6cb   : > { %4309 = vmatmul.f32.vlgmr.msrb.gmra.mxu3 %v8497_v48  ;;  %4328 = vmatpush.msra.mxu0 %v8645_v19  ;;  %v3958_v19 = vpop.permute.xlu0 %3957 }
 0x6cc   : > { %4399 = vmatpush.msra.mxu2 %v10159_v57  ;;  %4445 = vmatpush.msra.mxu3 %v8581_v15 }
 0x6cd   : > { %4205 = vmatpush.msrb.mxu1 %v8564_v60  ;;  %4331 = vmatpush.msra.mxu0 %v8658_v11 }
 0x6ce   : > { %4403 = vmatpush.msra.mxu2 %v10160_v40  ;;  %4447 = vmatpush.msra.mxu3 %v8608_v50 }
 0x6cf   : > { %4207 = vmatpush.msrb.mxu1 %v8681_v20  ;;  %4334 = vmatpush.msra.mxu0 %v8698_v21  ;;  %v3812_v21 = vpop.f32.mrf.mxu3 }
 0x6d0   : > { %4209 = vmatmul.f32.vlgmr.msrb.gmra.mxu1 %v8497_v48  ;;  %4407 = vmatpush.msra.mxu2 %v10161_v52 }
 0x6d1   : > { %4361 = vmatpush.msra.mxu1 %v8470_v56  ;;  %4449 = vmatpush.msra.mxu3 %v8560_v25 }
 0x6d2   : > { %4337 = vmatpush.msra.mxu0 %v8712_v4  ;;  %4411 = vmatpush.msra.mxu2 %v4280_v31 }
 0x6d3   : > { %4363 = vmatpush.msra.mxu1 %v8540_v59  ;;  %4451 = vmatpush.msra.mxu3 %v8672_v28  ;;  %v3734_v59 = vpop.f32.mrf.mxu1 }
 0x6d4   : > { %4340 = vmatpush.msra.mxu0 %v8721_v9  ;;  %4415 = vmatpush.msra.mxu2 %v4286_v62 }
 0x6d5   : > { %4365 = vmatpush.msra.mxu1 %v8581_v15  ;;  %4453 = vmatpush.msra.mxu3 %v8691_v32  ;;  %v3777_v15 = vpop.f32.mrf.mxu2 }
 0x6d6   : > { %4343 = vmatpush.msra.mxu0 %v8734_v1  ;;  %4419 = vmatpush.msra.mxu2 %v4292_v12 }
 0x6d7   : > { %4367 = vmatpush.msra.mxu1 %v8608_v50  ;;  %4455 = vmatpush.msra.mxu3 %v8709_v41 }
 0x6d8   : > { %4346 = vmatpush.msra.mxu0 %v8742_v58  ;;  %4423 = vmatpush.msra.mxu2 %v4298_v14 }
 0x6d9   : > { %4369 = vmatpush.msra.mxu1 %v8560_v25  ;;  %4457 = vmatpush.msra.mxu3 %v8723_v51  ;;  %v3693_v25 = vpop.f32.mrf.mxu0 }
 0x6da   : > { %4349 = vmatmul.f32.vlgmr.msra.gmra.mxu0 %v8552_v30  ;;  %4427 = vmatpush.msra.mxu2 %v4304_v6 }
 0x6db   : > { %4371 = vmatpush.msra.mxu1 %v8672_v28  ;;  %4429 = vmatmul.f32.vlgmr.msra.gmra.mxu2 %v8497_v48  ;;  %v8848_v56 = vpop.f32.mrf.mxu1 }
 0x6dc   : > { %4459 = vmatmul.f32.vlgmr.msra.gmra.mxu3 %v8497_v48  ;;  %v8854_v48 = vpop.f32.mrf.mxu3 }
 0x6dd   : > { %4373 = vmatpush.msra.mxu1 %v8691_v32  ;;  %v8850_v33 = vpop.f32.mrf.mxu2  ;;  %v3295_v32 = vpop.permute.xlu2 %3294 }
 0x6de   : > { %v3604_v5 = vadd.f32 %v8339_v23, %v3295_v32 }
 0x6df   : > { %4375 = vmatpush.msra.mxu1 %v8709_v41 }
 0x6e0   : > { %v3655_v18 = vadd.f32 %v8341_v22, %v3604_v5 }
 0x6e1   : > { %4377 = vmatpush.msra.mxu1 %v8723_v51  ;;  %v8846_v60 = vpop.f32.mrf.mxu0  ;;  %v3352_v51 = vadd.f32 %v8306_v46, %v3295_v32 }
 0x6e2   : > { %4381 = vmatmul.f32.vlgmr.msra.gmra.mxu1 %v8596_v24  ;;  %v3694_v44 = vadd.f32 %v3693_v25, %v3655_v18 }
 0x6e3   : > { %v8856_v7 = vpop.f32.mrf.mxu1  ;;  %v3403_v0 = vadd.f32 %v8310_v39, %v3352_v51 }
 0x6e4   : > { %v8862_v8 = vpop.f32.mrf.mxu3  ;;  %v3735_v14 = vadd.f32 %v3734_v59, %v3694_v44 }
 0x6e5   : > { %v8859_v24 = vpop.f32.mrf.mxu2  ;;  %v3442_v28 = vadd.f32 %v8312_v45, %v3403_v0 }
 0x6e6   : > { %v3778_v22 = vadd.f32 %v3777_v15, %v3735_v14 }
 0x6e7   : > { %v3483_v41 = vadd.f32 %v8314_v26, %v3442_v28 }
 0x6e8   : > { %v3813_v63 = vadd.f32 %v3812_v21, %v3778_v22 }
 0x6e9   : > { %v8852_v30 = vpop.f32.mrf.mxu0  ;;  %v3526_v46 = vadd.f32 %v8330_v13, %v3483_v41 }
 0x6ea   : > { %v3826_v35 = vmax.f32 %v3813_v63, 0.0 }
 0x6eb   : > { %v3561_v39 = vadd.f32 %v8337_v49, %v3526_v46 }
 0x6ed   : > { %v3825_v12 = vmax.f32 %v3561_v39, 0.0 }
 0x72f   : > { %v3994_v50 = vpop.f32.mrf.mxu0 }
 0x730   : > { %v3995_v20 = vadd.f32 %v3994_v50, %v3958_v19 }
 0x738   : > { %v4060_v11 = vpop.f32.mrf.mxu1 }
 0x739   : > { %v4061_v55 = vadd.f32 %v4060_v11, %v3995_v20 }
 0x73a   : > { %v4100_v9 = vpop.f32.mrf.mxu2 }
 0x73b   : > { %v4101_v4 = vadd.f32 %v4100_v9, %v4061_v55 }
 0x73c   : > { %v4132_v2 = vpop.f32.mrf.mxu3 }
 0x73d   : > { %v4133_v1 = vadd.f32 %v4132_v2, %v4101_v4  ;;  %v6332_v4 = vld [vmem:[%s9905_s4 + $0x20] sm:$0xff]  ;;  %v10162_v2 = vld [vmem:[#allocation7_spill] sm:$0xff] }
 0x743   : > { %v4180_v31 = vpop.f32.mrf.mxu0 }
 0x744   : > { %v4181_v62 = vadd.f32 %v4180_v31, %v4133_v1 }
 0x74c   : > { %v4244_v13 = vpop.f32.mrf.mxu2 }
 0x74d   : > { %v4210_v58 = vpop.f32.mrf.mxu1  ;;  %v4245_v49 = vadd.f32 %v4244_v13, %v3958_v19 }
 0x74e   : > { %v4211_v37 = vadd.f32 %v4210_v58, %v4181_v62  ;;  %v4310_v47 = vpop.f32.mrf.mxu3  ;;  %v10163_v58 = vld [vmem:[#allocation16_spill] sm:$0xff] }
 0x74f   : > { %v4311_v53 = vadd.f32 %v4310_v47, %v4245_v49  ;;  %v10164_v49 = vld [vmem:[#allocation14_spill] sm:$0xff] }
 0x750   : > { %v8869_v45 = vmax.f32 %v4211_v37, 0.0 }
 0x752   : > { %v4467_v26 = vadd.f32 %v8869_v45, %v3825_v12 }
 0x754   : > { %4535 = vrot.lane.b32.xlu2 %v4467_v26, %s6412_s18  ;;  %4547 = vrot.lane.b32.xlu0 %v4467_v26, %s6413_s19  ;;  %v4519_v28 = vmul.f32 %v4467_v26, %v8408_v61  ;;  %v4599_v61 = vsel %vm1022_vm4, %v6332_v4, 0 }
 0x755   : > { %4559 = vrot.lane.b32.xlu1 %v4467_v26, %s6414_s20  ;;  %v8947_v12 = vand.u32 4294901760, %v4599_v61 }
 0x756   : > { %v8930_v9 = vand.u32 4294901760, %v4519_v28 }
 0x757   : > { %v4350_v23 = vpop.f32.mrf.mxu0  ;;  %v8976_v63 = vsub.f32 %v4599_v61, %v8947_v12 }
 0x758   : > { %v4351_v34 = vadd.f32 %v4350_v23, %v4311_v53  ;;  %v8939_v1 = vsub.f32 %v4519_v28, %v8930_v9  ;;  %v10165_v53 = vld [vmem:[#allocation17_spill] sm:$0xff] }
 0x75a   : > { %v9974_v44 = vand.u32 4294901760, %v8939_v1 }
 0x75c   : > { %4493 = vrot.lane.b32.xlu2 %v4467_v26, %s6415_s21  ;;  %4505 = vrot.lane.b32.xlu0 %v4467_v26, %s6417_s23 }
 0x75d   : > { %4523 = vrot.lane.b32.xlu1 %v4467_v26, %s6416_s22 }
 0x75e   : > { %v4430_v6 = vpop.f32.mrf.mxu2 }
 0x75f   : > { %v4382_v16 = vpop.f32.mrf.mxu1  ;;  %v4460_v3 = vpop.f32.mrf.mxu3 }
 0x760   : > { %v4383_v27 = vadd.f32 %v4382_v16, %v4351_v34 }
 0x762   : > { %v4431_v42 = vadd.f32 %v4430_v6, %v4383_v27 }
 0x764   : > { %v4461_v38 = vadd.f32 %v4460_v3, %v4431_v42  ;;  %v10166_v42 = vld [vmem:[#allocation15_spill] sm:$0xff] }
 0x765   : > { %4481 = vrot.lane.b32.xlu1 %v4467_v26, %s10120_s15 }
 0x766   : > { %v8880_v43 = vmax.f32 %v4461_v38, 0.0 }
 0x768   : > { %v8883_v10 = vadd.f32 %v8880_v43, %v3826_v35 }
 0x76a   : > { %4561 = vrot.lane.b32.xlu2 %v8883_v10, %s6414_s20  ;;  %4537 = vrot.lane.b32.xlu0 %v8883_v10, %s6412_s18 }
 0x76d   : > { %4549 = vrot.lane.b32.xlu1 %v8883_v10, %s6413_s19 }
 0x772   : > { %4525 = vrot.lane.b32.xlu2 %v8883_v10, %s6416_s22  ;;  %4495 = vrot.lane.b32.xlu0 %v8883_v10, %s6415_s21 }
 0x775   : > { %4507 = vrot.lane.b32.xlu1 %v8883_v10, %s6417_s23 }
 0x77a   : > { %4483 = vrot.lane.b32.xlu2 %v8883_v10, %s10120_s15  ;;  %4469 = vrot.lane.b32.xlu0 %v4467_v26, %s6419_s25 }
 0x77d   : > { %4471 = vrot.lane.b32.xlu1 %v8883_v10, %s6419_s25 }
 0x782   : > { %3299 = vperm.xlu2 %6381, %v6328_v36   ;;  %4595 = vperm.xlu0 %6380, %v6333_v17   ;;  %v8985_v17 = vsub.f32 %v8939_v1, %v9974_v44 }
 0x7ae   : > { %v4536_v57 = vpop.permute.xlu2 %4535 }
 0x7b6   : > { %v8908_v40 = vpop.permute.xlu2 %4493 }
 0x7c4   : > { %v4562_v52 = vpop.permute.xlu2 %4561 }
 0x7c6   : > { %v4548_v21 = vpop.permute.xlu0 %4547 }
 0x7c7   : > { %v4560_v25 = vpop.permute.xlu1 %4559 }
 0x7c8   : > { %v4563_v59 = vsel %vm988_vm3, %v4560_v25, %v4562_v52  ;;  %v4564_v39 = vsel %vm988_vm3, %v4562_v52, %v4560_v25  ;;  %v10167_v25 = vld [vmem:[#allocation18_spill] sm:$0xff] }
 0x7c9   : > { %v4567_v15 = vmul.f32 %v4563_v59, %v8391_v29  ;;  %v4568_v47 = vmul.f32 %v4564_v39, %v10164_v49  ;;  %v10168_v59 = vld [vmem:[#allocation12_spill] sm:$0xff]  ;;  %v4670_v49 = vand.u32 4294901760, %v8985_v17 }
 0x7cb   : > { %v8913_v32 = vand.u32 4294901760, %v4567_v15  ;;  %v8987_v52 = vand.u32 4294901760, %v4568_v47 }
 0x7cc   : > { %v4526_v20 = vpop.permute.xlu2 %4525 }
 0x7cd   : > { %v8916_v51 = vsub.f32 %v4567_v15, %v8913_v32  ;;  %4609 = vmatpush.msrb.mxu0 %v8913_v32  ;;  %4749 = vmatpush.msrb.mxu3 %v8913_v32 }
 0x7ce   : > { %v8925_v11 = vpop.permute.xlu0 %4505 }
 0x7cf   : > { %v9978_v0 = vand.u32 4294901760, %v8916_v51  ;;  %4710 = vmatpush.msrb.mxu2 %v8916_v51  ;;  %v4524_v50 = vpop.permute.xlu1 %4523 }
 0x7d0   : > { %v4527_v41 = vsel %vm949_vm2, %v4524_v50, %v4526_v20  ;;  %v4528_v34 = vsel %vm949_vm2, %v4526_v20, %v4524_v50  ;;  %v10169_v50 = vld [vmem:[#allocation13_spill] sm:$0xff] }
 0x7d1   : > { %v4645_v19 = vsub.f32 %v8916_v51, %v9978_v0  ;;  %v4531_v46 = vmul.f32 %v4527_v41, %v10162_v2  ;;  %v9004_v2 = vand.u32 4294901760, %v8976_v63 }
 0x7d3   : > { %v4646_v29 = vand.u32 4294901760, %v4645_v19  ;;  %v8949_v18 = vand.u32 4294901760, %v4531_v46 }
 0x7d4   : > { %v8957_v14 = vpop.permute.xlu2 %4483 }
 0x7d5   : > { %4647 = vmatpush.msrb.mxu1 %v4646_v29  ;;  %v8980_v36 = vsub.f32 %v4531_v46, %v8949_v18  ;;  %v10170_v29 = vld [vmem:[#allocation11_spill] sm:$0xff]  ;;  %v10171_v46 = vld [vmem:[#allocation10_spill] sm:$0xff] }
 0x7d7   : > { %v8928_v55 = vpop.permute.xlu1 %4481 }
 0x7d8   : > { %v4486_v16 = vsel %vm904_vm6, %v8957_v14, %v8928_v55 }
 0x7d9   : > { %v4489_v15 = vmul.f32 %v4486_v16, %v10168_v59  ;;  %v4629_v59 = vsub.f32 %v8976_v63, %v9004_v2 }
 0x7dc   : > { %v4538_v31 = vpop.permute.xlu0 %4537 }
 0x7dd   : > { %v4539_v62 = vsel %vm962_vm5, %v4536_v57, %v4538_v31  ;;  %v4540_v27 = vsel %vm962_vm5, %v4538_v31, %v4536_v57  ;;  %v4532_v57 = vmul.f32 %v4528_v34, %v10167_v25  ;;  %v9008_v31 = vmul.f32 %v8883_v10, %v10171_v46 }
 0x7de   : > { %v4543_v5 = vmul.f32 %v4539_v62, %v10163_v58  ;;  %v4544_v19 = vmul.f32 %v4540_v27, %v10169_v50  ;;  %v9975_v58 = vand.u32 4294901760, %v8980_v36 }
 0x7df   : > { %v4550_v37 = vpop.permute.xlu1 %4549 }
 0x7e0   : > { %v8951_v26 = vand.u32 4294901760, %v4543_v5  ;;  %v4551_v13 = vsel %vm975_vm1, %v4548_v21, %v4550_v37  ;;  %v4552_v23 = vsel %vm975_vm1, %v4550_v37, %v4548_v21  ;;  %v10172_v37 = vld [vmem:[#allocation20_spill] sm:$0xff] }
 0x7e1   : > { %v4555_v22 = vmul.f32 %v4551_v13, %v10165_v53  ;;  %v4556_v38 = vmul.f32 %v4552_v23, %v10166_v42  ;;  %v9027_v23 = vsub.f32 %v4568_v47, %v8987_v52  ;;  %v9029_v53 = vand.u32 4294901760, %v4532_v57 }
 0x7e2   : > { %v8969_v6 = vsub.f32 %v4543_v5, %v8951_v26  ;;  %v9020_v5 = vand.u32 4294901760, %v4489_v15 }
 0x7e3   : > { %v8973_v3 = vand.u32 4294901760, %v4555_v22  ;;  %v9010_v61 = vand.u32 4294901760, %v4556_v38  ;;  %v9075_v46 = vsub.f32 %v4532_v57, %v9029_v53 }
 0x7e4   : > { %v4496_v35 = vpop.permute.xlu0 %4495  ;;  %v9976_v41 = vand.u32 4294901760, %v8969_v6 }
 0x7e5   : > { %v4498_v21 = vsel %vm917_vm8, %v4496_v35, %v8908_v40  ;;  %4611 = vmatpush.msrb.mxu0 %v8973_v3  ;;  %4751 = vmatpush.msrb.mxu3 %v8973_v3  ;;  %v8999_v20 = vsub.f32 %v4555_v22, %v8973_v3  ;;  %v9031_v22 = vand.u32 4294901760, %v4544_v19  ;;  %v9051_v25 = vsub.f32 %v4556_v38, %v9010_v61 }
 0x7e6   : > { %v4501_v28 = vmul.f32 %v4498_v21, %v10170_v29  ;;  %v4657_v34 = vsub.f32 %v8969_v6, %v9976_v41  ;;  %v9061_v21 = vand.u32 4294901760, %v9008_v31  ;;  %v4497_v50 = vsel %vm917_vm8, %v8908_v40, %v4496_v35  ;;  %v10173_v40 = vld [vmem:[#allocation21_spill] sm:$0xff]  ;;  %v10176_v41 = vld [vmem:[#allocation40_spill] sm:$0xff] }
 0x7e7   : > { %4613 = vmatpush.msrb.mxu0 %v8951_v26  ;;  %v4508_v4 = vpop.permute.xlu1 %4507  ;;  %4713 = vmatpush.msrb.mxu2 %v8999_v20  ;;  %v9977_v10 = vand.u32 4294901760, %v8999_v20 }
 0x7e8   : > { %v9012_v62 = vand.u32 4294901760, %v4501_v28  ;;  %4753 = vmatpush.msrb.mxu3 %v8951_v26  ;;  %v4510_v39 = vsel %vm930_vm7, %v4508_v4, %v8925_v11  ;;  %v4509_v16 = vsel %vm930_vm7, %v8925_v11, %v4508_v4  ;;  %v4663_v11 = vsub.f32 %v8980_v36, %v9975_v58 }
 0x7e9   : > { %v4513_v13 = vmul.f32 %v4510_v39, %v10172_v37  ;;  %4615 = vmatpush.msrb.mxu0 %v8949_v18  ;;  %4716 = vmatpush.msrb.mxu2 %v8969_v6  ;;  %v4651_v47 = vsub.f32 %v8999_v20, %v9977_v10  ;;  %v9980_v4 = vand.u32 4294901760, %v9027_v23  ;;  %v4485_v39 = vsel %vm904_vm6, %v8928_v55, %v8957_v14  ;;  %v10174_v55 = vld [vmem:[#allocation19_spill] sm:$0xff] }
 0x7ea   : > { %4755 = vmatpush.msrb.mxu3 %v8949_v18  ;;  %v9048_v42 = vsub.f32 %v4501_v28, %v9012_v62  ;;  %v9071_v28 = vsub.f32 %v4489_v15, %v9020_v5  ;;  %v4514_v35 = vmul.f32 %v4509_v16, %v10173_v40  ;;  %v9085_v37 = vsub.f32 %v4544_v19, %v9031_v22  ;;  %v10175_v40 = vld [vmem:[#allocation39_spill] sm:$0xff] }
 0x7eb   : > { %v9041_v27 = vand.u32 4294901760, %v4513_v13  ;;  %4617 = vmatpush.msrb.mxu0 %v8930_v9  ;;  %4719 = vmatpush.msrb.mxu2 %v8980_v36  ;;  %v4652_v38 = vand.u32 4294901760, %v4651_v47  ;;  %v4502_v14 = vmul.f32 %v4497_v50, %v10174_v55  ;;  %v4664_v19 = vand.u32 4294901760, %v4663_v11 }
 0x7ec   : > { %4757 = vmatpush.msrb.mxu3 %v8930_v9  ;;  %v4470_v15 = vpop.permute.xlu0 %4469  ;;  %v9983_v44 = vand.u32 4294901760, %v9048_v42  ;;  %v9982_v55 = vand.u32 4294901760, %v9071_v28  ;;  %v4490_v10 = vmul.f32 %v4485_v39, %v10176_v41  ;;  %v9105_v0 = vand.u32 4294901760, %v4514_v35 }
 0x7ed   : > { %4619 = vmatpush.msrb.mxu0 %v9041_v27  ;;  %v9068_v29 = vsub.f32 %v4513_v13, %v9041_v27  ;;  %4722 = vmatpush.msrb.mxu2 %v8939_v1  ;;  %v4658_v13 = vand.u32 4294901760, %v4657_v34  ;;  %v9109_v11 = vand.u32 4294901760, %v4629_v59  ;;  %v9984_v39 = vand.u32 4294901760, %v9085_v37 }
 0x7ee   : > { %4759 = vmatpush.msrb.mxu3 %v9041_v27  ;;  %4653 = vmatpush.msrb.mxu1 %v4652_v38  ;;  %v9981_v38 = vand.u32 4294901760, %v9051_v25  ;;  %v4681_v41 = vsub.f32 %v9048_v42, %v9983_v44 }
 0x7ef   : > { %v4472_v47 = vpop.permute.xlu1 %4471  ;;  %4621 = vmatpush.msrb.mxu0 %v9012_v62  ;;  %v9979_v57 = vand.u32 4294901760, %v9068_v29  ;;  %4725 = vmatpush.msrb.mxu2 %v9068_v29 }
 0x7f0   : > { %v4474_v16 = vsel %vm891_vm9, %v4472_v47, %v4470_v15  ;;  %4761 = vmatpush.msrb.mxu3 %v9012_v62  ;;  %4659 = vmatpush.msrb.mxu1 %v4658_v13  ;;  %v4473_v34 = vsel %vm891_vm9, %v4470_v15, %v4472_v47  ;;  %v4895_v15 = vsub.f32 %v9027_v23, %v9980_v4  ;;  %v9141_v4 = vand.u32 4294901760, %v4490_v10 }
 0x7f1   : > { %v4477_v58 = vmul.f32 %v4474_v16, %v10175_v40  ;;  %4623 = vmatpush.msrb.mxu0 %v9020_v5  ;;  %v4675_v50 = vsub.f32 %v9068_v29, %v9979_v57  ;;  %4728 = vmatpush.msrb.mxu2 %v9048_v42  ;;  %v9120_v16 = vand.u32 4294901760, %v4502_v14  ;;  %v10177_v40 = vld [vmem:[#allocation41_spill] sm:$0xff]  ;;  %v4901_v59 = vsub.f32 %v9051_v25, %v9981_v38 }
 0x7f2   : > { %4763 = vmatpush.msrb.mxu3 %v9020_v5  ;;  %4665 = vmatpush.msrb.mxu1 %v4664_v19  ;;  %v4478_v57 = vmul.f32 %v4473_v34, %v10177_v40  ;;  %v9129_v19 = vsub.f32 %v9008_v31, %v9061_v21  ;;  %v4687_v34 = vsub.f32 %v9071_v28, %v9982_v55  ;;  %v4912_v40 = vand.u32 4294901760, %v9075_v46 }
 0x7f3   : > { %v9114_v13 = vand.u32 4294901760, %v4477_v58  ;;  %v4676_v47 = vand.u32 4294901760, %v4675_v50  ;;  %4731 = vmatpush.msrb.mxu2 %v9071_v28  ;;  %v9144_v38 = vsub.f32 %v4514_v35, %v9105_v0  ;;  %v4896_v17 = vand.u32 4294901760, %v4895_v15 }
 0x7f4   : > { %4671 = vmatpush.msrb.mxu1 %v4670_v49  ;;  %v10178_v31 = vand.u32 4294901760, %v8916_v51  ;;  %v4907_v49 = vsub.f32 %v9085_v37, %v9984_v39  ;;  %v9155_v44 = vsub.f32 %v4502_v14, %v9120_v16  ;;  %v9157_v35 = vand.u32 4294901760, %v4478_v57 }
 0x7f5   : > { %4625 = vmatpush.msrb.mxu0 %v9114_v13  ;;  %v9135_v50 = vsub.f32 %v4477_v58, %v9114_v13  ;;  %4765 = vmatpush.msrb.mxu3 %v9114_v13  ;;  %v4682_v58 = vand.u32 4294901760, %v4681_v41  ;;  %v4902_v15 = vand.u32 4294901760, %v4901_v59  ;;  %v10179_v51 = vand.u32 4294901760, %v8999_v20 }
 0x7f6   : > { %4631 = vmatmul.f32.vlgmr.msrb.gmra.mxu0 %v9109_v11  ;;  %4677 = vmatpush.msrb.mxu1 %v4676_v47  ;;  %v4918_v47 = vand.u32 4294901760, %v9129_v19  ;;  %v4688_v41 = vand.u32 4294901760, %v4687_v34  ;;  %v9168_v39 = vsub.f32 %v4490_v10, %v9141_v4  ;;  %v4924_v59 = vand.u32 4294901760, %v9144_v38 }
 0x7f7   : > { %4783 = vmatpush.msra.mxu0 %v10178_v31  ;;  %v4692_v55 = vand.u32 4294901760, %v9135_v50  ;;  %4897 = vmatpush.msra.mxu3 %v4896_v17  ;;  %v4913_v31 = vsub.f32 %v9075_v46, %v4912_v40  ;;  %v4908_v20 = vand.u32 4294901760, %v4907_v49  ;;  %v9174_v34 = vsub.f32 %v4478_v57, %v9157_v35 }
 0x7f8   : > { %4734 = vmatpush.msrb.mxu2 %v9135_v50  ;;  %4683 = vmatpush.msrb.mxu1 %v4682_v58  ;;  %v10180_v58 = vand.u32 4294901760, %v8969_v6  ;;  %v4919_v10 = vsub.f32 %v9129_v19, %v4918_v47  ;;  %v10181_v49 = vand.u32 4294901760, %v8980_v36  ;;  %v4925_v6 = vsub.f32 %v9144_v38, %v4924_v59 }
 0x7f9   : > { %4787 = vmatpush.msra.mxu0 %v10179_v51  ;;  %v4693_v14 = vsub.f32 %v9135_v50, %v4692_v55  ;;  %4903 = vmatpush.msra.mxu3 %v4902_v15  ;;  %v4930_v50 = vand.u32 4294901760, %v9155_v44  ;;  %v4914_v15 = vand.u32 4294901760, %v4913_v31  ;;  %v4936_v57 = vand.u32 4294901760, %v9168_v39 }
 0x7fa   : > { %4859 = vmatpush.msra.mxu2 %v8987_v52  ;;  %4689 = vmatpush.msrb.mxu1 %v4688_v41  ;;  %v10182_v51 = vand.u32 4294901760, %v8939_v1  ;;  %v4920_v41 = vand.u32 4294901760, %v4919_v10  ;;  %v4942_v31 = vand.u32 4294901760, %v9174_v34 }
 0x7fb   : > { %4737 = vmatmul.f32.vlgmr.msrb.gmra.mxu2 %v8976_v63  ;;  %v4694_v17 = vand.u32 4294901760, %v4693_v14  ;;  %4791 = vmatpush.msra.mxu0 %v10180_v58  ;;  %v4931_v36 = vsub.f32 %v9155_v44, %v4930_v50  ;;  %v10183_v14 = vand.u32 4294901760, %v9068_v29  ;;  %v4937_v1 = vsub.f32 %v9168_v39, %v4936_v57 }
 0x7fc   : > { %4861 = vmatpush.msra.mxu2 %v9010_v61  ;;  %4909 = vmatpush.msra.mxu3 %v4908_v20  ;;  %v4926_v20 = vand.u32 4294901760, %v4925_v6  ;;  %v4943_v58 = vsub.f32 %v9174_v34, %v4942_v31  ;;  %v10185_v29 = vand.u32 4294901760, %v9071_v28 }
 0x7fd   : > { %4695 = vmatpush.msrb.mxu1 %v4694_v17  ;;  %4769 = vmatmul.f32.vlgmr.msrb.gmra.mxu3 %v9004_v2  ;;  %v10184_v17 = vand.u32 4294901760, %v9048_v42 }
 0x7fe   : > { %4795 = vmatpush.msra.mxu0 %v10181_v49  ;;  %4863 = vmatpush.msra.mxu2 %v9031_v22  ;;  %v4944_v42 = vand.u32 4294901760, %v4943_v58 }
 0x7ff   : > { %4915 = vmatpush.msra.mxu3 %v4914_v15  ;;  %4697 = vmatmul.f32.vlgmr.msrb.gmra.mxu1 %v8947_v12 }
 0x800   : > { %4799 = vmatpush.msra.mxu0 %v10182_v51  ;;  %4829 = vmatpush.msra.mxu1 %v8913_v32  ;;  %v4932_v32 = vand.u32 4294901760, %v4931_v36 }
 0x801   : > { %4865 = vmatpush.msra.mxu2 %v9029_v53  ;;  %4921 = vmatpush.msra.mxu3 %v4920_v41 }
 0x802   : > { %4803 = vmatpush.msra.mxu0 %v10183_v14  ;;  %4831 = vmatpush.msra.mxu1 %v8973_v3  ;;  %v4938_v3 = vand.u32 4294901760, %v4937_v1 }
 0x803   : > { %4867 = vmatpush.msra.mxu2 %v9061_v21  ;;  %4927 = vmatpush.msra.mxu3 %v4926_v20 }
 0x804   : > { %4807 = vmatpush.msra.mxu0 %v10184_v17  ;;  %4833 = vmatpush.msra.mxu1 %v8951_v26  ;;  %v10188_v26 = vand.u32 4294901760, %v9085_v37 }
 0x805   : > { %4869 = vmatpush.msra.mxu2 %v9105_v0  ;;  %4933 = vmatpush.msra.mxu3 %v4932_v32 }
 0x806   : > { %4811 = vmatpush.msra.mxu0 %v10185_v29  ;;  %4835 = vmatpush.msra.mxu1 %v8949_v18  ;;  %v10186_v18 = vand.u32 4294901760, %v9027_v23 }
 0x807   : > { %4871 = vmatpush.msra.mxu2 %v9120_v16  ;;  %4939 = vmatpush.msra.mxu3 %v4938_v3 }
 0x808   : > { %4815 = vmatpush.msra.mxu0 %v4692_v55  ;;  %4837 = vmatpush.msra.mxu1 %v8930_v9  ;;  %v10187_v9 = vand.u32 4294901760, %v9051_v25 }
 0x809   : > { %4873 = vmatpush.msra.mxu2 %v9141_v4  ;;  %4945 = vmatpush.msra.mxu3 %v4944_v42 }
 0x80a   : > { %4817 = vmatmul.f32.vlgmr.msra.gmra.mxu0 %v8947_v12  ;;  %4839 = vmatpush.msra.mxu1 %v9041_v27 }
 0x80b   : > { %4960 = vmatpush.msrb.mxu0 %v9027_v23  ;;  %5079 = vmatpush.msrb.mxu3 %v8987_v52 }
 0x80c   : > { %4875 = vmatpush.msra.mxu2 %v9157_v35  ;;  %4841 = vmatpush.msra.mxu1 %v9012_v62 }
 0x80d   : > { %4881 = vmatmul.f32.vlgmr.msra.gmra.mxu2 %v9109_v11  ;;  %4963 = vmatpush.msrb.mxu0 %v9051_v25 }
 0x80e   : > { %5033 = vmatpush.msrb.mxu2 %v10186_v18  ;;  %5081 = vmatpush.msrb.mxu3 %v9010_v61  ;;  %v6338_v18 = vld [vmem:[%s9908_s7 + $0x10] sm:$0xff] }
 0x80f   : > { %4947 = vmatmul.f32.vlgmr.msra.gmra.mxu3 %v8947_v12  ;;  %4966 = vmatpush.msrb.mxu0 %v9085_v37  ;;  %v10193_v37 = vld [vmem:[#allocation34_spill] sm:$0xff] }
 0x810   : > { %5037 = vmatpush.msrb.mxu2 %v10187_v9  ;;  %5083 = vmatpush.msrb.mxu3 %v9031_v22  ;;  %v6339_v9 = vld [vmem:[%s9908_s7 + $0x18] sm:$0xff] }
 0x811   : > { %4843 = vmatpush.msra.mxu1 %v9020_v5  ;;  %4969 = vmatpush.msrb.mxu0 %v9075_v46  ;;  %v4596_v5 = vpop.permute.xlu0 %4595 }
 0x812   : > { %5041 = vmatpush.msrb.mxu2 %v10188_v26  ;;  %5085 = vmatpush.msrb.mxu3 %v9029_v53 }
 0x813   : > { %4845 = vmatpush.msra.mxu1 %v9114_v13  ;;  %4972 = vmatpush.msrb.mxu0 %v9129_v19  ;;  %v10194_v13 = vld [vmem:[#allocation35_spill] sm:$0xff]  ;;  %v10195_v19 = vld [vmem:[#allocation36_spill] sm:$0xff] }
 0x814   : > { %4847 = vmatmul.f32.vlgmr.msra.gmra.mxu1 %v8947_v12  ;;  %5045 = vmatpush.msrb.mxu2 %v4912_v40 }
 0x815   : > { %4999 = vmatpush.msrb.mxu1 %v8987_v52  ;;  %5087 = vmatpush.msrb.mxu3 %v9061_v21  ;;  %v10189_v52 = vld [vmem:[#allocation23_spill] sm:$0xff] }
 0x816   : > { %4975 = vmatpush.msrb.mxu0 %v9144_v38  ;;  %5049 = vmatpush.msrb.mxu2 %v4918_v47 }
 0x817   : > { %5001 = vmatpush.msrb.mxu1 %v9010_v61  ;;  %5089 = vmatpush.msrb.mxu3 %v9105_v0  ;;  %v10190_v61 = vld [vmem:[#allocation29_spill] sm:$0xff] }
 0x818   : > { %4978 = vmatpush.msrb.mxu0 %v9155_v44  ;;  %5053 = vmatpush.msrb.mxu2 %v4924_v59  ;;  %v3300_v44 = vpop.permute.xlu2 %3299 }
 0x819   : > { %5003 = vmatpush.msrb.mxu1 %v9031_v22  ;;  %5091 = vmatpush.msrb.mxu3 %v9120_v16  ;;  %v3612_v40 = vadd.f32 %v10195_v19, %v3300_v44 }
 0x81a   : > { %4981 = vmatpush.msrb.mxu0 %v9168_v39  ;;  %5057 = vmatpush.msrb.mxu2 %v4930_v50 }
 0x81b   : > { %5005 = vmatpush.msrb.mxu1 %v9029_v53  ;;  %5093 = vmatpush.msrb.mxu3 %v9141_v4  ;;  %v10191_v53 = vld [vmem:[#allocation30_spill] sm:$0xff] }
 0x81c   : > { %4984 = vmatpush.msrb.mxu0 %v9174_v34  ;;  %5061 = vmatpush.msrb.mxu2 %v4936_v57  ;;  %v10196_v34 = vld [vmem:[#allocation38_spill] sm:$0xff] }
 0x81d   : > { %5007 = vmatpush.msrb.mxu1 %v9061_v21  ;;  %5095 = vmatpush.msrb.mxu3 %v9157_v35  ;;  %v10192_v21 = vld [vmem:[#allocation31_spill] sm:$0xff]  ;;  %v3659_v10 = vadd.f32 %v10196_v34, %v3612_v40 }
 0x81e   : > { %4987 = vmatmul.f32.vlgmr.msrb.gmra.mxu0 %v8976_v63  ;;  %5065 = vmatpush.msrb.mxu2 %v4942_v31  ;;  %v3360_v63 = vadd.f32 %v10189_v52, %v3300_v44  ;;  %v5203_v52 = vld [vmem:[%s9902_s1 + $0x80] sm:$0xff] }
 0x81f   : > { %5009 = vmatpush.msrb.mxu1 %v9105_v0  ;;  %5067 = vmatmul.f32.vlgmr.msrb.gmra.mxu2 %v8947_v12  ;;  %v3699_v49 = vadd.f32 %v8846_v60, %v3659_v10 }
 0x820   : > { %5097 = vmatmul.f32.vlgmr.msrb.gmra.mxu3 %v8947_v12  ;;  %v3407_v0 = vadd.f32 %v10190_v61, %v3360_v63 }
 0x821   : > { %5011 = vmatpush.msrb.mxu1 %v9120_v16  ;;  %v3741_v51 = vadd.f32 %v8848_v56, %v3699_v49 }
 0x822   : > { %v3447_v22 = vadd.f32 %v10191_v53, %v3407_v0 }
 0x823   : > { %5013 = vmatpush.msrb.mxu1 %v9141_v4  ;;  %v3782_v31 = vadd.f32 %v8850_v33, %v3741_v51  ;;  %v6329_v33 = vld [vmem:[%s9904_s3 + $0x38] sm:$0xff] }
 0x824   : > { %v3489_v28 = vadd.f32 %v10192_v21, %v3447_v22 }
 0x825   : > { %5015 = vmatpush.msrb.mxu1 %v9157_v35  ;;  %v3817_v56 = vadd.f32 %v8854_v48, %v3782_v31  ;;  %v6335_v48 = vld [vmem:[%s9906_s5 + $0x28] sm:$0xff] }
 0x826   : > { %5019 = vmatmul.f32.vlgmr.msrb.gmra.mxu1 %v9004_v2  ;;  %v3530_v38 = vadd.f32 %v10193_v37, %v3489_v28 }
 0x827   : > { %v3828_v29 = vmax.f32 %v3817_v56, 0.0 }
 0x828   : > { %v3565_v39 = vadd.f32 %v10194_v13, %v3530_v38  ;;  %v5179_v13 = vld [vmem:[%s9902_s1 + $0x60] sm:$0xff] }
 0x82a   : > { %v3827_v47 = vmax.f32 %v3565_v39, 0.0 }
 0x873   : > { %v4632_v62 = vpop.f32.mrf.mxu0 }
 0x874   : > { %v4633_v27 = vadd.f32 %v4632_v62, %v4596_v5 }
 0x87c   : > { %v4698_v23 = vpop.f32.mrf.mxu1 }
 0x87d   : > { %v4699_v12 = vadd.f32 %v4698_v23, %v4633_v27 }
 0x87e   : > { %v4738_v25 = vpop.f32.mrf.mxu2 }
 0x87f   : > { %v4739_v4 = vadd.f32 %v4738_v25, %v4699_v12  ;;  %v5155_v25 = vld [vmem:[%s9902_s1 + $0x40] sm:$0xff] }
 0x880   : > { %v4770_v46 = vpop.f32.mrf.mxu3 }
 0x881   : > { %v4771_v55 = vadd.f32 %v4770_v46, %v4739_v4 }
 0x887   : > { %v4818_v2 = vpop.f32.mrf.mxu0 }
 0x888   : > { %v4819_v11 = vadd.f32 %v4818_v2, %v4771_v55  ;;  %v5167_v2 = vld [vmem:[%s9902_s1 + $0x50] sm:$0xff] }
 0x890   : > { %v4882_v15 = vpop.f32.mrf.mxu2 }
 0x891   : > { %v4848_v16 = vpop.f32.mrf.mxu1  ;;  %v4883_v6 = vadd.f32 %v4882_v15, %v4596_v5 }
 0x892   : > { %v4849_v35 = vadd.f32 %v4848_v16, %v4819_v11  ;;  %v4948_v57 = vpop.f32.mrf.mxu3  ;;  %v6334_v11 = vld [vmem:[%s9905_s4 + $0x28] sm:$0xff] }
 0x893   : > { %v4949_v36 = vadd.f32 %v4948_v57, %v4883_v6  ;;  %v5237_v40 = vsel %vm1022_vm4, %v6334_v11, 0 }
 0x894   : > { %v9285_v59 = vmax.f32 %v4849_v35, 0.0  ;;  %v9398_v49 = vand.u32 4294901760, %v5237_v40 }
 0x896   : > { %v9289_v50 = vadd.f32 %v9285_v59, %v3827_v47  ;;  %v5204_v47 = vld [vmem:[%s9902_s1 + $0x88] sm:$0xff] }
 0x898   : > { %5173 = vrot.lane.b32.xlu2 %v9289_v50, %s6412_s18  ;;  %5185 = vrot.lane.b32.xlu0 %v9289_v50, %s6413_s19  ;;  %v5157_v4 = vmul.f32 %v5155_v25, %v9289_v50 }
 0x899   : > { %5197 = vrot.lane.b32.xlu1 %v9289_v50, %s6414_s20 }
 0x89a   : > { %v9371_v38 = vand.u32 4294901760, %v5157_v4 }
 0x89b   : > { %v4988_v41 = vpop.f32.mrf.mxu0 }
 0x89c   : > { %v4989_v14 = vadd.f32 %v4988_v41, %v4949_v36  ;;  %v9385_v19 = vsub.f32 %v5157_v4, %v9371_v38 }
 0x89e   : > { %v9985_v41 = vand.u32 4294901760, %v9385_v19 }
 0x8a0   : > { %5131 = vrot.lane.b32.xlu2 %v9289_v50, %s6415_s21  ;;  %5143 = vrot.lane.b32.xlu0 %v9289_v50, %s6417_s23 }
 0x8a1   : > { %5161 = vrot.lane.b32.xlu1 %v9289_v50, %s6416_s22 }
 0x8a2   : > { %v5068_v60 = vpop.f32.mrf.mxu2 }
 0x8a3   : > { %v5020_v20 = vpop.f32.mrf.mxu1  ;;  %v5098_v17 = vpop.f32.mrf.mxu3 }
 0x8a4   : > { %v5021_v1 = vadd.f32 %v5020_v20, %v4989_v14  ;;  %v5192_v14 = vld [vmem:[%s9902_s1 + $0x78] sm:$0xff] }
 0x8a6   : > { %v5069_v32 = vadd.f32 %v5068_v60, %v5021_v1  ;;  %v5168_v1 = vld [vmem:[%s9902_s1 + $0x58] sm:$0xff] }
 0x8a8   : > { %v5099_v58 = vadd.f32 %v5098_v17, %v5069_v32  ;;  %v5125_v32 = vld [vmem:[%s9902_s1 + $0x10] sm:$0xff] }
 0x8a9   : > { %5119 = vrot.lane.b32.xlu1 %v9289_v50, %s10120_s15 }
 0x8aa   : > { %v9309_v3 = vmax.f32 %v5099_v58, 0.0 }
 0x8ac   : > { %v9312_v42 = vadd.f32 %v9309_v3, %v3828_v29  ;;  %v5180_v29 = vld [vmem:[%s9902_s1 + $0x68] sm:$0xff] }
 0x8ae   : > { %5199 = vrot.lane.b32.xlu2 %v9312_v42, %s6414_s20  ;;  %5175 = vrot.lane.b32.xlu0 %v9312_v42, %s6412_s18  ;;  %s9871_s20 = scalar_lea.vmem [#allocation5], %s6517_s11  ;;  %s10217_s11 = sadd.s32 (%p6495_p5), 4294967295, %s6409_s29  }
 0x8b1   : > { %5187 = vrot.lane.b32.xlu1 %v9312_v42, %s6413_s19 }
 0x8b6   : > { %5163 = vrot.lane.b32.xlu2 %v9312_v42, %s6416_s22  ;;  %5133 = vrot.lane.b32.xlu0 %v9312_v42, %s6415_s21  ;;  %s6346_s22 = sshll.u32 (%p6495_p5), %s10217_s11, 4 }
 0x8b9   : > { %5145 = vrot.lane.b32.xlu1 %v9312_v42, %s6417_s23 }
 0x8be   : > { %5121 = vrot.lane.b32.xlu2 %v9312_v42, %s10120_s15  ;;  %5107 = vrot.lane.b32.xlu0 %v9289_v50, %s6419_s25  ;;  %v5191_v50 = vld [vmem:[%s9902_s1 + $0x70] sm:$0xff]  ;;  %s6228_s15 = scalar_lea.vmem (%p6495_p5), %s9909_s8, %s6346_s22 }
 0x8c1   : > { %5109 = vrot.lane.b32.xlu1 %v9312_v42, %s6419_s25 }
 0x8c6   : > { %3304 = vperm.xlu2 %6381, %v6329_v33   ;;  %5233 = vperm.xlu0 %6380, %v6335_v48  }
 0x8c9   : > { %5761 = vperm.xlu1 %6382, %v6338_v18   ;;  %v5137_v18 = vld [vmem:[%s9902_s1 + $0x20] sm:$0xff] }
 0x8ce   : > { %5766 = vperm.xlu2 %6381, %v6339_v9   ;;  %v9440_v9 = vsub.f32 %v5237_v40, %v9398_v49 }
 0x8d0   : > { %v9469_v11 = vand.u32 4294901760, %v9440_v9 }
 0x8f2   : > { %v5174_v26 = vpop.permute.xlu2 %5173 }
 0x8fa   : > { %v9344_v44 = vpop.permute.xlu2 %5131 }
 0x908   : > { %v5200_v63 = vpop.permute.xlu2 %5199 }
 0x90a   : > { %v5186_v5 = vpop.permute.xlu0 %5185 }
 0x90b   : > { %v5198_v61 = vpop.permute.xlu1 %5197 }
 0x90c   : > { %v5201_v0 = vsel %vm988_vm3, %v5198_v61, %v5200_v63  ;;  %v5202_v34 = vsel %vm988_vm3, %v5200_v63, %v5198_v61 }
 0x90d   : > { %v5205_v62 = vmul.f32 %v5203_v52, %v5201_v0  ;;  %v5206_v36 = vmul.f32 %v5204_v47, %v5202_v34  ;;  %v9448_v0 = vsub.f32 %v9385_v19, %v9985_v41 }
 0x90f   : > { %v9351_v23 = vand.u32 4294901760, %v5205_v62 }
 0x910   : > { %v5164_v46 = vpop.permute.xlu2 %5163 }
 0x911   : > { %v9354_v53 = vsub.f32 %v5205_v62, %v9351_v23  ;;  %5247 = vmatpush.msra.mxu0 %v9351_v23  ;;  %5387 = vmatpush.msra.mxu3 %v9351_v23  ;;  %v9453_v62 = vand.u32 4294901760, %v5206_v36 }
 0x912   : > { %v9366_v28 = vpop.permute.xlu0 %5143 }
 0x913   : > { %v5282_v22 = vand.u32 4294901760, %v9354_v53  ;;  %5348 = vmatpush.msra.mxu2 %v9354_v53  ;;  %v5162_v27 = vpop.permute.xlu1 %5161 }
 0x914   : > { %v5165_v55 = vsel %vm949_vm2, %v5162_v27, %v5164_v46  ;;  %v5166_v17 = vsel %vm949_vm2, %v5164_v46, %v5162_v27  ;;  %v5149_v46 = vld [vmem:[%s9902_s1 + $0x30] sm:$0xff] }
 0x915   : > { %v5283_v12 = vsub.f32 %v9354_v53, %v5282_v22  ;;  %v5169_v39 = vmul.f32 %v5167_v2, %v5165_v55 }
 0x917   : > { %v5284_v21 = vand.u32 4294901760, %v5283_v12  ;;  %v9400_v6 = vand.u32 4294901760, %v5169_v39 }
 0x918   : > { %v9407_v31 = vpop.permute.xlu2 %5121 }
 0x919   : > { %5285 = vmatpush.msra.mxu1 %v5284_v21  ;;  %v9443_v61 = vsub.f32 %v5169_v39, %v9400_v6 }
 0x91b   : > { %v9369_v37 = vpop.permute.xlu1 %5119 }
 0x91c   : > { %v5124_v56 = vsel %vm904_vm6, %v9407_v31, %v9369_v37 }
 0x91d   : > { %v5127_v27 = vmul.f32 %v5125_v32, %v5124_v56  ;;  %v5267_v56 = vsub.f32 %v9440_v9, %v9469_v11 }
 0x91f   : > { %v9484_v47 = vand.u32 4294901760, %v5127_v27 }
 0x920   : > { %v5176_v16 = vpop.permute.xlu0 %5175 }
 0x921   : > { %v5177_v35 = vsel %vm962_vm5, %v5174_v26, %v5176_v16  ;;  %v5178_v33 = vsel %vm962_vm5, %v5176_v16, %v5174_v26  ;;  %v5156_v26 = vld [vmem:[%s9902_s1 + $0x48] sm:$0xff] }
 0x922   : > { %v5181_v10 = vmul.f32 %v5179_v13, %v5177_v35  ;;  %v5182_v25 = vmul.f32 %v5180_v29, %v5178_v33  ;;  %v9472_v13 = vmul.f32 %v5156_v26, %v9312_v42  ;;  %v9986_v35 = vand.u32 4294901760, %v9443_v61  ;;  %v5138_v33 = vld [vmem:[%s9902_s1 + $0x28] sm:$0xff] }
 0x923   : > { %v5188_v15 = vpop.permute.xlu1 %5187 }
 0x924   : > { %v9402_v57 = vand.u32 4294901760, %v5181_v10  ;;  %v5189_v51 = vsel %vm975_vm1, %v5186_v5, %v5188_v15  ;;  %v5190_v20 = vsel %vm975_vm1, %v5188_v15, %v5186_v5  ;;  %v5170_v5 = vmul.f32 %v5168_v1, %v5166_v17 }
 0x925   : > { %v5193_v60 = vmul.f32 %v5191_v50, %v5189_v51  ;;  %v5194_v52 = vmul.f32 %v5192_v14, %v5190_v20  ;;  %v9490_v50 = vsub.f32 %v5206_v36, %v9453_v62  ;;  %v9494_v51 = vand.u32 4294901760, %v5182_v25  ;;  %v5150_v20 = vld [vmem:[%s9902_s1 + $0x38] sm:$0xff] }
 0x926   : > { %v9427_v58 = vsub.f32 %v5181_v10, %v9402_v57  ;;  %v5308_v10 = vand.u32 4294901760, %v9448_v0  ;;  %v9492_v15 = vand.u32 4294901760, %v5170_v5  ;;  %v9527_v29 = vand.u32 4294901760, %v9472_v13 }
 0x927   : > { %v9434_v48 = vand.u32 4294901760, %v5193_v60  ;;  %v9474_v39 = vand.u32 4294901760, %v5194_v52 }
 0x928   : > { %v5134_v63 = vpop.permute.xlu0 %5133  ;;  %v9987_v2 = vand.u32 4294901760, %v9427_v58 }
 0x929   : > { %v5136_v12 = vsel %vm917_vm8, %v5134_v63, %v9344_v44  ;;  %5249 = vmatpush.msra.mxu0 %v9434_v48  ;;  %5389 = vmatpush.msra.mxu3 %v9434_v48  ;;  %v9461_v4 = vsub.f32 %v5193_v60, %v9434_v48  ;;  %v9517_v32 = vsub.f32 %v5194_v52, %v9474_v39 }
 0x92a   : > { %v5139_v21 = vmul.f32 %v5137_v18, %v5136_v12  ;;  %v5295_v14 = vsub.f32 %v9427_v58, %v9987_v2  ;;  %v5135_v18 = vsel %vm917_vm8, %v9344_v44, %v5134_v63  ;;  %v9540_v12 = vsub.f32 %v5127_v27, %v9484_v47  ;;  %v5113_v63 = vld [vmem:[%s9902_s1] sm:$0xff]  ;;  %v5126_v27 = vld [vmem:[%s9902_s1 + $0x18] sm:$0xff] }
 0x92b   : > { %5251 = vmatpush.msra.mxu0 %v9402_v57  ;;  %v5146_v55 = vpop.permute.xlu1 %5145  ;;  %5351 = vmatpush.msra.mxu2 %v9461_v4  ;;  %v5288_v42 = vand.u32 4294901760, %v9461_v4  ;;  %v9989_v41 = vand.u32 4294901760, %v9517_v32 }
 0x92c   : > { %v9476_v16 = vand.u32 4294901760, %v5139_v21  ;;  %5391 = vmatpush.msra.mxu3 %v9402_v57  ;;  %v5148_v40 = vsel %vm930_vm7, %v5146_v55, %v9366_v28  ;;  %v5147_v36 = vsel %vm930_vm7, %v9366_v28, %v5146_v55  ;;  %v5301_v28 = vsub.f32 %v9443_v61, %v9986_v35 }
 0x92d   : > { %v5151_v34 = vmul.f32 %v5149_v46, %v5148_v40  ;;  %5253 = vmatpush.msra.mxu0 %v9400_v6  ;;  %5354 = vmatpush.msra.mxu2 %v9427_v58  ;;  %v5289_v1 = vsub.f32 %v9461_v4, %v5288_v42  ;;  %v9544_v46 = vsub.f32 %v5170_v5, %v9492_v15 }
 0x92e   : > { %5393 = vmatpush.msra.mxu3 %v9400_v6  ;;  %v9514_v17 = vsub.f32 %v5139_v21, %v9476_v16  ;;  %v9988_v21 = vand.u32 4294901760, %v9490_v50  ;;  %v5123_v55 = vsel %vm904_vm6, %v9369_v37, %v9407_v31  ;;  %v5152_v44 = vmul.f32 %v5150_v20, %v5147_v36 }
 0x92f   : > { %v9507_v60 = vand.u32 4294901760, %v5151_v34  ;;  %5255 = vmatpush.msra.mxu0 %v9371_v38  ;;  %5357 = vmatpush.msra.mxu2 %v9443_v61  ;;  %v5290_v52 = vand.u32 4294901760, %v5289_v1  ;;  %v9559_v5 = vsub.f32 %v5182_v25, %v9494_v51  ;;  %v5140_v36 = vmul.f32 %v5138_v33, %v5135_v18 }
 0x930   : > { %5395 = vmatpush.msra.mxu3 %v9371_v38  ;;  %v5108_v40 = vpop.permute.xlu0 %5107  ;;  %v9991_v20 = vand.u32 4294901760, %v9514_v17  ;;  %v5302_v25 = vand.u32 4294901760, %v5301_v28  ;;  %v9990_v18 = vand.u32 4294901760, %v9540_v12  ;;  %v5128_v28 = vmul.f32 %v5126_v27, %v5123_v55 }
 0x931   : > { %5257 = vmatpush.msra.mxu0 %v9507_v60  ;;  %v9537_v26 = vsub.f32 %v5151_v34, %v9507_v60  ;;  %5360 = vmatpush.msra.mxu2 %v9385_v19  ;;  %v5296_v34 = vand.u32 4294901760, %v5295_v14  ;;  %v5114_v14 = vld [vmem:[%s9902_s1 + $0x8] sm:$0xff]  ;;  %v9579_v2 = vand.u32 4294901760, %v5152_v44  ;;  %v5533_v54 = vsub.f32 %v9490_v50, %v9988_v21 }
 0x932   : > { %5397 = vmatpush.msra.mxu3 %v9507_v60  ;;  %5291 = vmatpush.msra.mxu1 %v5290_v52  ;;  %v5319_v55 = vsub.f32 %v9514_v17, %v9991_v20  ;;  %v9992_v27 = vand.u32 4294901760, %v9559_v5  ;;  %v9602_v21 = vsub.f32 %v9472_v13, %v9527_v29  ;;  %v9621_v13 = vpop.permute.xlu2 %3304 }
 0x933   : > { %v5110_v37 = vpop.permute.xlu1 %5109  ;;  %5259 = vmatpush.msra.mxu0 %v9476_v16  ;;  %v5312_v31 = vand.u32 4294901760, %v9537_v26  ;;  %5363 = vmatpush.msra.mxu2 %v9537_v26  ;;  %v5534_v0 = vand.u32 4294901760, %v5533_v54 }
 0x934   : > { %v5112_v1 = vsel %vm891_vm9, %v5110_v37, %v5108_v40  ;;  %5399 = vmatpush.msra.mxu3 %v9476_v16  ;;  %5297 = vmatpush.msra.mxu1 %v5296_v34  ;;  %v5111_v52 = vsel %vm891_vm9, %v5108_v40, %v5110_v37  ;;  %v9583_v34 = vand.u32 4294901760, %v5267_v56  ;;  %v9594_v37 = vand.u32 4294901760, %v5140_v36 }
 0x935   : > { %v5115_v35 = vmul.f32 %v5113_v63, %v5112_v1  ;;  %5261 = vmatpush.msra.mxu0 %v9484_v47  ;;  %v5313_v33 = vsub.f32 %v9537_v26, %v5312_v31  ;;  %5366 = vmatpush.msra.mxu2 %v9514_v17  ;;  %v5116_v1 = vmul.f32 %v5114_v14, %v5111_v52  ;;  %v5550_v52 = vand.u32 4294901760, %v9544_v46  ;;  %v10204_v26 = vld [vmem:[#allocation32_spill] sm:$0xff] }
 0x936   : > { %5401 = vmatpush.msra.mxu3 %v9484_v47  ;;  %5303 = vmatpush.msra.mxu1 %v5302_v25  ;;  %v5539_v56 = vsub.f32 %v9517_v32, %v9989_v41  ;;  %v5325_v14 = vsub.f32 %v9540_v12, %v9990_v18  ;;  %v9617_v41 = vsub.f32 %v5152_v44, %v9579_v2 }
 0x937   : > { %v9588_v63 = vand.u32 4294901760, %v5115_v35  ;;  %v5314_v40 = vand.u32 4294901760, %v5313_v33  ;;  %5369 = vmatpush.msra.mxu2 %v9540_v12  ;;  %v9614_v33 = vand.u32 4294901760, %v5128_v28  ;;  %v9630_v44 = vsub.f32 %v5140_v36, %v9594_v37 }
 0x938   : > { %5309 = vmatpush.msra.mxu1 %v5308_v10  ;;  %v5545_v10 = vsub.f32 %v9559_v5, %v9992_v27  ;;  %v9632_v20 = vand.u32 4294901760, %v5116_v1  ;;  %v5540_v54 = vand.u32 4294901760, %v5539_v56  ;;  %v5326_v53 = vand.u32 4294901760, %v5325_v14 }
 0x939   : > { %5263 = vmatpush.msra.mxu0 %v9588_v63  ;;  %v9608_v25 = vsub.f32 %v5115_v35, %v9588_v63  ;;  %5403 = vmatpush.msra.mxu3 %v9588_v63  ;;  %v5320_v35 = vand.u32 4294901760, %v5319_v55  ;;  %v9643_v55 = vsub.f32 %v5128_v28, %v9614_v33  ;;  %v5562_v56 = vand.u32 4294901760, %v9617_v41 }
 0x93a   : > { %5269 = vmatmul.f32.vlgmr.msra.gmra.mxu0 %v9583_v34  ;;  %5315 = vmatpush.msra.mxu1 %v5314_v40  ;;  %v5556_v40 = vand.u32 4294901760, %v9602_v21  ;;  %v5546_v4 = vand.u32 4294901760, %v5545_v10  ;;  %v9651_v14 = vsub.f32 %v5116_v1, %v9632_v20  ;;  %v10200_v1 = vand.u32 4294901760, %v9443_v61 }
 0x93b   : > { %5421 = vmatpush.msrb.mxu0 %v5282_v22  ;;  %v5330_v18 = vand.u32 4294901760, %v9608_v25  ;;  %5535 = vmatpush.msrb.mxu3 %v5534_v0  ;;  %v5551_v22 = vsub.f32 %v9544_v46, %v5550_v52  ;;  %v10197_v0 = vld [vmem:[#allocation24_spill] sm:$0xff] }
 0x93c   : > { %5372 = vmatpush.msra.mxu2 %v9608_v25  ;;  %5321 = vmatpush.msra.mxu1 %v5320_v35  ;;  %v3368_v27 = vadd.f32 %v10197_v0, %v9621_v13  ;;  %v5557_v28 = vsub.f32 %v9602_v21, %v5556_v40  ;;  %v5568_v35 = vand.u32 4294901760, %v9630_v44  ;;  %v5580_v0 = vand.u32 4294901760, %v9651_v14 }
 0x93d   : > { %5425 = vmatpush.msrb.mxu0 %v5288_v42  ;;  %v5331_v36 = vsub.f32 %v9608_v25, %v5330_v18  ;;  %5541 = vmatpush.msrb.mxu3 %v5540_v54  ;;  %v10198_v25 = vand.u32 4294901760, %v9427_v58  ;;  %v5552_v54 = vand.u32 4294901760, %v5551_v22  ;;  %v5563_v58 = vsub.f32 %v9617_v41, %v5562_v56 }
 0x93e   : > { %5497 = vmatpush.msrb.mxu2 %v9453_v62  ;;  %5327 = vmatpush.msra.mxu1 %v5326_v53  ;;  %v10199_v53 = vld [vmem:[#allocation33_spill] sm:$0xff]  ;;  %v10201_v22 = vand.u32 4294901760, %v9385_v19  ;;  %v5569_v61 = vsub.f32 %v9630_v44, %v5568_v35 }
 0x93f   : > { %5375 = vmatmul.f32.vlgmr.msra.gmra.mxu2 %v9440_v9  ;;  %v5332_v42 = vand.u32 4294901760, %v5331_v36  ;;  %5429 = vmatpush.msrb.mxu0 %v10198_v25  ;;  %v3411_v10 = vadd.f32 %v10199_v53, %v3368_v27  ;;  %v5574_v36 = vand.u32 4294901760, %v9643_v55  ;;  %v5558_v27 = vand.u32 4294901760, %v5557_v28 }
 0x940   : > { %5499 = vmatpush.msrb.mxu2 %v9474_v39  ;;  %5547 = vmatpush.msrb.mxu3 %v5546_v4  ;;  %v10202_v4 = vld [vmem:[#allocation28_spill] sm:$0xff]  ;;  %v5564_v25 = vand.u32 4294901760, %v5563_v58  ;;  %v5570_v28 = vand.u32 4294901760, %v5569_v61  ;;  %v9806_v61 = vand.u32 4294901760, %v8869_v45 }
 0x941   : > { %5333 = vmatpush.msra.mxu1 %v5332_v42  ;;  %5407 = vmatmul.f32.vlgmr.msra.gmra.mxu3 %v9469_v11  ;;  %v3452_v42 = vadd.f32 %v10202_v4, %v3411_v10  ;;  %v5575_v19 = vsub.f32 %v9643_v55, %v5574_v36 }
 0x942   : > { %5433 = vmatpush.msrb.mxu0 %v10200_v1  ;;  %5501 = vmatpush.msrb.mxu2 %v9494_v51  ;;  %v9798_v1 = vand.u32 4294901760, %v9285_v59 }
 0x943   : > { %5553 = vmatpush.msrb.mxu3 %v5552_v54  ;;  %5335 = vmatmul.f32.vlgmr.msra.gmra.mxu1 %v9398_v49  ;;  %v5581_v54 = vsub.f32 %v9651_v14, %v5580_v0  ;;  %v5576_v53 = vand.u32 4294901760, %v5575_v19 }
 0x944   : > { %5437 = vmatpush.msrb.mxu0 %v10201_v22  ;;  %5467 = vmatpush.msrb.mxu1 %v9351_v23  ;;  %v10203_v23 = vand.u32 4294901760, %v9514_v17 }
 0x945   : > { %5503 = vmatpush.msrb.mxu2 %v9492_v15  ;;  %5559 = vmatpush.msrb.mxu3 %v5558_v27  ;;  %v5582_v17 = vand.u32 4294901760, %v5581_v54 }
 0x946   : > { %5441 = vmatpush.msrb.mxu0 %v5312_v31  ;;  %5469 = vmatpush.msrb.mxu1 %v9434_v48  ;;  %v3495_v31 = vadd.f32 %v10204_v26, %v3452_v42  ;;  %v10205_v48 = vand.u32 4294901760, %v9540_v12  ;;  %v5837_v42 = vsub.f32 %v9285_v59, %v9798_v1 }
 0x947   : > { %5505 = vmatpush.msrb.mxu2 %v9527_v29  ;;  %5565 = vmatpush.msrb.mxu3 %v5564_v25 }
 0x948   : > { %5445 = vmatpush.msrb.mxu0 %v10203_v23  ;;  %5471 = vmatpush.msrb.mxu1 %v9402_v57  ;;  %v10206_v57 = vld [vmem:[#allocation37_spill] sm:$0xff]  ;;  %v5838_v59 = vand.u32 4294901760, %v5837_v42 }
 0x949   : > { %5507 = vmatpush.msrb.mxu2 %v9579_v2  ;;  %5571 = vmatpush.msrb.mxu3 %v5570_v28  ;;  %v3534_v10 = vadd.f32 %v10206_v57, %v3495_v31  ;;  %v5843_v28 = vsub.f32 %v8869_v45, %v9806_v61 }
 0x94a   : > { %5449 = vmatpush.msrb.mxu0 %v10205_v48  ;;  %5473 = vmatpush.msrb.mxu1 %v9400_v6  ;;  %v10208_v6 = vld [vmem:[#allocation6_spill] sm:$0xff] }
 0x94b   : > { %5509 = vmatpush.msrb.mxu2 %v9594_v37  ;;  %5577 = vmatpush.msrb.mxu3 %v5576_v53  ;;  %v3569_v12 = vadd.f32 %v10208_v6, %v3534_v10  ;;  %v5844_v45 = vand.u32 4294901760, %v5843_v28  ;;  %v5839_v6 = vsub.f32 %v5837_v42, %v5838_v59 }
 0x94c   : > { %5453 = vmatpush.msrb.mxu0 %v5330_v18  ;;  %5475 = vmatpush.msrb.mxu1 %v9371_v38  ;;  %v10207_v38 = vand.u32 4294901760, %v9490_v50 }
 0x94d   : > { %5511 = vmatpush.msrb.mxu2 %v9614_v33  ;;  %5583 = vmatpush.msrb.mxu3 %v5582_v17  ;;  %v3829_v18 = vmax.f32 %v3569_v12, 0.0 }
 0x94e   : > { %5455 = vmatmul.f32.vlgmr.msrb.gmra.mxu0 %v9398_v49  ;;  %5477 = vmatpush.msrb.mxu1 %v9507_v60  ;;  %v10209_v60 = vand.u32 4294901760, %v9517_v32 }
 0x94f   : > { %5598 = vmatpush.msra.mxu0 %v9490_v50  ;;  %5717 = vmatpush.msra.mxu3 %v9453_v62  ;;  %v10210_v50 = vand.u32 4294901760, %v9559_v5 }
 0x950   : > { %5513 = vmatpush.msrb.mxu2 %v9632_v20  ;;  %5479 = vmatpush.msrb.mxu1 %v9476_v16  ;;  %v9731_v16 = vand.u32 4294901760, %v3829_v18 }
 0x951   : > { %5519 = vmatmul.f32.vlgmr.msrb.gmra.mxu2 %v9583_v34  ;;  %5601 = vmatpush.msra.mxu0 %v9517_v32 }
 0x952   : > { %5671 = vmatpush.msra.mxu2 %v10207_v38  ;;  %5719 = vmatpush.msra.mxu3 %v9474_v39 }
 0x953   : > { %5585 = vmatmul.f32.vlgmr.msrb.gmra.mxu3 %v9398_v49  ;;  %5604 = vmatpush.msra.mxu0 %v9559_v5 }
 0x954   : > { %5675 = vmatpush.msra.mxu2 %v10209_v60  ;;  %5721 = vmatpush.msra.mxu3 %v9494_v51 }
 0x955   : > { %5481 = vmatpush.msrb.mxu1 %v9484_v47  ;;  %5607 = vmatpush.msra.mxu0 %v9544_v46  ;;  %v5234_v46 = vpop.permute.xlu0 %5233 }
 0x956   : > { %5679 = vmatpush.msra.mxu2 %v10210_v50  ;;  %5723 = vmatpush.msra.mxu3 %v9492_v15 }
 0x957   : > { %5483 = vmatpush.msrb.mxu1 %v9588_v63  ;;  %5610 = vmatpush.msra.mxu0 %v9602_v21 }
 0x958   : > { %5485 = vmatmul.f32.vlgmr.msrb.gmra.mxu1 %v9398_v49  ;;  %5683 = vmatpush.msra.mxu2 %v5550_v52 }
 0x959   : > { %5637 = vmatpush.msra.mxu1 %v9453_v62  ;;  %5725 = vmatpush.msra.mxu3 %v9527_v29  ;;  %v9744_v62 = vsub.f32 %v3829_v18, %v9731_v16  ;;  %v5845_v18 = vsub.f32 %v5843_v28, %v5844_v45 }
 0x95a   : > { %5613 = vmatpush.msra.mxu0 %v9617_v41  ;;  %5687 = vmatpush.msra.mxu2 %v5556_v40 }
 0x95b   : > { %5639 = vmatpush.msra.mxu1 %v9474_v39  ;;  %5727 = vmatpush.msra.mxu3 %v9579_v2  ;;  %v5826_v41 = vand.u32 4294901760, %v9744_v62  ;;  %v10211_v39 = vld [vmem:[#allocation8_spill] sm:$0xff] }
 0x95c   : > { %5616 = vmatpush.msra.mxu0 %v9630_v44  ;;  %5691 = vmatpush.msra.mxu2 %v5562_v56  ;;  %v3620_v47 = vadd.f32 %v10211_v39, %v9621_v13  ;;  %v6337_v44 = vld [vmem:[%s9907_s6 + $0x18] sm:$0xff]  ;;  %v5840_v39 = vand.u32 4294901760, %v5839_v6 }
 0x95d   : > { %5641 = vmatpush.msra.mxu1 %v9494_v51  ;;  %5729 = vmatpush.msra.mxu3 %v9594_v37  ;;  %v5773_v56 = vsel %vm2830_vm10, %v6337_v44, 0 }
 0x95e   : > { %5619 = vmatpush.msra.mxu0 %v9643_v55  ;;  %5695 = vmatpush.msra.mxu2 %v5568_v35  ;;  %v9803_v27 = vand.u32 4294901760, %v5773_v56 }
 0x95f   : > { %5643 = vmatpush.msra.mxu1 %v9492_v15  ;;  %5731 = vmatpush.msra.mxu3 %v9614_v33  ;;  %v10212_v15 = vld [vmem:[#allocation9_spill] sm:$0xff] }
 0x960   : > { %5622 = vmatpush.msra.mxu0 %v9651_v14  ;;  %5699 = vmatpush.msra.mxu2 %v5574_v36  ;;  %v3663_v51 = vadd.f32 %v10212_v15, %v3620_v47  ;;  %v9814_v23 = vsub.f32 %v5773_v56, %v9803_v27  ;;  %v5846_v47 = vand.u32 4294901760, %v5845_v18 }
 0x961   : > { %5645 = vmatpush.msra.mxu1 %v9527_v29  ;;  %5733 = vmatpush.msra.mxu3 %v9632_v20 }
 0x962   : > { %5625 = vmatmul.f32.vlgmr.msra.gmra.mxu0 %v9440_v9  ;;  %5703 = vmatpush.msra.mxu2 %v5580_v0  ;;  %v5827_v9 = vsub.f32 %v9744_v62, %v5826_v41  ;;  %v3704_v32 = vadd.f32 %v8852_v30, %v3663_v51  ;;  %v9825_v17 = vand.u32 4294901760, %v9814_v23 }
 0x963   : > { %5788 = vmatpush.msrb.mxu0 %v9731_v16  ;;  %5905 = vmatpush.msrb.mxu3 %v9731_v16 }
 0x964   : > { %5647 = vmatpush.msra.mxu1 %v9579_v2  ;;  %5871 = vmatpush.msrb.mxu2 %v9744_v62  ;;  %v5828_v2 = vand.u32 4294901760, %v5827_v9  ;;  %v5806_v50 = vsub.f32 %v9814_v23, %v9825_v17 }
 0x965   : > { %5735 = vmatmul.f32.vlgmr.msra.gmra.mxu3 %v9398_v49  ;;  %5705 = vmatmul.f32.vlgmr.msra.gmra.mxu2 %v9398_v49  ;;  %v3747_v49 = vadd.f32 %v8856_v7, %v3704_v32 }
 0x966   : > { %5649 = vmatpush.msra.mxu1 %v9594_v37  ;;  %v5807_v62 = vand.u32 4294901760, %v5806_v50 }
 0x967   : > { %v3786_v29 = vadd.f32 %v8859_v24, %v3747_v49 }
 0x968   : > { %5651 = vmatpush.msra.mxu1 %v9614_v33 }
 0x96a   : > { %5653 = vmatpush.msra.mxu1 %v9632_v20  ;;  %v6336_v20 = vld [vmem:[%s9907_s6 + $0x10] sm:$0xff] }
 0x96b   : > { %5657 = vmatmul.f32.vlgmr.msra.gmra.mxu1 %v9469_v11  ;;  %v3821_v11 = vadd.f32 %v8862_v8, %v3786_v29  ;;  %v5770_v37 = vsel %vm2830_vm10, %v6336_v20, 0 }
 0x96c   : > { %5829 = vmatpush.msrb.mxu1 %v5828_v2  ;;  %v9783_v30 = vand.u32 4294901760, %v5770_v37 }
 0x96d   : > { %v3830_v33 = vmax.f32 %v3821_v11, 0.0 }
 0x96e   : > { %v9791_v55 = vsub.f32 %v5770_v37, %v9783_v30 }
 0x96f   : > { %v9785_v24 = vand.u32 4294901760, %v3830_v33 }
 0x970   : > { %v9801_v36 = vand.u32 4294901760, %v9791_v55 }
 0x971   : > { %v9795_v35 = vsub.f32 %v3830_v33, %v9785_v24 }
 0x972   : > { %v5798_v25 = vsub.f32 %v9791_v55, %v9801_v36 }
 0x973   : > { %v6042_v4 = vand.u32 4294901760, %v9795_v35 }
 0x974   : > { %v9821_v31 = vand.u32 4294901760, %v5798_v25 }
 0x975   : > { %v6043_v26 = vsub.f32 %v9795_v35, %v6042_v4 }
 0x977   : > { %v6044_v57 = vand.u32 4294901760, %v6043_v26  ;;  %v10213_v26 = vld [vmem:[#allocation22_spill] sm:$0xff] }
 0x9b7   : > { %v5270_v21 = vpop.f32.mrf.mxu0 }
 0x9b8   : > { %v5271_v34 = vadd.f32 %v5270_v21, %v5234_v46  ;;  %v6007_v21 = vand.u32 4294901760, %v9309_v3 }
 0x9ba   : > { %v6053_v11 = vsub.f32 %v9309_v3, %v6007_v21 }
 0x9bc   : > { %v6054_v37 = vand.u32 4294901760, %v6053_v11 }
 0x9c0   : > { %v5336_v5 = vpop.f32.mrf.mxu1 }
 0x9c1   : > { %v5337_v63 = vadd.f32 %v5336_v5, %v5271_v34  ;;  %v6009_v5 = vand.u32 4294901760, %v8880_v43 }
 0x9c2   : > { %v5376_v52 = vpop.f32.mrf.mxu2 }
 0x9c3   : > { %v5377_v7 = vadd.f32 %v5376_v52, %v5337_v63 }
 0x9c4   : > { %v5408_v13 = vpop.f32.mrf.mxu3 }
 0x9c5   : > { %v5409_v8 = vadd.f32 %v5408_v13, %v5377_v7  ;;  %v6055_v7 = vsub.f32 %v6053_v11, %v6054_v37 }
 0x9c7   : > { %v6056_v44 = vand.u32 4294901760, %v6055_v7  ;;  %v10216_v7 = vld [vmem:[#allocation26_spill] sm:$0xff] }
 0x9cb   : > { %v5456_v40 = vpop.f32.mrf.mxu0 }
 0x9cc   : > { %v5457_v14 = vadd.f32 %v5456_v40, %v5409_v8 }
 0x9d4   : > { %v5520_v48 = vpop.f32.mrf.mxu2 }
 0x9d5   : > { %v5486_v58 = vpop.f32.mrf.mxu1  ;;  %v5521_v38 = vadd.f32 %v5520_v48, %v5234_v46 }
 0x9d6   : > { %v5487_v22 = vadd.f32 %v5486_v58, %v5457_v14  ;;  %v5586_v12 = vpop.f32.mrf.mxu3  ;;  %v5762_v14 = vpop.permute.xlu1 %5761 }
 0x9d7   : > { %v5587_v2 = vadd.f32 %v5586_v12, %v5521_v38  ;;  %v10214_v38 = vld [vmem:[#allocation25_spill] sm:$0xff] }
 0x9d8   : > { %v5739_v0 = vmax.f32 %v5487_v22, 0.0 }
 0x9da   : > { %v5789_v19 = vand.u32 4294901760, %v5739_v0 }
 0x9dc   : > { %v5831_v54 = vsub.f32 %v5739_v0, %v5789_v19  ;;  %5790 = vmatpush.msrb.mxu0 %v5789_v19  ;;  %5907 = vmatpush.msrb.mxu3 %v5789_v19 }
 0x9de   : > { %5792 = vmatpush.msrb.mxu0 %v9798_v1  ;;  %5874 = vmatpush.msrb.mxu2 %v5831_v54  ;;  %v5832_v53 = vand.u32 4294901760, %v5831_v54 }
 0x9df   : > { %5909 = vmatpush.msrb.mxu3 %v9798_v1  ;;  %v5626_v9 = vpop.f32.mrf.mxu0 }
 0x9e0   : > { %5794 = vmatpush.msrb.mxu0 %v9806_v61  ;;  %5877 = vmatpush.msrb.mxu2 %v5837_v42  ;;  %v5833_v10 = vsub.f32 %v5831_v54, %v5832_v53 }
 0x9e1   : > { %5911 = vmatpush.msrb.mxu3 %v9806_v61  ;;  %5800 = vmatmul.f32.vlgmr.msrb.gmra.mxu0 %v9821_v31 }
 0x9e2   : > { %5940 = vmatpush.msra.mxu0 %v5826_v41  ;;  %v5834_v60 = vand.u32 4294901760, %v5833_v10  ;;  %5880 = vmatpush.msrb.mxu2 %v5843_v28  ;;  %v5627_v41 = vadd.f32 %v5626_v9, %v5587_v2 }
 0x9e3   : > { %6045 = vmatpush.msra.mxu3 %v6044_v57  ;;  %5883 = vmatmul.f32.vlgmr.msrb.gmra.mxu2 %v9791_v55 }
 0x9e4   : > { %5915 = vmatmul.f32.vlgmr.msrb.gmra.mxu3 %v9801_v36  ;;  %5944 = vmatpush.msra.mxu0 %v5832_v53 }
 0x9e5   : > { %6004 = vmatpush.msra.mxu2 %v9785_v24  ;;  %5835 = vmatpush.msrb.mxu1 %v5834_v60 }
 0x9e6   : > { %5948 = vmatpush.msra.mxu0 %v5838_v59 }
 0x9e7   : > { %5841 = vmatpush.msrb.mxu1 %v5840_v39 }
 0x9e8   : > { %v5658_v15 = vpop.f32.mrf.mxu1  ;;  %5952 = vmatpush.msra.mxu0 %v5844_v45  ;;  %v5706_v32 = vpop.f32.mrf.mxu2 }
 0x9e9   : > { %v5659_v51 = vadd.f32 %v5658_v15, %v5627_v41  ;;  %5847 = vmatpush.msrb.mxu1 %v5846_v47  ;;  %5808 = vmatmul.f32.gmra.mxu0 %v5807_v62  ;;  %v5736_v49 = vpop.f32.mrf.mxu3 }
 0x9ea   : > { %6087 = vmatpush.msrb.mxu0 %v9795_v35  ;;  %5849 = vmatmul.f32.vlgmr.msrb.gmra.mxu1 %v9783_v30 }
 0x9eb   : > { %v5707_v29 = vadd.f32 %v5706_v32, %v5659_v51  ;;  %5975 = vmatpush.msra.mxu1 %v9731_v16  ;;  %5888 = vmatmul.f32.gmra.mxu2 %v9814_v23  ;;  %v6059_v16 = vsub.f32 %v8880_v43, %v6009_v5 }
 0x9ec   : > { %5921 = vmatmul.f32.gmra.mxu3 %v9825_v17 }
 0x9ed   : > { %v5737_v46 = vadd.f32 %v5736_v49, %v5707_v29  ;;  %5977 = vmatpush.msra.mxu1 %v5789_v19  ;;  %v6060_v3 = vand.u32 4294901760, %v6059_v16 }
 0x9ef   : > { %v5740_v20 = vmax.f32 %v5737_v46, 0.0  ;;  %5979 = vmatpush.msra.mxu1 %v9798_v1  ;;  %v6061_v13 = vsub.f32 %v6059_v16, %v6060_v3 }
 0x9f1   : > { %v6005_v34 = vand.u32 4294901760, %v5740_v20  ;;  %5981 = vmatpush.msra.mxu1 %v9806_v61  ;;  %5954 = vmatmul.f32.vlgmr.msra.gmra.mxu0 %v9783_v30  ;;  %v6062_v40 = vand.u32 4294901760, %v6061_v13 }
 0x9f2   : > { %5853 = vmatmul.f32.gmra.mxu1 %v9803_v27 }
 0x9f3   : > { %6121 = vmatpush.msrb.mxu1 %v9785_v24  ;;  %v6047_v63 = vsub.f32 %v5740_v20, %v6005_v34  ;;  %6006 = vmatpush.msra.mxu2 %v6005_v34 }
 0x9f5   : > { %6123 = vmatpush.msrb.mxu1 %v6005_v34  ;;  %6008 = vmatpush.msra.mxu2 %v6007_v21  ;;  %v6048_v52 = vand.u32 4294901760, %v6047_v63 }
 0x9f6   : > { %6090 = vmatpush.msrb.mxu0 %v6047_v63 }
 0x9f7   : > { %6125 = vmatpush.msrb.mxu1 %v6007_v21  ;;  %6010 = vmatpush.msra.mxu2 %v6009_v5  ;;  %v6049_v33 = vsub.f32 %v6047_v63, %v6048_v52 }
 0x9f8   : > { %6093 = vmatpush.msrb.mxu0 %v6053_v11  ;;  %6016 = vmatmul.f32.vlgmr.msra.gmra.mxu2 %v9821_v31 }
 0x9f9   : > { %6127 = vmatpush.msrb.mxu1 %v6009_v5  ;;  %6156 = vmatpush.msrb.mxu2 %v6042_v4  ;;  %v6050_v43 = vand.u32 4294901760, %v6049_v33 }
 0x9fa   : > { %6096 = vmatpush.msrb.mxu0 %v6059_v16  ;;  %5983 = vmatmul.f32.vlgmr.msra.gmra.mxu1 %v9783_v30 }
 0x9fb   : > { %5958 = vmatmul.f32.gmra.mxu0 %v9803_v27  ;;  %6160 = vmatpush.msrb.mxu2 %v6048_v52 }
 0x9fc   : > { %6051 = vmatpush.msra.mxu3 %v6050_v43 }
 0x9fd   : > { %6164 = vmatpush.msrb.mxu2 %v6054_v37 }
 0x9fe   : > { %6057 = vmatpush.msra.mxu3 %v6056_v44 }
 0x9ff   : > { %6168 = vmatpush.msrb.mxu2 %v6060_v3 }
 0xa00   : > { %6063 = vmatpush.msra.mxu3 %v6062_v40  ;;  %6024 = vmatmul.f32.gmra.mxu2 %v5807_v62 }
 0xa01   : > { %6065 = vmatmul.f32.vlgmr.msra.gmra.mxu3 %v9783_v30 }
 0xa02   : > { %6191 = vmatpush.msrb.mxu3 %v9785_v24  ;;  %5987 = vmatmul.f32.gmra.mxu1 %v9803_v27 }
 0xa03   : > { %6099 = vmatmul.f32.vlgmr.msrb.gmra.mxu0 %v9791_v55 }
 0xa04   : > { %6193 = vmatpush.msrb.mxu3 %v6005_v34  ;;  %v10215_v34 = vld [vmem:[#allocation27_spill] sm:$0xff] }
 0xa06   : > { %6195 = vmatpush.msrb.mxu3 %v6007_v21 }
 0xa08   : > { %6197 = vmatpush.msrb.mxu3 %v6009_v5  ;;  %6170 = vmatmul.f32.vlgmr.msrb.gmra.mxu2 %v9783_v30 }
 0xa09   : > { %6069 = vmatmul.f32.gmra.mxu3 %v9803_v27 }
 0xa0a   : > { %6131 = vmatmul.f32.vlgmr.msrb.gmra.mxu1 %v9801_v36  ;;  %v5767_v36 = vpop.permute.xlu2 %5766 }
 0xa0b   : > { %6104 = vmatmul.f32.gmra.mxu0 %v9814_v23 }
 0xa10   : > { %6174 = vmatmul.f32.gmra.mxu2 %v9803_v27 }
 0xa11   : > { %6199 = vmatmul.f32.vlgmr.msrb.gmra.mxu3 %v9783_v30 }
 0xa12   : > { %6137 = vmatmul.f32.gmra.mxu1 %v9825_v17 }
 0xa19   : > { %6203 = vmatmul.f32.gmra.mxu3 %v9803_v27 }
 0xa5e   : > { %v5801_v24 = vpop.f32.mrf.mxu0 }
 0xa5f   : > { %v5802_v35 = vadd.f32 %v5801_v24, %v5762_v14 }
 0xa66   : > { %v5809_v8 = vpop.f32.mrf.mxu0  ;;  %v5884_v56 = vpop.f32.mrf.mxu2 }
 0xa67   : > { %v5850_v55 = vpop.f32.mrf.mxu1  ;;  %v5916_v58 = vpop.f32.mrf.mxu3  ;;  %v5810_v42 = vadd.f32 %v5809_v8, %v5767_v36 }
 0xa68   : > { %v5851_v1 = vadd.f32 %v5850_v55, %v5802_v35 }
 0xa6a   : > { %v5885_v61 = vadd.f32 %v5884_v56, %v5851_v1 }
 0xa6c   : > { %v5917_v30 = vadd.f32 %v5916_v58, %v5885_v61 }
 0xa6e   : > { %v5889_v0 = vpop.f32.mrf.mxu2  ;;  %v5955_v4 = vpop.f32.mrf.mxu0 }
 0xa6f   : > { %v5854_v22 = vpop.f32.mrf.mxu1  ;;  %v5956_v19 = vadd.f32 %v5955_v4, %v5917_v30  ;;  %v5922_v54 = vpop.f32.mrf.mxu3 }
 0xa70   : > { %v5855_v25 = vadd.f32 %v5854_v22, %v5810_v42 }
 0xa72   : > { %v5890_v27 = vadd.f32 %v5889_v0, %v5855_v25 }
 0xa74   : > { %v5923_v53 = vadd.f32 %v5922_v54, %v5890_v27 }
 0xa77   : > { %v5984_v23 = vpop.f32.mrf.mxu1 }
 0xa78   : > { %v5985_v28 = vadd.f32 %v5984_v23, %v5956_v19  ;;  %v5959_v48 = vpop.f32.mrf.mxu0 }
 0xa79   : > { %v5960_v45 = vadd.f32 %v5959_v48, %v5923_v53 }
 0xa7a   : > { %v6207_v31 = vadd.f32 %v5985_v28, %v10213_v26 }
 0xa7b   : > { %v6017_v59 = vpop.f32.mrf.mxu2 }
 0xa7c   : > { %v6211_v17 = vmax.f32 %v6207_v31, 0.0  ;;  %v6018_v50 = vadd.f32 %v6017_v59, %v5762_v14 }
 0xa7e   : > { %6215 = vst [vmem:[%s9871_s20] sm:$0xff] %v6211_v17 }
 0xa7f   : > { %v5988_v57 = vpop.f32.mrf.mxu1 }
 0xa80   : > { %v5989_v10 = vadd.f32 %v5988_v57, %v5960_v45  ;;  %v6100_v9 = vpop.f32.mrf.mxu0 }
 0xa82   : > { %v6209_v6 = vadd.f32 %v5989_v10, %v10214_v38 }
 0xa83   : > { %v6025_v12 = vpop.f32.mrf.mxu2 }
 0xa84   : > { %v6066_v60 = vpop.f32.mrf.mxu3  ;;  %v6213_v18 = vmax.f32 %v6209_v6, 0.0  ;;  %v6026_v47 = vadd.f32 %v6025_v12, %v5767_v36 }
 0xa85   : > { %v6067_v2 = vadd.f32 %v6066_v60, %v6018_v50  ;;  %v6241_v44 = vld [vmem:[%s9871_s20] sm:$0xff] (%p6495_p5) }
 0xa86   : > { %6217 = vst [vmem:[%s9871_s20 + $0x10] sm:$0xff] %v6213_v18 }
 0xa87   : > { %v6132_v39 = vpop.f32.mrf.mxu1  ;;  %v6101_v62 = vadd.f32 %v6100_v9, %v6067_v2  ;;  %6242 = vst [vmem:[%s6228_s15] sm:$0xff] (%p6495_p5), %v6241_v44 }
 0xa88   : > { %v6105_v49 = vpop.f32.mrf.mxu0 }
 0xa89   : > { %v6133_v51 = vadd.f32 %v6132_v39, %v6101_v62 }
 0xa8b   : > { %v6171_v15 = vpop.f32.mrf.mxu2 }
 0xa8c   : > { %v6070_v41 = vpop.f32.mrf.mxu3  ;;  %v6172_v29 = vadd.f32 %v6171_v15, %v6133_v51 }
 0xa8d   : > { %v6071_v32 = vadd.f32 %v6070_v41, %v6026_v47  ;;  %v6245_v24 = vld [vmem:[%s9871_s20 + $0x10] sm:$0xff] (%p6495_p5) }
 0xa8e   : > { %6246 = vst [vmem:[%s6228_s15 + $0x20] sm:$0xff] (%p6495_p5), %v6245_v24 }
 0xa8f   : > { %v6106_v21 = vadd.f32 %v6105_v49, %v6071_v32  ;;  %v6138_v46 = vpop.f32.mrf.mxu1 }
 0xa91   : > { %v6139_v11 = vadd.f32 %v6138_v46, %v6106_v21 }
 0xa93   : > { %v6175_v63 = vpop.f32.mrf.mxu2 }
 0xa94   : > { %v6200_v5 = vpop.f32.mrf.mxu3  ;;  %v6176_v52 = vadd.f32 %v6175_v63, %v6139_v11 }
 0xa95   : > { %v6201_v20 = vadd.f32 %v6200_v5, %v6172_v29 }
 0xa97   : > { %v6208_v16 = vadd.f32 %v6201_v20, %v10215_v34 }
 0xa99   : > { %v6212_v37 = vmax.f32 %v6208_v16, 0.0 }
 0xa9b   : > { %6216 = vst [vmem:[%s9871_s20 + $0x8] sm:$0xff] %v6212_v37 }
 0xa9c   : > { %v6204_v3 = vpop.f32.mrf.mxu3 }
 0xa9d   : > { %v6205_v33 = vadd.f32 %v6204_v3, %v6176_v52 }
 0xa9f   : > { %v6210_v43 = vadd.f32 %v6205_v33, %v10216_v7  ;;  %6225 = sbr.rel (!%p6495_p5) target bundleno = 2732 (0xaac), region = 79 }
 0xaa1   : > { %v6214_v13 = vmax.f32 %v6210_v43, 0.0 }
 0xaa2   : > { %v6243_v40 = vld [vmem:[%s9871_s20 + $0x8] sm:$0xff] (%p6495_p5) }
 0xaa3   : > { %6218 = vst [vmem:[%s9871_s20 + $0x18] sm:$0xff] %v6214_v13 }
 0xaa4   : > { %6244 = vst [vmem:[%s6228_s15 + $0x8] sm:$0xff] %v6243_v40 }
 0xaaa   : > { %v6247_v55 = vld [vmem:[%s9871_s20 + $0x18] sm:$0xff] }
 0xaab   : > { %6248 = vst [vmem:[%s6228_s15 + $0x28] sm:$0xff] %v6247_v55 }
 0xaac PF: > { %p15_p10 = scmp.ge.s32.totalorder %s6482_s9, 4   ;;  %s10218_s27 = smov %s6405_s28 }
 0xaad   : > { %s10219_s28 = smov %s6493_s12  ;;  %s10220_s29 = smov %s6482_s9 }
 0xaae   :  { %17 = sbr.rel (!%p15_p10) target bundleno = 2 (0x2), region = 147 }

</bundles_post_ra>
